<compile_context>
chip_gen: v5e
topology: v5e:2x2
jax: 0.10.0
libtpu: 0.0.40
codegen_flags: <defaults>
</compile_context>

<pallas_src>
import functools
import math

import numpy as np
import jax
import jax.numpy as jnp
from jax import lax
from jax.experimental import pallas as pl
from jax.experimental.pallas import tpu as pltpu

GN_EPS = 1e-5  # PyTorch GroupNorm default eps


# ----------------------------------------------------------------------------
# Kernel
# ----------------------------------------------------------------------------
def ema_kernel(x_ref, p_ref, e_ref, w1_ref, b1_ref, w3_ref, b3_ref,
               gnw_ref, gnb_ref, g_ref, mask_ref, o_ref, *, w, cg):
    f32 = jnp.float32
    X = x_ref[...].astype(f32)                      # (R, hw), lane-dense planes
    R, hw = X.shape

    # Mean-over-lanes expressed as an MXU matmul (keeps the XLU free for rolls).
    mean_col = jnp.full((hw, 1), 1.0 / hw, f32)

    # --- directional pooling: lanes -> [h means over W | w means over H] -----
    pooled = jnp.dot(X, p_ref[...], preferred_element_type=f32)        # (R, h+w)

    # --- 1x1 conv over channels, batched across BG samples (block-diag W) ----
    hwv = jnp.dot(w1_ref[...], pooled, preferred_element_type=f32) + b1_ref[...]
    sig = jax.nn.sigmoid(hwv)                                          # (R, h+w)

    # --- fused gate expansion: one matmul -> [row gate | col gate] -----------
    gates = jnp.dot(sig, e_ref[...], preferred_element_type=f32)       # (R, 2hw)
    mod = X * gates[:, :hw] * gates[:, hw:]

    # --- GroupNorm(cg, cg): per-(sample,channel) stats over hw lanes (MXU) ---
    mu = jnp.dot(mod, mean_col, preferred_element_type=f32)            # (R, 1)
    ex2 = jnp.dot(mod * mod, mean_col, preferred_element_type=f32)
    var = jnp.maximum(ex2 - mu * mu, 0.0)
    x1 = (mod - mu) * lax.rsqrt(var + GN_EPS) * gnw_ref[...] + gnb_ref[...]

    # --- conv3x3 (pad 1): 9 rolled+masked taps, accumulated block-diag matmuls
    acc = None
    t = 0
    for dy in (-1, 0, 1):
        for dx in (-1, 0, 1):
            k = dy * w + dx
            tap = X if k == 0 else pltpu.roll(X, shift=(-k) % hw, axis=1)
            if k != 0:                               # centre tap needs no mask
                tap = tap * mask_ref[t]              # (1, hw) edge-validity mask
            term = jnp.dot(w3_ref[t], tap, preferred_element_type=f32)
            acc = term if acc is None else acc + term
            t += 1
    x2 = acc + b3_ref[...]                                             # (R, hw)

    # --- cross-branch channel attention (softmax over cg channels / sample) --
    m1 = jnp.dot(x1, mean_col, preferred_element_type=f32)             # (R, 1)
    m2 = jnp.dot(x2, mean_col, preferred_element_type=f32)
    G = g_ref[...]                                   # (R, R) block-of-ones / sample
    inv_cg = 1.0 / cg
    # Per-sample mean centering: exactly softmax-invariant and (unlike the old
    # block-wide max) every sample keeps at least one exp() >= 1 -> no 0/0 NaN.
    e1 = jnp.exp(m1 - jnp.dot(G, m1, preferred_element_type=f32) * inv_cg)
    e2 = jnp.exp(m2 - jnp.dot(G, m2, preferred_element_type=f32) * inv_cg)
    a1 = e1 / jnp.dot(G, e1, preferred_element_type=f32)
    a2 = e2 / jnp.dot(G, e2, preferred_element_type=f32)
    mix = a1 * x2 + a2 * x1
    wts = jnp.dot(G, mix, preferred_element_type=f32)                  # (R, hw)

    o_ref[...] = (X * jax.nn.sigmoid(wts)).astype(o_ref.dtype)


# ----------------------------------------------------------------------------
# Wrapper-side constants, generation-aware block selection
# ----------------------------------------------------------------------------
@functools.lru_cache(maxsize=None)
def _structural_constants(h, w):
    """Pooling / gate-expansion matrices and 3x3 edge-validity masks (numpy)."""
    hw = h * w
    ii, jj = np.meshgrid(np.arange(h), np.arange(w), indexing="ij")
    flat = (ii * w + jj).reshape(-1)
    i_flat = ii.reshape(-1)
    j_flat = jj.reshape(-1)

    P = np.zeros((hw, h + w), np.float32)           # pooling: mean over W / over H
    P[flat, i_flat] = 1.0 / w
    P[flat, h + j_flat] = 1.0 / h

    E = np.zeros((h + w, 2 * hw), np.float32)       # [row-gate expand | col-gate expand]
    E[i_flat, flat] = 1.0
    E[h + j_flat, hw + flat] = 1.0

    masks = np.zeros((9, 1, hw), np.float32)        # validity of each 3x3 neighbour
    t = 0
    for dy in (-1, 0, 1):
        for dx in (-1, 0, 1):
            ok = ((i_flat + dy >= 0) & (i_flat + dy < h) &
                  (j_flat + dx >= 0) & (j_flat + dx < w))
            masks[t, 0, :] = ok.astype(np.float32)
            t += 1
    return P, E, masks


@functools.lru_cache(maxsize=None)
def _group_sum_matrix(BG, cg):
    return np.kron(np.eye(BG, dtype=np.float32), np.ones((cg, cg), np.float32))


def _device_kind():
    try:
        return jax.local_devices()[0].device_kind.lower()
    except Exception:
        return ""


def _num_tensorcores():
    kind = _device_kind()
    # v4 / v5p (megacore) and v7x expose 2 TensorCores per device; v5e/v6e have 1.
    return 2 if any(tag in kind for tag in ("v4", "v5p", "v7")) else 1


def _vmem_budget_bytes():
    # v7x has 64 MiB physical VMEM; v5e/v6e have 128 MiB.
    return (24 << 20) if "v7" in _device_kind() else (56 << 20)


def _est_block_bytes(BG, cg, h, w, itemsize):
    hw = h * w
    R = BG * cg
    const = (hw * (h + w) + (h + w) * 2 * hw + 11 * R * R + 9 * hw + 4 * R) * 4
    blocks = 2 * 2 * R * hw * itemsize              # double-buffered in/out tiles
    live = 10 * R * hw * 4                          # in-kernel f32 temporaries
    return const + blocks + live


def _choose_block_bg(bg, cg, h, w, itemsize, num_cores, budget_bytes):
    """Largest per-step sample count BG (BG | bg) whose block fits the VMEM
    budget, preferring a grid-step count that is a multiple of the TC count
    (1 step on single-core chips, multiple-of-2 on dual-core chips)."""
    cands = [d for d in range(1, bg + 1)
             if bg % d == 0 and ((d * cg) % 8 == 0 or d == bg)]
    fits = [d for d in cands
            if _est_block_bytes(d, cg, h, w, itemsize) <= budget_bytes]
    pool = fits if fits else [min(cands)]
    aligned = [d for d in pool if (bg // d) % num_cores == 0]
    return max(aligned) if aligned else max(pool)


# ----------------------------------------------------------------------------
# Forward
# ----------------------------------------------------------------------------
def _ema_forward_impl(x, params, groups=8):
    w1, b1, w3, b3, gnw, gnb = params
    b, c, h, w = x.shape
    assert c % groups == 0 and c // groups > 0
    cg = c // groups
    bg = b * groups
    hw = h * w
    R_total = bg * cg
    f32 = jnp.float32
    itemsize = jnp.dtype(x.dtype).itemsize

    num_cores = _num_tensorcores()
    budget = _vmem_budget_bytes()
    BG = _choose_block_bg(bg, cg, h, w, itemsize, num_cores, budget)
    R = BG * cg

    # hw = 256 here is lane-aligned; for spatial sizes where h*w is not a
    # multiple of 128, pad hw in the wrapper to keep unmasked lane-dense stores.
    x2d = x.reshape(R_total, hw)

    P, E, masks = _structural_constants(h, w)
    Gsum = _group_sum_matrix(BG, cg)

    eye = jnp.eye(BG, dtype=f32)
    W1bd = jnp.kron(eye, w1.astype(f32))                                  # (R, R)
    W3stk = jnp.stack([jnp.kron(eye, w3[:, :, di, dj].astype(f32))
                       for di in range(3) for dj in range(3)])            # (9, R, R)
    b1r = jnp.tile(b1.astype(f32), BG).reshape(R, 1)
    b3r = jnp.tile(b3.astype(f32), BG).reshape(R, 1)
    gnwr = jnp.tile(gnw.astype(f32), BG).reshape(R, 1)
    gnbr = jnp.tile(gnb.astype(f32), BG).reshape(R, 1)

    kernel = functools.partial(ema_kernel, w=w, cg=cg)
    full2 = lambda i: (0, 0)
    full3 = lambda i: (0, 0, 0)

    est = _est_block_bytes(BG, cg, h, w, itemsize)
    vmem_limit = int(min(max(est, 32 << 20), budget + (8 << 20)))

    out2d = pl.pallas_call(
        kernel,
        out_shape=jax.ShapeDtypeStruct((R_total, hw), x.dtype),
        grid=(R_total // R,),
        in_specs=[
            pl.BlockSpec((R, hw), lambda i: (i, 0)),     # x block: BG samples
            pl.BlockSpec((hw, h + w), full2),            # pooling matrix
            pl.BlockSpec((h + w, 2 * hw), full2),        # fused gate expansion
            pl.BlockSpec((R, R), full2),                 # block-diag conv1x1 weight
            pl.BlockSpec((R, 1), full2),                 # conv1x1 bias (per row)
            pl.BlockSpec((9, R, R), full3),              # 9 block-diag conv3x3 tap weights
            pl.BlockSpec((R, 1), full2),                 # conv3x3 bias (per row)
            pl.BlockSpec((R, 1), full2),                 # GroupNorm weight (per row)
            pl.BlockSpec((R, 1), full2),                 # GroupNorm bias (per row)
            pl.BlockSpec((R, R), full2),                 # per-sample group-sum matrix
            pl.BlockSpec((9, 1, hw), full3),             # 3x3 edge-validity masks
        ],
        out_specs=pl.BlockSpec((R, hw), lambda i: (i, 0)),
        compiler_params=pltpu.CompilerParams(
            dimension_semantics=("parallel",),
            vmem_limit_bytes=vmem_limit),
    )(x2d, jnp.asarray(P), jnp.asarray(E), W1bd, b1r, W3stk, b3r,
      gnwr, gnbr, jnp.asarray(Gsum), jnp.asarray(masks))
    return out2d.reshape(b, c, h, w)


# Jitted entry point: structural constants / block-diag weights are built once
# per (shape, groups) and cached; subsequent calls skip all host-side work.
ema_forward = jax.jit(_ema_forward_impl, static_argnames=("groups",))


# ----------------------------------------------------------------------------
# Pure-JAX reference (matches the PyTorch forward)
# ----------------------------------------------------------------------------
def ema_ref(x, params, groups=8):
    w1, b1, w3, b3, gnw, gnb = params
    b, c, h, w = x.shape
    cg = c // groups
    bg = b * groups
    gx = x.reshape(bg, cg, h, w).astype(jnp.float32)
    x_h = gx.mean(axis=3)                                    # (bg, cg, h)
    x_w = gx.mean(axis=2)                                    # (bg, cg, w)
    pooled = jnp.concatenate([x_h, x_w], axis=2)             # (bg, cg, h+w)
    hw_ = jnp.einsum('oc,bcl->bol', w1, pooled) + b1[None, :, None]
    xh, xw = hw_[:, :, :h], hw_[:, :, h:]
    mod = gx * jax.nn.sigmoid(xh)[..., None] * jax.nn.sigmoid(xw)[:, :, None, :]
    mean = mod.mean(axis=(2, 3), keepdims=True)
    var = ((mod - mean) ** 2).mean(axis=(2, 3), keepdims=True)
    x1 = (mod - mean) * lax.rsqrt(var + GN_EPS)
    x1 = x1 * gnw[None, :, None, None] + gnb[None, :, None, None]
    x2 = lax.conv_general_dilated(
        gx, w3, window_strides=(1, 1), padding='SAME',
        dimension_numbers=('NCHW', 'OIHW', 'NCHW')) + b3[None, :, None, None]
    a1 = jax.nn.softmax(x1.mean(axis=(2, 3)), axis=1)        # (bg, cg)
    a2 = jax.nn.softmax(x2.mean(axis=(2, 3)), axis=1)
    x1f = x1.reshape(bg, cg, h * w)
    x2f = x2.reshape(bg, cg, h * w)
    weights = (jnp.einsum('bc,bcl->bl', a1, x2f) +
               jnp.einsum('bc,bcl->bl', a2, x1f))
    out = gx * jax.nn.sigmoid(weights.reshape(bg, 1, h, w))
    return out.reshape(b, c, h, w).astype(x.dtype)


if __name__ == "__main__":
    key = jax.random.PRNGKey(0)
    b, c, h, w = 2, 32, 16, 16        # cg = 32 // 8 = 4
    groups = 8
    cg = c // groups

    ks = jax.random.split(key, 7)
    x = jax.random.normal(ks[0], (b, c, h, w), jnp.float32)
    # Deterministic synthetic parameters (shapes from nn.Module.__init__):
    w1 = jax.random.normal(ks[1], (cg, cg), jnp.float32) * (1.0 / math.sqrt(cg))            # conv1x1 weight
    b1 = jax.random.normal(ks[2], (cg,), jnp.float32) * 0.1                                 # conv1x1 bias
    w3 = jax.random.normal(ks[3], (cg, cg, 3, 3), jnp.float32) * (1.0 / math.sqrt(cg * 9))  # conv3x3 weight
    b3 = jax.random.normal(ks[4], (cg,), jnp.float32) * 0.1                                 # conv3x3 bias
    gnw = 1.0 + 0.1 * jax.random.normal(ks[5], (cg,), jnp.float32)                          # GroupNorm weight
    gnb = 0.1 * jax.random.normal(ks[6], (cg,), jnp.float32)                                # GroupNorm bias
    params = (w1, b1, w3, b3, gnw, gnb)

    out = ema_forward(x, params, groups=groups)
    out = jax.block_until_ready(out)

    ref = ema_ref(x, params, groups=groups)
    np.testing.assert_allclose(np.asarray(out), np.asarray(ref), atol=2e-4, rtol=2e-4)
    print("KERNEL_OK")
</pallas_src>

<mosaic_0001>
module attributes {stable_mosaic.version = 11 : i64} {
  func.func @ema_kernel(%arg0: i32, %arg1: memref<64x256xf32, #tpu.memory_space<vmem>>, %arg2: memref<256x32xf32, #tpu.memory_space<vmem>>, %arg3: memref<32x512xf32, #tpu.memory_space<vmem>>, %arg4: memref<64x64xf32, #tpu.memory_space<vmem>>, %arg5: memref<64x1xf32, #tpu.memory_space<vmem>>, %arg6: memref<9x64x64xf32, #tpu.memory_space<vmem>>, %arg7: memref<64x1xf32, #tpu.memory_space<vmem>>, %arg8: memref<64x1xf32, #tpu.memory_space<vmem>>, %arg9: memref<64x1xf32, #tpu.memory_space<vmem>>, %arg10: memref<64x64xf32, #tpu.memory_space<vmem>>, %arg11: memref<9x1x256xf32, #tpu.memory_space<vmem>>, %arg12: memref<64x256xf32, #tpu.memory_space<vmem>>) attributes {dimension_semantics = [#tpu.dimension_semantics<parallel>], iteration_bounds = array<i64: 1>, scalar_prefetch = 0 : i64, scratch_operands = 0 : i64, tpu.core_type = #tpu.core_type<tc>, window_params = [{transform_indices = @transform_0, window_bounds = array<i64: 64, 256>}, {pipeline_mode = #tpu.pipeline_mode<synchronous>, transform_indices = @transform_1, window_bounds = array<i64: 256, 32>}, {pipeline_mode = #tpu.pipeline_mode<synchronous>, transform_indices = @transform_2, window_bounds = array<i64: 32, 512>}, {pipeline_mode = #tpu.pipeline_mode<synchronous>, transform_indices = @transform_3, window_bounds = array<i64: 64, 64>}, {pipeline_mode = #tpu.pipeline_mode<synchronous>, transform_indices = @transform_4, window_bounds = array<i64: 64, 1>}, {pipeline_mode = #tpu.pipeline_mode<synchronous>, transform_indices = @transform_5, window_bounds = array<i64: 9, 64, 64>}, {pipeline_mode = #tpu.pipeline_mode<synchronous>, transform_indices = @transform_6, window_bounds = array<i64: 64, 1>}, {pipeline_mode = #tpu.pipeline_mode<synchronous>, transform_indices = @transform_7, window_bounds = array<i64: 64, 1>}, {pipeline_mode = #tpu.pipeline_mode<synchronous>, transform_indices = @transform_8, window_bounds = array<i64: 64, 1>}, {pipeline_mode = #tpu.pipeline_mode<synchronous>, transform_indices = @transform_9, window_bounds = array<i64: 64, 64>}, {pipeline_mode = #tpu.pipeline_mode<synchronous>, transform_indices = @transform_10, window_bounds = array<i64: 9, 1, 256>}, {transform_indices = @transform_11, window_bounds = array<i64: 64, 256>}]} {
    %c0 = arith.constant 0 : index
    %c0_0 = arith.constant 0 : index
    %0 = vector.load %arg1[%c0, %c0_0] : memref<64x256xf32, #tpu.memory_space<vmem>>, vector<64x256xf32>
    %cst = arith.constant 3.906250e-03 : f32
    %1 = vector.broadcast %cst : f32 to vector<256x1xf32>
    %c0_1 = arith.constant 0 : index
    %c0_2 = arith.constant 0 : index
    %2 = vector.load %arg2[%c0_1, %c0_2] : memref<256x32xf32, #tpu.memory_space<vmem>>, vector<256x32xf32>
    %cst_3 = arith.constant dense<0.000000e+00> : vector<64x32xf32>
    %3 = tpu.matmul %0, %2, %cst_3 {dimension_numbers = #tpu.dot_dimension_numbers<[1], [0], [0], [1], [0, 0, 1, 1], [], []>} : vector<64x256xf32>, vector<256x32xf32>, vector<64x32xf32> -> vector<64x32xf32>
    %c0_4 = arith.constant 0 : index
    %c0_5 = arith.constant 0 : index
    %4 = vector.load %arg4[%c0_4, %c0_5] : memref<64x64xf32, #tpu.memory_space<vmem>>, vector<64x64xf32>
    %cst_6 = arith.constant dense<0.000000e+00> : vector<64x32xf32>
    %5 = tpu.matmul %4, %3, %cst_6 {dimension_numbers = #tpu.dot_dimension_numbers<[1], [0], [0], [1], [0, 0, 1, 1], [], []>} : vector<64x64xf32>, vector<64x32xf32>, vector<64x32xf32> -> vector<64x32xf32>
    %c0_7 = arith.constant 0 : index
    %c0_8 = arith.constant 0 : index
    %6 = vector.load %arg5[%c0_7, %c0_8] : memref<64x1xf32, #tpu.memory_space<vmem>>, vector<64x1xf32>
    %7 = vector.broadcast %6 : vector<64x1xf32> to vector<64x32xf32>
    %8 = arith.addf %5, %7 : vector<64x32xf32>
    %9 = arith.negf %8 : vector<64x32xf32>
    %10 = math.exp %9 : vector<64x32xf32>
    %cst_9 = arith.constant 1.000000e+00 : f32
    %11 = vector.broadcast %cst_9 : f32 to vector<64x32xf32>
    %12 = arith.addf %11, %10 : vector<64x32xf32>
    %13 = arith.divf %11, %12 : vector<64x32xf32>
    %c0_10 = arith.constant 0 : index
    %c0_11 = arith.constant 0 : index
    %14 = vector.load %arg3[%c0_10, %c0_11] : memref<32x512xf32, #tpu.memory_space<vmem>>, vector<32x512xf32>
    %cst_12 = arith.constant dense<0.000000e+00> : vector<64x512xf32>
    %15 = tpu.matmul %13, %14, %cst_12 {dimension_numbers = #tpu.dot_dimension_numbers<[1], [0], [0], [1], [0, 0, 1, 1], [], []>} : vector<64x32xf32>, vector<32x512xf32>, vector<64x512xf32> -> vector<64x512xf32>
    %16 = vector.extract_strided_slice %15 {offsets = [0, 0], sizes = [64, 256], strides = [1, 1]} : vector<64x512xf32> to vector<64x256xf32>
    %17 = arith.mulf %0, %16 : vector<64x256xf32>
    %18 = vector.extract_strided_slice %15 {offsets = [0, 256], sizes = [64, 256], strides = [1, 1]} : vector<64x512xf32> to vector<64x256xf32>
    %19 = arith.mulf %17, %18 : vector<64x256xf32>
    %cst_13 = arith.constant dense<0.000000e+00> : vector<64x1xf32>
    %20 = tpu.matmul %19, %1, %cst_13 {dimension_numbers = #tpu.dot_dimension_numbers<[1], [0], [0], [1], [0, 0, 1, 1], [], []>} : vector<64x256xf32>, vector<256x1xf32>, vector<64x1xf32> -> vector<64x1xf32>
    %21 = arith.mulf %19, %19 : vector<64x256xf32>
    %cst_14 = arith.constant dense<0.000000e+00> : vector<64x1xf32>
    %22 = tpu.matmul %21, %1, %cst_14 {dimension_numbers = #tpu.dot_dimension_numbers<[1], [0], [0], [1], [0, 0, 1, 1], [], []>} : vector<64x256xf32>, vector<256x1xf32>, vector<64x1xf32> -> vector<64x1xf32>
    %23 = arith.mulf %20, %20 : vector<64x1xf32>
    %24 = arith.subf %22, %23 : vector<64x1xf32>
    %cst_15 = arith.constant 0.000000e+00 : f32
    %25 = vector.broadcast %cst_15 : f32 to vector<64x1xf32>
    %26 = arith.maximumf %24, %25 : vector<64x1xf32>
    %27 = vector.broadcast %20 : vector<64x1xf32> to vector<64x256xf32>
    %28 = arith.subf %19, %27 : vector<64x256xf32>
    %cst_16 = arith.constant 9.99999974E-6 : f32
    %29 = vector.broadcast %cst_16 : f32 to vector<64x1xf32>
    %30 = arith.addf %26, %29 : vector<64x1xf32>
    %31 = math.rsqrt %30 : vector<64x1xf32>
    %32 = vector.broadcast %31 : vector<64x1xf32> to vector<64x256xf32>
    %33 = arith.mulf %28, %32 : vector<64x256xf32>
    %c0_17 = arith.constant 0 : index
    %c0_18 = arith.constant 0 : index
    %34 = vector.load %arg8[%c0_17, %c0_18] : memref<64x1xf32, #tpu.memory_space<vmem>>, vector<64x1xf32>
    %35 = vector.broadcast %34 : vector<64x1xf32> to vector<64x256xf32>
    %36 = arith.mulf %33, %35 : vector<64x256xf32>
    %c0_19 = arith.constant 0 : index
    %c0_20 = arith.constant 0 : index
    %37 = vector.load %arg9[%c0_19, %c0_20] : memref<64x1xf32, #tpu.memory_space<vmem>>, vector<64x1xf32>
    %38 = vector.broadcast %37 : vector<64x1xf32> to vector<64x256xf32>
    %39 = arith.addf %36, %38 : vector<64x256xf32>
    %c17_i32 = arith.constant 17 : i32
    %40 = tpu.dynamic_rotate %0 by %c17_i32 dim 1 : vector<64x256xf32>, i32 -> vector<64x256xf32>
    %c0_21 = arith.constant 0 : index
    %c0_22 = arith.constant 0 : index
    %c0_23 = arith.constant 0 : index
    %41 = vector.load %arg11[%c0_21, %c0_22, %c0_23] : memref<9x1x256xf32, #tpu.memory_space<vmem>>, vector<1x1x256xf32>
    %42 = vector.shape_cast %41 : vector<1x1x256xf32> to vector<1x256xf32>
    %43 = vector.broadcast %42 : vector<1x256xf32> to vector<64x256xf32>
    %44 = arith.mulf %40, %43 : vector<64x256xf32>
    %c0_24 = arith.constant 0 : index
    %c0_25 = arith.constant 0 : index
    %c0_26 = arith.constant 0 : index
    %45 = vector.load %arg6[%c0_24, %c0_25, %c0_26] : memref<9x64x64xf32, #tpu.memory_space<vmem>>, vector<1x64x64xf32>
    %46 = vector.shape_cast %45 : vector<1x64x64xf32> to vector<64x64xf32>
    %cst_27 = arith.constant dense<0.000000e+00> : vector<64x256xf32>
    %47 = tpu.matmul %46, %44, %cst_27 {dimension_numbers = #tpu.dot_dimension_numbers<[1], [0], [0], [1], [0, 0, 1, 1], [], []>} : vector<64x64xf32>, vector<64x256xf32>, vector<64x256xf32> -> vector<64x256xf32>
    %c16_i32 = arith.constant 16 : i32
    %48 = tpu.dynamic_rotate %0 by %c16_i32 dim 1 : vector<64x256xf32>, i32 -> vector<64x256xf32>
    %c1 = arith.constant 1 : index
    %c0_28 = arith.constant 0 : index
    %c0_29 = arith.constant 0 : index
    %49 = vector.load %arg11[%c1, %c0_28, %c0_29] : memref<9x1x256xf32, #tpu.memory_space<vmem>>, vector<1x1x256xf32>
    %50 = vector.shape_cast %49 : vector<1x1x256xf32> to vector<1x256xf32>
    %51 = vector.broadcast %50 : vector<1x256xf32> to vector<64x256xf32>
    %52 = arith.mulf %48, %51 : vector<64x256xf32>
    %c1_30 = arith.constant 1 : index
    %c0_31 = arith.constant 0 : index
    %c0_32 = arith.constant 0 : index
    %53 = vector.load %arg6[%c1_30, %c0_31, %c0_32] : memref<9x64x64xf32, #tpu.memory_space<vmem>>, vector<1x64x64xf32>
    %54 = vector.shape_cast %53 : vector<1x64x64xf32> to vector<64x64xf32>
    %cst_33 = arith.constant dense<0.000000e+00> : vector<64x256xf32>
    %55 = tpu.matmul %54, %52, %cst_33 {dimension_numbers = #tpu.dot_dimension_numbers<[1], [0], [0], [1], [0, 0, 1, 1], [], []>} : vector<64x64xf32>, vector<64x256xf32>, vector<64x256xf32> -> vector<64x256xf32>
    %56 = arith.addf %47, %55 : vector<64x256xf32>
    %c15_i32 = arith.constant 15 : i32
    %57 = tpu.dynamic_rotate %0 by %c15_i32 dim 1 : vector<64x256xf32>, i32 -> vector<64x256xf32>
    %c2 = arith.constant 2 : index
    %c0_34 = arith.constant 0 : index
    %c0_35 = arith.constant 0 : index
    %58 = vector.load %arg11[%c2, %c0_34, %c0_35] : memref<9x1x256xf32, #tpu.memory_space<vmem>>, vector<1x1x256xf32>
    %59 = vector.shape_cast %58 : vector<1x1x256xf32> to vector<1x256xf32>
    %60 = vector.broadcast %59 : vector<1x256xf32> to vector<64x256xf32>
    %61 = arith.mulf %57, %60 : vector<64x256xf32>
    %c2_36 = arith.constant 2 : index
    %c0_37 = arith.constant 0 : index
    %c0_38 = arith.constant 0 : index
    %62 = vector.load %arg6[%c2_36, %c0_37, %c0_38] : memref<9x64x64xf32, #tpu.memory_space<vmem>>, vector<1x64x64xf32>
    %63 = vector.shape_cast %62 : vector<1x64x64xf32> to vector<64x64xf32>
    %cst_39 = arith.constant dense<0.000000e+00> : vector<64x256xf32>
    %64 = tpu.matmul %63, %61, %cst_39 {dimension_numbers = #tpu.dot_dimension_numbers<[1], [0], [0], [1], [0, 0, 1, 1], [], []>} : vector<64x64xf32>, vector<64x256xf32>, vector<64x256xf32> -> vector<64x256xf32>
    %65 = arith.addf %56, %64 : vector<64x256xf32>
    %c1_i32 = arith.constant 1 : i32
    %66 = tpu.dynamic_rotate %0 by %c1_i32 dim 1 : vector<64x256xf32>, i32 -> vector<64x256xf32>
    %c3 = arith.constant 3 : index
    %c0_40 = arith.constant 0 : index
    %c0_41 = arith.constant 0 : index
    %67 = vector.load %arg11[%c3, %c0_40, %c0_41] : memref<9x1x256xf32, #tpu.memory_space<vmem>>, vector<1x1x256xf32>
    %68 = vector.shape_cast %67 : vector<1x1x256xf32> to vector<1x256xf32>
    %69 = vector.broadcast %68 : vector<1x256xf32> to vector<64x256xf32>
    %70 = arith.mulf %66, %69 : vector<64x256xf32>
    %c3_42 = arith.constant 3 : index
    %c0_43 = arith.constant 0 : index
    %c0_44 = arith.constant 0 : index
    %71 = vector.load %arg6[%c3_42, %c0_43, %c0_44] : memref<9x64x64xf32, #tpu.memory_space<vmem>>, vector<1x64x64xf32>
    %72 = vector.shape_cast %71 : vector<1x64x64xf32> to vector<64x64xf32>
    %cst_45 = arith.constant dense<0.000000e+00> : vector<64x256xf32>
    %73 = tpu.matmul %72, %70, %cst_45 {dimension_numbers = #tpu.dot_dimension_numbers<[1], [0], [0], [1], [0, 0, 1, 1], [], []>} : vector<64x64xf32>, vector<64x256xf32>, vector<64x256xf32> -> vector<64x256xf32>
    %74 = arith.addf %65, %73 : vector<64x256xf32>
    %c4 = arith.constant 4 : index
    %c0_46 = arith.constant 0 : index
    %c0_47 = arith.constant 0 : index
    %75 = vector.load %arg6[%c4, %c0_46, %c0_47] : memref<9x64x64xf32, #tpu.memory_space<vmem>>, vector<1x64x64xf32>
    %76 = vector.shape_cast %75 : vector<1x64x64xf32> to vector<64x64xf32>
    %cst_48 = arith.constant dense<0.000000e+00> : vector<64x256xf32>
    %77 = tpu.matmul %76, %0, %cst_48 {dimension_numbers = #tpu.dot_dimension_numbers<[1], [0], [0], [1], [0, 0, 1, 1], [], []>} : vector<64x64xf32>, vector<64x256xf32>, vector<64x256xf32> -> vector<64x256xf32>
    %78 = arith.addf %74, %77 : vector<64x256xf32>
    %c255_i32 = arith.constant 255 : i32
    %79 = tpu.dynamic_rotate %0 by %c255_i32 dim 1 : vector<64x256xf32>, i32 -> vector<64x256xf32>
    %c5 = arith.constant 5 : index
    %c0_49 = arith.constant 0 : index
    %c0_50 = arith.constant 0 : index
    %80 = vector.load %arg11[%c5, %c0_49, %c0_50] : memref<9x1x256xf32, #tpu.memory_space<vmem>>, vector<1x1x256xf32>
    %81 = vector.shape_cast %80 : vector<1x1x256xf32> to vector<1x256xf32>
    %82 = vector.broadcast %81 : vector<1x256xf32> to vector<64x256xf32>
    %83 = arith.mulf %79, %82 : vector<64x256xf32>
    %c5_51 = arith.constant 5 : index
    %c0_52 = arith.constant 0 : index
    %c0_53 = arith.constant 0 : index
    %84 = vector.load %arg6[%c5_51, %c0_52, %c0_53] : memref<9x64x64xf32, #tpu.memory_space<vmem>>, vector<1x64x64xf32>
    %85 = vector.shape_cast %84 : vector<1x64x64xf32> to vector<64x64xf32>
    %cst_54 = arith.constant dense<0.000000e+00> : vector<64x256xf32>
    %86 = tpu.matmul %85, %83, %cst_54 {dimension_numbers = #tpu.dot_dimension_numbers<[1], [0], [0], [1], [0, 0, 1, 1], [], []>} : vector<64x64xf32>, vector<64x256xf32>, vector<64x256xf32> -> vector<64x256xf32>
    %87 = arith.addf %78, %86 : vector<64x256xf32>
    %c241_i32 = arith.constant 241 : i32
    %88 = tpu.dynamic_rotate %0 by %c241_i32 dim 1 : vector<64x256xf32>, i32 -> vector<64x256xf32>
    %c6 = arith.constant 6 : index
    %c0_55 = arith.constant 0 : index
    %c0_56 = arith.constant 0 : index
    %89 = vector.load %arg11[%c6, %c0_55, %c0_56] : memref<9x1x256xf32, #tpu.memory_space<vmem>>, vector<1x1x256xf32>
    %90 = vector.shape_cast %89 : vector<1x1x256xf32> to vector<1x256xf32>
    %91 = vector.broadcast %90 : vector<1x256xf32> to vector<64x256xf32>
    %92 = arith.mulf %88, %91 : vector<64x256xf32>
    %c6_57 = arith.constant 6 : index
    %c0_58 = arith.constant 0 : index
    %c0_59 = arith.constant 0 : index
    %93 = vector.load %arg6[%c6_57, %c0_58, %c0_59] : memref<9x64x64xf32, #tpu.memory_space<vmem>>, vector<1x64x64xf32>
    %94 = vector.shape_cast %93 : vector<1x64x64xf32> to vector<64x64xf32>
    %cst_60 = arith.constant dense<0.000000e+00> : vector<64x256xf32>
    %95 = tpu.matmul %94, %92, %cst_60 {dimension_numbers = #tpu.dot_dimension_numbers<[1], [0], [0], [1], [0, 0, 1, 1], [], []>} : vector<64x64xf32>, vector<64x256xf32>, vector<64x256xf32> -> vector<64x256xf32>
    %96 = arith.addf %87, %95 : vector<64x256xf32>
    %c240_i32 = arith.constant 240 : i32
    %97 = tpu.dynamic_rotate %0 by %c240_i32 dim 1 : vector<64x256xf32>, i32 -> vector<64x256xf32>
    %c7 = arith.constant 7 : index
    %c0_61 = arith.constant 0 : index
    %c0_62 = arith.constant 0 : index
    %98 = vector.load %arg11[%c7, %c0_61, %c0_62] : memref<9x1x256xf32, #tpu.memory_space<vmem>>, vector<1x1x256xf32>
    %99 = vector.shape_cast %98 : vector<1x1x256xf32> to vector<1x256xf32>
    %100 = vector.broadcast %99 : vector<1x256xf32> to vector<64x256xf32>
    %101 = arith.mulf %97, %100 : vector<64x256xf32>
    %c7_63 = arith.constant 7 : index
    %c0_64 = arith.constant 0 : index
    %c0_65 = arith.constant 0 : index
    %102 = vector.load %arg6[%c7_63, %c0_64, %c0_65] : memref<9x64x64xf32, #tpu.memory_space<vmem>>, vector<1x64x64xf32>
    %103 = vector.shape_cast %102 : vector<1x64x64xf32> to vector<64x64xf32>
    %cst_66 = arith.constant dense<0.000000e+00> : vector<64x256xf32>
    %104 = tpu.matmul %103, %101, %cst_66 {dimension_numbers = #tpu.dot_dimension_numbers<[1], [0], [0], [1], [0, 0, 1, 1], [], []>} : vector<64x64xf32>, vector<64x256xf32>, vector<64x256xf32> -> vector<64x256xf32>
    %105 = arith.addf %96, %104 : vector<64x256xf32>
    %c239_i32 = arith.constant 239 : i32
    %106 = tpu.dynamic_rotate %0 by %c239_i32 dim 1 : vector<64x256xf32>, i32 -> vector<64x256xf32>
    %c8 = arith.constant 8 : index
    %c0_67 = arith.constant 0 : index
    %c0_68 = arith.constant 0 : index
    %107 = vector.load %arg11[%c8, %c0_67, %c0_68] : memref<9x1x256xf32, #tpu.memory_space<vmem>>, vector<1x1x256xf32>
    %108 = vector.shape_cast %107 : vector<1x1x256xf32> to vector<1x256xf32>
    %109 = vector.broadcast %108 : vector<1x256xf32> to vector<64x256xf32>
    %110 = arith.mulf %106, %109 : vector<64x256xf32>
    %c8_69 = arith.constant 8 : index
    %c0_70 = arith.constant 0 : index
    %c0_71 = arith.constant 0 : index
    %111 = vector.load %arg6[%c8_69, %c0_70, %c0_71] : memref<9x64x64xf32, #tpu.memory_space<vmem>>, vector<1x64x64xf32>
    %112 = vector.shape_cast %111 : vector<1x64x64xf32> to vector<64x64xf32>
    %cst_72 = arith.constant dense<0.000000e+00> : vector<64x256xf32>
    %113 = tpu.matmul %112, %110, %cst_72 {dimension_numbers = #tpu.dot_dimension_numbers<[1], [0], [0], [1], [0, 0, 1, 1], [], []>} : vector<64x64xf32>, vector<64x256xf32>, vector<64x256xf32> -> vector<64x256xf32>
    %114 = arith.addf %105, %113 : vector<64x256xf32>
    %c0_73 = arith.constant 0 : index
    %c0_74 = arith.constant 0 : index
    %115 = vector.load %arg7[%c0_73, %c0_74] : memref<64x1xf32, #tpu.memory_space<vmem>>, vector<64x1xf32>
    %116 = vector.broadcast %115 : vector<64x1xf32> to vector<64x256xf32>
    %117 = arith.addf %114, %116 : vector<64x256xf32>
    %cst_75 = arith.constant dense<0.000000e+00> : vector<64x1xf32>
    %118 = tpu.matmul %39, %1, %cst_75 {dimension_numbers = #tpu.dot_dimension_numbers<[1], [0], [0], [1], [0, 0, 1, 1], [], []>} : vector<64x256xf32>, vector<256x1xf32>, vector<64x1xf32> -> vector<64x1xf32>
    %cst_76 = arith.constant dense<0.000000e+00> : vector<64x1xf32>
    %119 = tpu.matmul %117, %1, %cst_76 {dimension_numbers = #tpu.dot_dimension_numbers<[1], [0], [0], [1], [0, 0, 1, 1], [], []>} : vector<64x256xf32>, vector<256x1xf32>, vector<64x1xf32> -> vector<64x1xf32>
    %c0_77 = arith.constant 0 : index
    %c0_78 = arith.constant 0 : index
    %120 = vector.load %arg10[%c0_77, %c0_78] : memref<64x64xf32, #tpu.memory_space<vmem>>, vector<64x64xf32>
    %cst_79 = arith.constant dense<0.000000e+00> : vector<64x1xf32>
    %121 = tpu.matmul %120, %118, %cst_79 {dimension_numbers = #tpu.dot_dimension_numbers<[1], [0], [0], [1], [0, 0, 1, 1], [], []>} : vector<64x64xf32>, vector<64x1xf32>, vector<64x1xf32> -> vector<64x1xf32>
    %cst_80 = arith.constant 2.500000e-01 : f32
    %122 = vector.broadcast %cst_80 : f32 to vector<64x1xf32>
    %123 = arith.mulf %121, %122 : vector<64x1xf32>
    %124 = arith.subf %118, %123 : vector<64x1xf32>
    %125 = math.exp %124 : vector<64x1xf32>
    %cst_81 = arith.constant dense<0.000000e+00> : vector<64x1xf32>
    %126 = tpu.matmul %120, %119, %cst_81 {dimension_numbers = #tpu.dot_dimension_numbers<[1], [0], [0], [1], [0, 0, 1, 1], [], []>} : vector<64x64xf32>, vector<64x1xf32>, vector<64x1xf32> -> vector<64x1xf32>
    %cst_82 = arith.constant 2.500000e-01 : f32
    %127 = vector.broadcast %cst_82 : f32 to vector<64x1xf32>
    %128 = arith.mulf %126, %127 : vector<64x1xf32>
    %129 = arith.subf %119, %128 : vector<64x1xf32>
    %130 = math.exp %129 : vector<64x1xf32>
    %cst_83 = arith.constant dense<0.000000e+00> : vector<64x1xf32>
    %131 = tpu.matmul %120, %125, %cst_83 {dimension_numbers = #tpu.dot_dimension_numbers<[1], [0], [0], [1], [0, 0, 1, 1], [], []>} : vector<64x64xf32>, vector<64x1xf32>, vector<64x1xf32> -> vector<64x1xf32>
    %132 = arith.divf %125, %131 : vector<64x1xf32>
    %cst_84 = arith.constant dense<0.000000e+00> : vector<64x1xf32>
    %133 = tpu.matmul %120, %130, %cst_84 {dimension_numbers = #tpu.dot_dimension_numbers<[1], [0], [0], [1], [0, 0, 1, 1], [], []>} : vector<64x64xf32>, vector<64x1xf32>, vector<64x1xf32> -> vector<64x1xf32>
    %134 = arith.divf %130, %133 : vector<64x1xf32>
    %135 = vector.broadcast %132 : vector<64x1xf32> to vector<64x256xf32>
    %136 = arith.mulf %135, %117 : vector<64x256xf32>
    %137 = vector.broadcast %134 : vector<64x1xf32> to vector<64x256xf32>
    %138 = arith.mulf %137, %39 : vector<64x256xf32>
    %139 = arith.addf %136, %138 : vector<64x256xf32>
    %cst_85 = arith.constant dense<0.000000e+00> : vector<64x256xf32>
    %140 = tpu.matmul %120, %139, %cst_85 {dimension_numbers = #tpu.dot_dimension_numbers<[1], [0], [0], [1], [0, 0, 1, 1], [], []>} : vector<64x64xf32>, vector<64x256xf32>, vector<64x256xf32> -> vector<64x256xf32>
    %141 = arith.negf %140 : vector<64x256xf32>
    %142 = math.exp %141 : vector<64x256xf32>
    %cst_86 = arith.constant 1.000000e+00 : f32
    %143 = vector.broadcast %cst_86 : f32 to vector<64x256xf32>
    %144 = arith.addf %143, %142 : vector<64x256xf32>
    %145 = arith.divf %143, %144 : vector<64x256xf32>
    %146 = arith.mulf %0, %145 : vector<64x256xf32>
    %c0_87 = arith.constant 0 : index
    %c0_88 = arith.constant 0 : index
    %147 = vector.load %arg12[%c0_87, %c0_88] : memref<64x256xf32, #tpu.memory_space<vmem>>, vector<64x256xf32>
    tpu.vector_store %arg12[%c0_87, %c0_88], %146 {strides = array<i32>} : memref<64x256xf32, #tpu.memory_space<vmem>>, vector<64x256xf32>,
    return
  }
  func.func @transform_0(%arg0: i32) -> (i32, i32) {
    %c0_i32 = arith.constant 0 : i32
    %c0_i32_0 = arith.constant 0 : i32
    return %arg0, %c0_i32 : i32, i32
  }
  func.func @transform_1(%arg0: i32) -> (i32, i32) {
    %c0_i32 = arith.constant 0 : i32
    %c0_i32_0 = arith.constant 0 : i32
    %c0_i32_1 = arith.constant 0 : i32
    return %c0_i32, %c0_i32_0 : i32, i32
  }
  func.func @transform_2(%arg0: i32) -> (i32, i32) {
    %c0_i32 = arith.constant 0 : i32
    %c0_i32_0 = arith.constant 0 : i32
    %c0_i32_1 = arith.constant 0 : i32
    return %c0_i32, %c0_i32_0 : i32, i32
  }
  func.func @transform_3(%arg0: i32) -> (i32, i32) {
    %c0_i32 = arith.constant 0 : i32
    %c0_i32_0 = arith.constant 0 : i32
    %c0_i32_1 = arith.constant 0 : i32
    return %c0_i32, %c0_i32_0 : i32, i32
  }
  func.func @transform_4(%arg0: i32) -> (i32, i32) {
    %c0_i32 = arith.constant 0 : i32
    %c0_i32_0 = arith.constant 0 : i32
    %c0_i32_1 = arith.constant 0 : i32
    return %c0_i32, %c0_i32_0 : i32, i32
  }
  func.func @transform_5(%arg0: i32) -> (i32, i32, i32) {
    %c0_i32 = arith.constant 0 : i32
    %c0_i32_0 = arith.constant 0 : i32
    %c0_i32_1 = arith.constant 0 : i32
    %c0_i32_2 = arith.constant 0 : i32
    return %c0_i32, %c0_i32_0, %c0_i32_1 : i32, i32, i32
  }
  func.func @transform_6(%arg0: i32) -> (i32, i32) {
    %c0_i32 = arith.constant 0 : i32
    %c0_i32_0 = arith.constant 0 : i32
    %c0_i32_1 = arith.constant 0 : i32
    return %c0_i32, %c0_i32_0 : i32, i32
  }
  func.func @transform_7(%arg0: i32) -> (i32, i32) {
    %c0_i32 = arith.constant 0 : i32
    %c0_i32_0 = arith.constant 0 : i32
    %c0_i32_1 = arith.constant 0 : i32
    return %c0_i32, %c0_i32_0 : i32, i32
  }
  func.func @transform_8(%arg0: i32) -> (i32, i32) {
    %c0_i32 = arith.constant 0 : i32
    %c0_i32_0 = arith.constant 0 : i32
    %c0_i32_1 = arith.constant 0 : i32
    return %c0_i32, %c0_i32_0 : i32, i32
  }
  func.func @transform_9(%arg0: i32) -> (i32, i32) {
    %c0_i32 = arith.constant 0 : i32
    %c0_i32_0 = arith.constant 0 : i32
    %c0_i32_1 = arith.constant 0 : i32
    return %c0_i32, %c0_i32_0 : i32, i32
  }
  func.func @transform_10(%arg0: i32) -> (i32, i32, i32) {
    %c0_i32 = arith.constant 0 : i32
    %c0_i32_0 = arith.constant 0 : i32
    %c0_i32_1 = arith.constant 0 : i32
    %c0_i32_2 = arith.constant 0 : i32
    return %c0_i32, %c0_i32_0, %c0_i32_1 : i32, i32, i32
  }
  func.func @transform_11(%arg0: i32) -> (i32, i32) {
    %c0_i32 = arith.constant 0 : i32
    %c0_i32_0 = arith.constant 0 : i32
    return %arg0, %c0_i32 : i32, i32
  }
}

</mosaic_0001>

<bundles_post_ra>
// kernel: tile.23
= control target key start
LH: loop header
LB: loop body
LE: loop exit
PB: predicated region body
PF: predicated region fallthrough
CT: control target
= control target key end

     0   :  { %s28_s0 = inlined_call_operand.vmem [shape: f32[4], index: 0, kind: input, shape index: {}]   ;;  %s29_s1 = inlined_call_operand.vmem [shape: f32[16,4], index: 1, kind: output, shape index: {}]  }
   0x1   :  { %v4_v0 = vld [vmem:[%s28_s0] ss:$0 sm:$0xff] }
   0x2   :  { %5 = vst [vmem:[%s29_s1] sm:$0xff] %v4_v0 }
   0x3   :  { %8 = vst [vmem:[%s29_s1 + $0x8] sm:$0xff] %v4_v0 }

// kernel: tile.0
= control target key start
LH: loop header
LB: loop body
LE: loop exit
PB: predicated region body
PF: predicated region fallthrough
CT: control target
= control target key end

     0   :  { %vm3_vm0 = vcmask 7168   ;;  %s63_s8 = smov 126   ;;  %s64_s9 = smov 127   ;;  %s114_s0 = inlined_call_operand.vmem [shape: f32[16,4], index: 0, kind: input, shape index: {}]   ;;  %s115_s1 = inlined_call_operand.vmem [shape: f32[64,1], index: 1, kind: output, shape index: {}]  }
   0x1   :  { %v23_v0 = vld [vmem:[%s114_s0] sm:$0xff]   ;;  %v55_v1 = vld [vmem:[%s114_s0 + $0x8] sm:$0xff]   ;;  %s65_s13 = smov 125  }
   0x2   :  { %24 = vrot.lane.b32.xlu1 %v23_v0, %s63_s8  ;;  %11 = vrot.lane.b32.xlu0 %v23_v0, %s64_s9  ;;  %4 = vst.msk [vmem:[%s115_s1] ss:$4 sm:$0xff] %vm3_vm0, %v23_v0  }
   0x3   :  { %37 = vrot.lane.b32.xlu2 %v23_v0, %s65_s13  ;;  %50 = vst.msk [vmem:[%s115_s1 + $0x20] ss:$4 sm:$0xff] %vm3_vm0, %v55_v1  }
   0xa   :  { %31 = vrot.lane.b32.xlu1 %v55_v1, %s63_s8  ;;  %18 = vrot.lane.b32.xlu0 %v55_v1, %s64_s9 }
   0xb   :  { %44 = vrot.lane.b32.xlu2 %v55_v1, %s65_s13 }
  0x5d   :  { %v38_v2 = vpop.permute.xlu2 %37  }
  0x5e   :  { %57 = vst.msk [vmem:[%s115_s1 + $0x3] ss:$4 sm:$0xff] %vm3_vm0, %v38_v2  }
  0x65   :  { %v45_v3 = vpop.permute.xlu2 %44  }
  0x66   :  { %59 = vst.msk [vmem:[%s115_s1 + $0x23] ss:$4 sm:$0xff] %vm3_vm0, %v45_v3  }
  0x74   :  { %v25_v4 = vpop.permute.xlu1 %24   ;;  %v12_v5 = vpop.permute.xlu0 %11  }
  0x75   :  { %54 = vst.msk [vmem:[%s115_s1 + $0x2] ss:$4 sm:$0xff] %vm3_vm0, %v25_v4  }
  0x76   :  { %51 = vst.msk [vmem:[%s115_s1 + $0x1] ss:$4 sm:$0xff] %vm3_vm0, %v12_v5  }
  0x7c   :  { %v32_v6 = vpop.permute.xlu1 %31   ;;  %v19_v7 = vpop.permute.xlu0 %18  }
  0x7d   :  { %56 = vst.msk [vmem:[%s115_s1 + $0x22] ss:$4 sm:$0xff] %vm3_vm0, %v32_v6  }
  0x7e   :  { %53 = vst.msk [vmem:[%s115_s1 + $0x21] ss:$4 sm:$0xff] %vm3_vm0, %v19_v7  }

// kernel: _ema_forward_impl.1
= control target key start
LH: loop header
LB: loop body
LE: loop exit
PB: predicated region body
PF: predicated region fallthrough
CT: control target
= control target key end

     0   :  { %v4784_v0 = vmov 0   ;;  %s4785_s17 = smov 16   ;;  %s4786_s14 = smov 15   ;;  %vm224_vm0 = vcmask 523264   ;;  %vm458_vm9 = vcmask 261120   ;;  %s8935_s4 = inlined_call_operand.vmem [shape: f32[64,1], index: 4, kind: input, shape index: {}]   ;;  %s8936_s1 = inlined_call_operand.vmem [shape: f32[256,32], index: 1, kind: input, shape index: {}]   ;;  %s8937_s0 = inlined_call_operand.vmem [shape: f32[64,256], index: 0, kind: input, shape index: {}]   ;;  %s8938_s3 = inlined_call_operand.vmem [shape: f32[64,64], index: 3, kind: input, shape index: {}]   ;;  %s8939_s10 = inlined_call_operand.vmem [shape: f32[9,1,256], index: 10, kind: input, shape index: {}]   ;;  %s8940_s2 = inlined_call_operand.vmem [shape: f32[32,512], index: 2, kind: input, shape index: {}]   ;;  %s8941_s6 = inlined_call_operand.vmem [shape: f32[64,1], index: 6, kind: input, shape index: {}]   ;;  %s8942_s8 = inlined_call_operand.vmem [shape: f32[64,1], index: 8, kind: input, shape index: {}]   ;;  %s8943_s7 = inlined_call_operand.vmem [shape: f32[64,1], index: 7, kind: input, shape index: {}]   ;;  %s8944_s5 = inlined_call_operand.vmem [shape: f32[9,64,64], index: 5, kind: input, shape index: {}]   ;;  %s8945_s9 = inlined_call_operand.vmem [shape: f32[64,64], index: 9, kind: input, shape index: {}]   ;;  %s8946_s11 = inlined_call_operand.vmem [shape: f32[64,256], index: 11, kind: output, shape index: {}]  }
   0x1   :  { %4563 = vset.pattern.permute.xlu2 %v4784_v0  ;;  %4562 = vset.pattern.permute.xlu1 %v4784_v0  ;;  %v180_v1 = vld [vmem:[%s8935_s4 + $0x20] sm:$0xff]  ;;  %v178_v2 = vld [vmem:[%s8935_s4 + $0x10] sm:$0xff]  ;;  %v69_v4 = vld [vmem:[%s8936_s1 + $0x78] sm:$0xff]  ;;  %s4787_s15 = smov 17   ;;  %s4790_s16 = smov 127  }
   0x2   :  { %v176_v3 = vld [vmem:[%s8935_s4] sm:$0xff]  ;;  %4561 = vset.pattern.permute.xlu0 %v4784_v0  ;;  %206 = vperm.xlu2 %4563, %v180_v1   ;;  %v85_v5 = vld [vmem:[%s8936_s1 + $0xf8] sm:$0xff]  ;;  %v68_v6 = vld [vmem:[%s8936_s1 + $0x70] sm:$0xff]  ;;  %s4791_s12 = smov 111  }
   0x3   :  { %196 = vperm.xlu1 %4562, %v178_v2   ;;  %186 = vperm.xlu0 %4561, %v176_v3   ;;  %v84_v7 = vld [vmem:[%s8936_s1 + $0xf0] sm:$0xff]  ;;  %v67_v8 = vld [vmem:[%s8936_s1 + $0x68] sm:$0xff]  ;;  %v66_v10 = vld [vmem:[%s8936_s1 + $0x60] sm:$0xff] }
   0x4   :  { %86 = vmatpush.msra.mxu0 %v69_v4  ;;  %127 = vmatpush.msra.mxu1 %v85_v5  ;;  %v83_v9 = vld [vmem:[%s8936_s1 + $0xe8] sm:$0xff]  ;;  %v82_v11 = vld [vmem:[%s8936_s1 + $0xe0] sm:$0xff]  ;;  %v179_v13 = vld [vmem:[%s8935_s4 + $0x18] sm:$0xff] }
   0x5   :  { %v181_v12 = vld [vmem:[%s8935_s4 + $0x28] sm:$0xff]  ;;  %v65_v15 = vld [vmem:[%s8936_s1 + $0x58] sm:$0xff]  ;;  %v64_v17 = vld [vmem:[%s8936_s1 + $0x50] sm:$0xff] }
   0x6   :  { %87 = vmatpush.msra.mxu0 %v68_v6  ;;  %128 = vmatpush.msra.mxu1 %v84_v7  ;;  %v177_v14 = vld [vmem:[%s8935_s4 + $0x8] sm:$0xff]  ;;  %v81_v16 = vld [vmem:[%s8936_s1 + $0xd8] sm:$0xff]  ;;  %v80_v18 = vld [vmem:[%s8936_s1 + $0xd0] sm:$0xff] }
   0x7   :  { %v63_v19 = vld [vmem:[%s8936_s1 + $0x48] sm:$0xff]  ;;  %v62_v21 = vld [vmem:[%s8936_s1 + $0x40] sm:$0xff]  ;;  %v183_v23 = vld [vmem:[%s8935_s4 + $0x38] sm:$0xff] }
   0x8   :  { %88 = vmatpush.msra.mxu0 %v67_v8  ;;  %129 = vmatpush.msra.mxu1 %v83_v9  ;;  %v79_v20 = vld [vmem:[%s8936_s1 + $0xc8] sm:$0xff]  ;;  %v78_v22 = vld [vmem:[%s8936_s1 + $0xc0] sm:$0xff]  ;;  %v182_v24 = vld [vmem:[%s8935_s4 + $0x30] sm:$0xff]  ;;  %s4789_s4 = smov 113  }
   0x9   :  { %v61_v25 = vld [vmem:[%s8936_s1 + $0x38] sm:$0xff]  ;;  %v4935_v27 = vld [vmem:[%s8937_s0 + $0x70] sm:$0xff]  ;;  %v59_v30 = vld [vmem:[%s8936_s1 + $0x28] sm:$0xff] }
   0xa   :  { %89 = vmatpush.msra.mxu0 %v66_v10  ;;  %130 = vmatpush.msra.mxu1 %v82_v11  ;;  %v77_v26 = vld [vmem:[%s8936_s1 + $0xb8] sm:$0xff]  ;;  %v60_v28 = vld [vmem:[%s8936_s1 + $0x30] sm:$0xff]  ;;  %v75_v31 = vld [vmem:[%s8936_s1 + $0xa8] sm:$0xff] }
   0xb   :  { %211 = vperm.xlu2 %4563, %v181_v12   ;;  %201 = vperm.xlu1 %4562, %v179_v13   ;;  %v76_v29 = vld [vmem:[%s8936_s1 + $0xb0] sm:$0xff]  ;;  %v58_v32 = vld [vmem:[%s8936_s1 + $0x20] sm:$0xff]  ;;  %v57_v35 = vld [vmem:[%s8936_s1 + $0x18] sm:$0xff] }
   0xc   :  { %191 = vperm.xlu0 %4561, %v177_v14   ;;  %90 = vmatpush.msra.mxu0 %v65_v15  ;;  %v74_v33 = vld [vmem:[%s8936_s1 + $0xa0] sm:$0xff]  ;;  %v4968_v36 = vld [vmem:[%s8937_s0 + $0x78] sm:$0xff]  ;;  %v4976_v38 = vld [vmem:[%s8937_s0 + $0x68] sm:$0xff] }
   0xd   :  { %131 = vmatpush.msra.mxu1 %v81_v16  ;;  %v4960_v34 = vld [vmem:[%s8937_s0 + $0x60] sm:$0xff]  ;;  %v73_v37 = vld [vmem:[%s8936_s1 + $0x98] sm:$0xff]  ;;  %v56_v39 = vld [vmem:[%s8936_s1 + $0x10] sm:$0xff] }
   0xe   :  { %91 = vmatpush.msra.mxu0 %v64_v17  ;;  %v72_v40 = vld [vmem:[%s8936_s1 + $0x90] sm:$0xff]  ;;  %v55_v41 = vld [vmem:[%s8936_s1 + $0x8] sm:$0xff]  ;;  %v54_v43 = vld [vmem:[%s8936_s1] sm:$0xff] }
   0xf   :  { %132 = vmatpush.msra.mxu1 %v80_v18  ;;  %v71_v42 = vld [vmem:[%s8936_s1 + $0x88] sm:$0xff]  ;;  %v70_v44 = vld [vmem:[%s8936_s1 + $0x80] sm:$0xff]  ;;  %v5015_v47 = vld [vmem:[%s8937_s0 + $0x58] sm:$0xff] }
  0x10   :  { %92 = vmatpush.msra.mxu0 %v63_v19  ;;  %v5005_v45 = vld [vmem:[%s8937_s0] sm:$0xff]  ;;  %v5010_v46 = vld [vmem:[%s8937_s0 + $0x8] sm:$0xff]  ;;  %v5020_v48 = vld [vmem:[%s8937_s0 + $0x50] sm:$0xff] }
  0x11   :  { %133 = vmatpush.msra.mxu1 %v79_v20  ;;  %v5025_v49 = vld [vmem:[%s8937_s0 + $0x40] sm:$0xff]  ;;  %v5038_v50 = vld [vmem:[%s8937_s0 + $0x10] sm:$0xff]  ;;  %v5043_v51 = vld [vmem:[%s8937_s0 + $0x18] sm:$0xff] }
  0x12   :  { %93 = vmatpush.msra.mxu0 %v62_v21  ;;  %v5048_v52 = vld [vmem:[%s8937_s0 + $0x30] sm:$0xff]  ;;  %v5053_v53 = vld [vmem:[%s8937_s0 + $0x48] sm:$0xff]  ;;  %v5058_v54 = vld [vmem:[%s8937_s0 + $0x38] sm:$0xff] }
  0x13   :  { %134 = vmatpush.msra.mxu1 %v78_v22  ;;  %221 = vperm.xlu1 %4562, %v183_v23   ;;  %v5071_v55 = vld [vmem:[%s8937_s0 + $0x20] sm:$0xff]  ;;  %v5076_v56 = vld [vmem:[%s8937_s0 + $0x28] sm:$0xff] }
  0x14   :  { %216 = vperm.xlu0 %4561, %v182_v24   ;;  %94 = vmatpush.msra.mxu0 %v61_v25 }
  0x15   :  { %135 = vmatpush.msra.mxu1 %v77_v26  ;;  %1306 = vrot.lane.b32.xlu2 %v4935_v27, %s4785_s17 }
  0x16   :  { %95 = vmatpush.msra.mxu0 %v60_v28 }
  0x17   :  { %136 = vmatpush.msra.mxu1 %v76_v29 }
  0x18   :  { %96 = vmatpush.msra.mxu0 %v59_v30 }
  0x19   :  { %137 = vmatpush.msra.mxu1 %v75_v31 }
  0x1a   :  { %97 = vmatpush.msra.mxu0 %v58_v32 }
  0x1b   :  { %138 = vmatpush.msra.mxu1 %v74_v33  ;;  %1304 = vrot.lane.b32.xlu1 %v4960_v34, %s4785_s17 }
  0x1c   :  { %98 = vmatpush.msra.mxu0 %v57_v35  ;;  %1322 = vrot.lane.b32.xlu0 %v4968_v36, %s4785_s17 }
  0x1d   :  { %139 = vmatpush.msra.mxu1 %v73_v37  ;;  %1320 = vrot.lane.b32.xlu2 %v4976_v38, %s4785_s17 }
  0x1e   :  { %99 = vmatpush.msra.mxu0 %v56_v39 }
  0x1f   :  { %140 = vmatpush.msra.mxu1 %v72_v40 }
  0x20   :  { %100 = vmatpush.msra.mxu0 %v55_v41 }
  0x21   :  { %141 = vmatpush.msra.mxu1 %v71_v42 }
  0x22   :  { %101 = vmatpush.msra.mxu0 %v54_v43 }
  0x23   :  { %142 = vmatpush.msra.mxu1 %v70_v44  ;;  %102 = vmatmul.f32.vlgmr.msra.gmra.mxu0 %v5005_v45 }
  0x24   :  { %143 = vmatmul.f32.vlgmr.msra.gmra.mxu1 %v5010_v46  ;;  %1318 = vrot.lane.b32.xlu1 %v5015_v47, %s4785_s17 }
  0x25   :  { %1302 = vrot.lane.b32.xlu0 %v5020_v48, %s4785_s17  ;;  %1300 = vrot.lane.b32.xlu2 %v5025_v49, %s4785_s17 }
  0x2b   :  { %105 = vmatmul.f32.gmra.mxu0 %v5038_v50 }
  0x2c   :  { %146 = vmatmul.f32.gmra.mxu1 %v5043_v51  ;;  %1298 = vrot.lane.b32.xlu1 %v5048_v52, %s4785_s17 }
  0x2d   :  { %1316 = vrot.lane.b32.xlu0 %v5053_v53, %s4785_s17  ;;  %1314 = vrot.lane.b32.xlu2 %v5058_v54, %s4785_s17 }
  0x33   :  { %108 = vmatmul.f32.gmra.mxu0 %v5071_v55 }
  0x34   :  { %149 = vmatmul.f32.gmra.mxu1 %v5076_v56  ;;  %1312 = vrot.lane.b32.xlu1 %v5076_v56, %s4785_s17 }
  0x35   :  { %1296 = vrot.lane.b32.xlu0 %v5071_v55, %s4785_s17  ;;  %1294 = vrot.lane.b32.xlu2 %v5038_v50, %s4785_s17 }
  0x3b   :  { %111 = vmatmul.f32.gmra.mxu0 %v5048_v52 }
  0x3c   :  { %152 = vmatmul.f32.gmra.mxu1 %v5058_v54  ;;  %1292 = vrot.lane.b32.xlu1 %v5005_v45, %s4785_s17 }
  0x3d   :  { %1310 = vrot.lane.b32.xlu0 %v5043_v51, %s4785_s17  ;;  %1308 = vrot.lane.b32.xlu2 %v5010_v46, %s4785_s17  ;;  %s4788_s17 = smov 1  }
  0x43   :  { %114 = vmatmul.f32.gmra.mxu0 %v5025_v49 }
  0x44   :  { %155 = vmatmul.f32.gmra.mxu1 %v5053_v53  ;;  %1615 = vrot.lane.b32.xlu1 %v4968_v36, %s4786_s14 }
  0x45   :  { %1599 = vrot.lane.b32.xlu0 %v4935_v27, %s4786_s14  ;;  %1597 = vrot.lane.b32.xlu2 %v4960_v34, %s4786_s14 }
  0x4b   :  { %117 = vmatmul.f32.gmra.mxu0 %v5020_v48 }
  0x4c   :  { %158 = vmatmul.f32.gmra.mxu1 %v5015_v47  ;;  %1225 = vrot.lane.b32.xlu1 %v4935_v27, %s4787_s15 }
  0x4d   :  { %1613 = vrot.lane.b32.xlu0 %v4976_v38, %s4786_s14  ;;  %1241 = vrot.lane.b32.xlu2 %v4968_v36, %s4787_s15 }
  0x53   :  { %120 = vmatmul.f32.gmra.mxu0 %v4960_v34 }
  0x54   :  { %161 = vmatmul.f32.gmra.mxu1 %v4976_v38  ;;  %1611 = vrot.lane.b32.xlu1 %v5015_v47, %s4786_s14 }
  0x55   :  { %1595 = vrot.lane.b32.xlu0 %v5020_v48, %s4786_s14  ;;  %1223 = vrot.lane.b32.xlu2 %v4960_v34, %s4787_s15 }
  0x5b   :  { %123 = vmatmul.f32.gmra.mxu0 %v4935_v27 }
  0x5c   :  { %164 = vmatmul.f32.gmra.mxu1 %v4968_v36  ;;  %1593 = vrot.lane.b32.xlu1 %v5025_v49, %s4786_s14  ;;  %v5122_v57 = vpop.permute.xlu2 %206 }
  0x5d   :  { %1239 = vrot.lane.b32.xlu0 %v4976_v38, %s4787_s15  ;;  %1609 = vrot.lane.b32.xlu2 %v5053_v53, %s4786_s14 }
  0x64   :  { %1237 = vrot.lane.b32.xlu1 %v5015_v47, %s4787_s15 }
  0x65   :  { %1221 = vrot.lane.b32.xlu0 %v5020_v48, %s4787_s15  ;;  %1591 = vrot.lane.b32.xlu2 %v5048_v52, %s4786_s14  ;;  %v5134_v58 = vpop.permute.xlu2 %211 }
  0x6c   :  { %1219 = vrot.lane.b32.xlu1 %v5025_v49, %s4787_s15 }
  0x6d   :  { %1607 = vrot.lane.b32.xlu0 %v5058_v54, %s4786_s14  ;;  %1235 = vrot.lane.b32.xlu2 %v5053_v53, %s4787_s15 }
  0x6f   :  { %v5142_v59 = vpop.permute.xlu2 %1306 }
  0x74   :  { %1605 = vrot.lane.b32.xlu1 %v5076_v56, %s4786_s14 }
  0x75   :  { %1589 = vrot.lane.b32.xlu0 %v5071_v55, %s4786_s14  ;;  %1217 = vrot.lane.b32.xlu2 %v5048_v52, %s4787_s15  ;;  %v5150_v60 = vpop.permute.xlu1 %196  ;;  %v5152_v61 = vpop.permute.xlu0 %186 }
  0x77   :  { %v5154_v62 = vpop.permute.xlu2 %1320 }
  0x7c   :  { %1587 = vrot.lane.b32.xlu1 %v5038_v50, %s4786_s14 }
  0x7d   :  { %1233 = vrot.lane.b32.xlu0 %v5058_v54, %s4787_s15  ;;  %1603 = vrot.lane.b32.xlu2 %v5043_v51, %s4786_s14  ;;  %v5162_v63 = vpop.permute.xlu1 %201 }
  0x7e   :  { %v5164_v0 = vpop.permute.xlu0 %191 }
  0x7f   :  { %v5166_v1 = vpop.permute.xlu2 %1300 }
  0x84   :  { %1231 = vrot.lane.b32.xlu1 %v5076_v56, %s4787_s15 }
  0x85   :  { %1215 = vrot.lane.b32.xlu0 %v5071_v55, %s4787_s15  ;;  %1585 = vrot.lane.b32.xlu2 %v5005_v45, %s4786_s14  ;;  %v5174_v2 = vpop.permute.xlu1 %221 }
  0x86   :  { %v5176_v3 = vpop.permute.xlu0 %216 }
  0x87   :  { %v5178_v4 = vpop.permute.xlu2 %1314 }
  0x8c   :  { %1213 = vrot.lane.b32.xlu1 %v5038_v50, %s4787_s15 }
  0x8d   :  { %1601 = vrot.lane.b32.xlu0 %v5010_v46, %s4786_s14  ;;  %1229 = vrot.lane.b32.xlu2 %v5043_v51, %s4787_s15  ;;  %v5186_v5 = vpop.permute.xlu1 %1304 }
  0x8e   :  { %v5188_v6 = vpop.permute.xlu0 %1322 }
  0x8f   :  { %v5190_v7 = vpop.permute.xlu2 %1294 }
  0x90   :  { %9017 = vst [vmem:[#allocation2_spill] sm:$0xff] %v5190_v7 }
  0x94   :  { %1227 = vrot.lane.b32.xlu1 %v5010_v46, %s4787_s15 }
  0x95   :  { %1211 = vrot.lane.b32.xlu0 %v5005_v45, %s4787_s15  ;;  %1802 = vrot.lane.b32.xlu2 %v4935_v27, %s4788_s17 }
  0x96   :  { %v5198_v8 = vpop.permute.xlu1 %1318 }
  0x97   :  { %v5200_v9 = vpop.permute.xlu0 %1302  ;;  %v5202_v10 = vpop.permute.xlu2 %1308 }
  0x98   :  { %9018 = vst [vmem:[#allocation3_spill] sm:$0xff] %v5202_v10 }
  0x9c   :  { %1800 = vrot.lane.b32.xlu1 %v4960_v34, %s4788_s17 }
  0x9d   :  { %1818 = vrot.lane.b32.xlu0 %v4968_v36, %s4788_s17  ;;  %1816 = vrot.lane.b32.xlu2 %v4976_v38, %s4788_s17 }
  0x9e   :  { %v5210_v11 = vpop.permute.xlu1 %1298 }
  0x9f   :  { %v5212_v12 = vpop.permute.xlu0 %1316  ;;  %v5214_v13 = vpop.permute.xlu2 %1597 }
  0xa0   :  { %9019 = vst [vmem:[#allocation4_spill] sm:$0xff] %v5214_v13  ;;  %v5216_v14 = vpop.f32.mrf.mxu0 }
  0xa1   :  { %v5218_v15 = vpop.f32.mrf.mxu1 }
  0xa4   :  { %1814 = vrot.lane.b32.xlu1 %v5015_v47, %s4788_s17 }
  0xa5   :  { %1798 = vrot.lane.b32.xlu0 %v5020_v48, %s4788_s17  ;;  %1796 = vrot.lane.b32.xlu2 %v5025_v49, %s4788_s17 }
  0xa6   :  { %v5226_v16 = vpop.permute.xlu1 %1312 }
  0xa7   :  { %9020 = vst [vmem:[#allocation5_spill] sm:$0xff] %v5226_v16  ;;  %v5228_v17 = vpop.permute.xlu0 %1296  ;;  %v5230_v18 = vpop.permute.xlu2 %1241 }
  0xa8   :  { %9021 = vst [vmem:[#allocation6_spill] sm:$0xff] %v5228_v17  ;;  %v5232_v19 = vpop.f32.mrf.mxu0 }
  0xa9   :  { %v5234_v20 = vpop.f32.mrf.mxu1 }
  0xac   :  { %1794 = vrot.lane.b32.xlu1 %v5048_v52, %s4788_s17 }
  0xad   :  { %1812 = vrot.lane.b32.xlu0 %v5053_v53, %s4788_s17  ;;  %1810 = vrot.lane.b32.xlu2 %v5058_v54, %s4788_s17 }
  0xae   :  { %v5242_v21 = vpop.permute.xlu1 %1292 }
  0xaf   :  { %9022 = vst [vmem:[#allocation7_spill] sm:$0xff] %v5242_v21  ;;  %v5244_v22 = vpop.permute.xlu0 %1310  ;;  %v5246_v23 = vpop.permute.xlu2 %1223 }
  0xb0   :  { %9023 = vst [vmem:[#allocation8_spill] sm:$0xff] %v5244_v22  ;;  %v5248_v24 = vpop.f32.mrf.mxu0 }
  0xb1   :  { %v5250_v25 = vpop.f32.mrf.mxu1 }
  0xb4   :  { %1808 = vrot.lane.b32.xlu1 %v5076_v56, %s4788_s17 }
  0xb5   :  { %1792 = vrot.lane.b32.xlu0 %v5071_v55, %s4788_s17  ;;  %1790 = vrot.lane.b32.xlu2 %v5038_v50, %s4788_s17 }
  0xb6   :  { %v5258_v26 = vpop.permute.xlu1 %1615 }
  0xb7   :  { %9024 = vst [vmem:[#allocation9_spill] sm:$0xff] %v5258_v26  ;;  %v5260_v28 = vpop.permute.xlu0 %1599  ;;  %v5262_v29 = vpop.permute.xlu2 %1609 }
  0xb8   :  { %9025 = vst [vmem:[#allocation10_spill] sm:$0xff] %v5260_v28  ;;  %v112_v30 = vpop.f32.mrf.mxu0 }
  0xb9   :  { %9026 = vst [vmem:[#allocation11_spill] sm:$0xff] %v5262_v29  ;;  %v153_v31 = vpop.f32.mrf.mxu1 }
  0xbc   :  { %1788 = vrot.lane.b32.xlu1 %v5005_v45, %s4788_s17 }
  0xbd   :  { %1806 = vrot.lane.b32.xlu0 %v5043_v51, %s4788_s17  ;;  %1804 = vrot.lane.b32.xlu2 %v5010_v46, %s4788_s17 }
  0xbe   :  { %v5270_v32 = vpop.permute.xlu1 %1225 }
  0xbf   :  { %v5272_v33 = vpop.permute.xlu0 %1613  ;;  %v5274_v35 = vpop.permute.xlu2 %1591 }
  0xc0   :  { %9027 = vst [vmem:[#allocation12_spill] sm:$0xff] %v5272_v33  ;;  %v115_v37 = vpop.f32.mrf.mxu0 }
  0xc1   :  { %9028 = vst [vmem:[#allocation13_spill] sm:$0xff] %v5274_v35  ;;  %v156_v39 = vpop.f32.mrf.mxu1 }
  0xc4   :  { %2355 = vrot.lane.b32.xlu1 %v4968_v36, %s4789_s4 }
  0xc5   :  { %2339 = vrot.lane.b32.xlu0 %v4935_v27, %s4789_s4  ;;  %2337 = vrot.lane.b32.xlu2 %v4960_v34, %s4789_s4 }
  0xc6   :  { %v5282_v40 = vpop.permute.xlu1 %1611 }
  0xc7   :  { %9029 = vst [vmem:[#allocation14_spill] sm:$0xff] %v5282_v40  ;;  %v5284_v41 = vpop.permute.xlu0 %1595  ;;  %v5286_v42 = vpop.permute.xlu2 %1235 }
  0xc8   :  { %9030 = vst [vmem:[#allocation15_spill] sm:$0xff] %v5284_v41  ;;  %v118_v43 = vpop.f32.mrf.mxu0 }
  0xc9   :  { %v159_v44 = vpop.f32.mrf.mxu1 }
  0xca   :  { %v160_v16 = vadd.f32 %v159_v44, %v118_v43  ;;  %v170_v44 = vld [vmem:[%s8938_s3 + $0x10] sm:$0xff] }
  0xcc   :  { %2136 = vrot.lane.b32.xlu1 %v4935_v27, %s4790_s16 }
  0xcd   :  { %2353 = vrot.lane.b32.xlu0 %v4976_v38, %s4789_s4  ;;  %2152 = vrot.lane.b32.xlu2 %v4968_v36, %s4790_s16 }
  0xce   :  { %v5294_v35 = vpop.permute.xlu1 %1593 }
  0xcf   :  { %9031 = vst [vmem:[#allocation16_spill] sm:$0xff] %v5294_v35  ;;  %v5296_v29 = vpop.permute.xlu0 %1239  ;;  %v5298_v40 = vpop.permute.xlu2 %1217 }
  0xd0   :  { %v121_v41 = vpop.f32.mrf.mxu0 }
  0xd1   :  { %v162_v13 = vpop.f32.mrf.mxu1 }
  0xd2   :  { %v163_v22 = vadd.f32 %v162_v13, %v121_v41  ;;  %v157_v13 = vadd.f32 %v156_v39, %v115_v37  ;;  %v1243_v37 = vlaneseq  ;;  %v169_v39 = vld [vmem:[%s8938_s3 + $0x8] sm:$0xff] }
  0xd4   :  { %2351 = vrot.lane.b32.xlu1 %v5015_v47, %s4789_s4  ;;  %v5344_v41 = vand.u32 127, %v1243_v37  ;;  %v171_v37 = vld [vmem:[%s8938_s3 + $0x18] sm:$0xff] }
  0xd5   :  { %2335 = vrot.lane.b32.xlu0 %v5020_v48, %s4789_s4  ;;  %2134 = vrot.lane.b32.xlu2 %v4960_v34, %s4790_s16 }
  0xd6   :  { %v5306_v33 = vpop.permute.xlu1 %1237  ;;  %vm1617_vm1 = vcmp.lt.s32.totalorder %v5344_v41, 15  ;;  %vm1245_vm2 = vcmp.lt.s32.totalorder %v5344_v41, 17  ;;  %vm1820_vm3 = vcmp.lt.s32.totalorder %v5344_v41, 1  ;;  %vm2357_vm4 = vcmp.lt.s32.totalorder %v5344_v41, 113 }
  0xd7   :  { %v5308_v26 = vpop.permute.xlu0 %1221  ;;  %v1604_v35 = vpop.permute.xlu2 %1603  ;;  %vm2154_vm5 = vcmp.lt.s32.totalorder %v5344_v41, 127  ;;  %vm2763_vm14 = vcmp.lt.s32.totalorder %v5344_v41, 111 }
  0xd8   :  { %v124_v28 = vpop.f32.mrf.mxu0 }
  0xd9   :  { %v165_v10 = vpop.f32.mrf.mxu1 }
  0xda   :  { %v166_v21 = vadd.f32 %v165_v10, %v124_v28  ;;  %v151_v28 = vadd.f32 %v5250_v25, %v5248_v24  ;;  %v145_v24 = vadd.f32 %v5218_v15, %v5216_v14  ;;  %v168_v25 = vld [vmem:[%s8938_s3] sm:$0xff] }
  0xdc   :  { %257 = vmatpush.msrb.mxu0 %v166_v21  ;;  %4539 = vmatpush.msra.mxu2 %v166_v21  ;;  %v154_v21 = vadd.f32 %v153_v31, %v112_v30  ;;  %v148_v31 = vadd.f32 %v5234_v20, %v5232_v19 }
  0xdd   :  { %2150 = vrot.lane.b32.xlu0 %v4976_v38, %s4790_s16  ;;  %2349 = vrot.lane.b32.xlu2 %v5053_v53, %s4789_s4 }
  0xde   :  { %2333 = vrot.lane.b32.xlu1 %v5025_v49, %s4789_s4  ;;  %258 = vmatpush.msrb.mxu0 %v163_v22  ;;  %v5316_v7 = vpop.permute.xlu1 %1219 }
  0xdf   :  { %4540 = vmatpush.msra.mxu2 %v163_v22  ;;  %v5318_v17 = vpop.permute.xlu0 %1607  ;;  %v5320_v10 = vpop.permute.xlu2 %1585 }
  0xe0   :  { %9032 = vst [vmem:[#allocation17_spill] sm:$0xff] %v5318_v17  ;;  %259 = vmatpush.msrb.mxu0 %v160_v16 }
  0xe1   :  { %4541 = vmatpush.msra.mxu2 %v160_v16 }
  0xe2   :  { %260 = vmatpush.msrb.mxu0 %v157_v13 }
  0xe3   :  { %4542 = vmatpush.msra.mxu2 %v157_v13 }
  0xe4   :  { %261 = vmatpush.msrb.mxu0 %v154_v21 }
  0xe5   :  { %4543 = vmatpush.msra.mxu2 %v154_v21  ;;  %2132 = vrot.lane.b32.xlu0 %v5020_v48, %s4790_s16 }
  0xe6   :  { %2331 = vrot.lane.b32.xlu2 %v5048_v52, %s4789_s4  ;;  %2148 = vrot.lane.b32.xlu1 %v5015_v47, %s4790_s16  ;;  %v5330_v22 = vpop.permute.xlu1 %1605 }
  0xe7   :  { %9033 = vst [vmem:[#allocation18_spill] sm:$0xff] %v5330_v22  ;;  %262 = vmatpush.msrb.mxu0 %v151_v28  ;;  %4544 = vmatpush.msra.mxu2 %v151_v28  ;;  %v5332_v16 = vpop.permute.xlu0 %1589  ;;  %v1230_v30 = vpop.permute.xlu2 %1229 }
  0xe8   :  { %9034 = vst [vmem:[#allocation19_spill] sm:$0xff] %v5332_v16 }
  0xe9   :  { %263 = vmatpush.msrb.mxu0 %v148_v31  ;;  %4545 = vmatpush.msra.mxu2 %v148_v31 }
  0xeb   :  { %264 = vmatpush.msrb.mxu0 %v145_v24  ;;  %4546 = vmatpush.msra.mxu2 %v145_v24 }
  0xec   :  { %4212 = vmatmul.msk.f32.vlgmr.msrb.gmra.mxu0 %vm224_vm0, %v168_v25  ;;  %4213 = vmatmul.msk.f32.vlgmr.msra.gmra.mxu2 %vm224_vm0, %v169_v39 }
  0xed   :  { %2347 = vrot.lane.b32.xlu0 %v5058_v54, %s4789_s4 }
  0xee   :  { %2146 = vrot.lane.b32.xlu2 %v5053_v53, %s4790_s16  ;;  %2130 = vrot.lane.b32.xlu1 %v5025_v49, %s4790_s16  ;;  %v1588_v14 = vpop.permute.xlu1 %1587 }
  0xef   :  { %v5355_v15 = vpop.permute.xlu0 %1233  ;;  %v1803_v19 = vpop.permute.xlu2 %1802  ;;  %v5359_v20 = vsel %vm1617_vm1, %v1588_v14, %v1604_v35  ;;  %v5363_v43 = vsel %vm1617_vm1, %v1604_v35, %v1588_v14 }
  0xf0   :  { %9035 = vst [vmem:[#allocation20_spill] sm:$0xff] %v5359_v20 }
  0xf1   :  { %9036 = vst [vmem:[#allocation21_spill] sm:$0xff] %v5363_v43 }
  0xf4   :  { %4214 = vmatmul.msk.f32.gmra.mxu2 %vm224_vm0, %v170_v44 }
  0xf5   :  { %2329 = vrot.lane.b32.xlu0 %v5071_v55, %s4789_s4 }
  0xf6   :  { %2128 = vrot.lane.b32.xlu2 %v5048_v52, %s4790_s16  ;;  %2345 = vrot.lane.b32.xlu1 %v5076_v56, %s4789_s4  ;;  %v1232_v13 = vpop.permute.xlu1 %1231 }
  0xf7   :  { %v1216_v35 = vpop.permute.xlu0 %1215  ;;  %v1817_v21 = vpop.permute.xlu2 %1816 }
  0xf8   :  { %v5378_v28 = vsel %vm1245_vm2, %v1216_v35, %v1232_v13  ;;  %v5382_v31 = vsel %vm1245_vm2, %v1232_v13, %v1216_v35 }
  0xf9   :  { %9037 = vst [vmem:[#allocation22_spill] sm:$0xff] %v5378_v28  ;;  %v174_v28 = vld [vmem:[%s8938_s3 + $0x30] sm:$0xff] }
  0xfc   :  { %4215 = vmatmul.msk.f32.gmra.mxu2 %vm224_vm0, %v171_v37  ;;  %v172_v37 = vld [vmem:[%s8938_s3 + $0x20] sm:$0xff] }
  0xfd   :  { %2144 = vrot.lane.b32.xlu0 %v5058_v54, %s4790_s16 }
  0xfe   :  { %2343 = vrot.lane.b32.xlu2 %v5043_v51, %s4789_s4  ;;  %2327 = vrot.lane.b32.xlu1 %v5038_v50, %s4789_s4  ;;  %v1214_v24 = vpop.permute.xlu1 %1213 }
  0xff   :  { %v1602_v25 = vpop.permute.xlu0 %1601  ;;  %v1797_v39 = vpop.permute.xlu2 %1796  ;;  %v5396_v14 = vsel %vm1245_vm2, %v1214_v24, %v1230_v30  ;;  %v5400_v44 = vsel %vm1245_vm2, %v1230_v30, %v1214_v24 }
 0x100   :  { %9038 = vst [vmem:[#allocation23_spill] sm:$0xff] %v5396_v14  ;;  %v5405_v13 = vsel %vm1617_vm1, %v5320_v10, %v1602_v25  ;;  %v5410_v35 = vsel %vm1617_vm1, %v1602_v25, %v5320_v10 }
 0x101   :  { %9039 = vst [vmem:[#allocation24_spill] sm:$0xff] %v5405_v13 }
 0x102   :  { %9040 = vst [vmem:[#allocation25_spill] sm:$0xff] %v5410_v35 }
 0x104   :  { %4216 = vmatmul.msk.f32.gmra.mxu2 %vm224_vm0, %v172_v37  ;;  %v173_v37 = vld [vmem:[%s8938_s3 + $0x28] sm:$0xff] }
 0x105   :  { %2126 = vrot.lane.b32.xlu0 %v5071_v55, %s4790_s16 }
 0x106   :  { %2325 = vrot.lane.b32.xlu2 %v5005_v45, %s4789_s4  ;;  %2142 = vrot.lane.b32.xlu1 %v5076_v56, %s4790_s16  ;;  %v1228_v30 = vpop.permute.xlu1 %1227 }
 0x107   :  { %v1212_v24 = vpop.permute.xlu0 %1211  ;;  %v1811_v13 = vpop.permute.xlu2 %1810 }
 0x108   :  { %v5424_v10 = vsel %vm1245_vm2, %v1212_v24, %v1228_v30  ;;  %v5428_v25 = vsel %vm1245_vm2, %v1228_v30, %v1212_v24 }
 0x109   :  { %9041 = vst [vmem:[#allocation26_spill] sm:$0xff] %v5424_v10 }
 0x10c   :  { %4217 = vmatmul.msk.f32.gmra.mxu2 %vm224_vm0, %v173_v37 }
 0x10d   :  { %2341 = vrot.lane.b32.xlu0 %v5010_v46, %s4789_s4 }
 0x10e   :  { %2140 = vrot.lane.b32.xlu2 %v5043_v51, %s4790_s16  ;;  %2124 = vrot.lane.b32.xlu1 %v5038_v50, %s4790_s16  ;;  %v1801_v20 = vpop.permute.xlu1 %1800 }
 0x10f   :  { %v1819_v30 = vpop.permute.xlu0 %1818  ;;  %v1791_v24 = vpop.permute.xlu2 %1790  ;;  %v5443_v10 = vsel %vm1820_vm3, %v1801_v20, %v1817_v21  ;;  %v5447_v37 = vsel %vm1820_vm3, %v1817_v21, %v1801_v20 }
 0x110   :  { %9042 = vst [vmem:[#allocation27_spill] sm:$0xff] %v5443_v10  ;;  %v5451_v14 = vsel %vm1820_vm3, %v1803_v19, %v1819_v30  ;;  %v5455_v35 = vsel %vm1820_vm3, %v1819_v30, %v1803_v19  ;;  %v175_v10 = vld [vmem:[%s8938_s3 + $0x38] sm:$0xff]  ;;  %s4792_s3 = smov 112  }
 0x111   :  { %9043 = vst [vmem:[#allocation28_spill] sm:$0xff] %v5451_v14 }
 0x114   :  { %4218 = vmatmul.msk.f32.gmra.mxu2 %vm224_vm0, %v174_v28 }
 0x115   :  { %2122 = vrot.lane.b32.xlu0 %v5005_v45, %s4790_s16 }
 0x116   :  { %2745 = vrot.lane.b32.xlu2 %v4935_v27, %s4791_s12  ;;  %2138 = vrot.lane.b32.xlu1 %v5010_v46, %s4790_s16  ;;  %v1815_v20 = vpop.permute.xlu1 %1814 }
 0x117   :  { %v1799_v21 = vpop.permute.xlu0 %1798  ;;  %v1805_v19 = vpop.permute.xlu2 %1804 }
 0x118   :  { %v5469_v30 = vsel %vm1820_vm3, %v1799_v21, %v1815_v20  ;;  %v5473_v28 = vsel %vm1820_vm3, %v1815_v20, %v1799_v21 }
 0x119   :  { %9044 = vst [vmem:[#allocation29_spill] sm:$0xff] %v5469_v30 }
 0x11c   :  { %4219 = vmatmul.msk.f32.gmra.mxu2 %vm224_vm0, %v175_v10 }
 0x11d   :  { %2761 = vrot.lane.b32.xlu0 %v4968_v36, %s4791_s12 }
 0x11e   :  { %2759 = vrot.lane.b32.xlu2 %v4976_v38, %s4791_s12  ;;  %2743 = vrot.lane.b32.xlu1 %v4960_v34, %s4791_s12  ;;  %v1795_v30 = vpop.permute.xlu1 %1794 }
 0x11f   :  { %v1813_v14 = vpop.permute.xlu0 %1812  ;;  %v2338_v43 = vpop.permute.xlu2 %2337  ;;  %v5487_v20 = vsel %vm1820_vm3, %v1795_v30, %v1811_v13  ;;  %v5491_v21 = vsel %vm1820_vm3, %v1811_v13, %v1795_v30 }
 0x120   :  { %9045 = vst [vmem:[#allocation30_spill] sm:$0xff] %v5487_v20  ;;  %v5495_v10 = vsel %vm1820_vm3, %v1797_v39, %v1813_v14  ;;  %v5499_v22 = vsel %vm1820_vm3, %v1813_v14, %v1797_v39 }
 0x121   :  { %9046 = vst [vmem:[#allocation31_spill] sm:$0xff] %v5495_v10 }
 0x125   :  { %2542 = vrot.lane.b32.xlu0 %v4935_v27, %s4792_s3 }
 0x126   :  { %2741 = vrot.lane.b32.xlu2 %v5020_v48, %s4791_s12  ;;  %2558 = vrot.lane.b32.xlu1 %v4968_v36, %s4792_s3  ;;  %v1809_v13 = vpop.permute.xlu1 %1808 }
 0x127   :  { %v1793_v30 = vpop.permute.xlu0 %1792  ;;  %v2153_v20 = vpop.permute.xlu2 %2152 }
 0x128   :  { %v5509_v10 = vsel %vm1820_vm3, %v1793_v30, %v1809_v13  ;;  %v5513_v39 = vsel %vm1820_vm3, %v1809_v13, %v1793_v30 }
 0x129   :  { %9047 = vst [vmem:[#allocation32_spill] sm:$0xff] %v5509_v10 }
 0x12d   :  { %2757 = vrot.lane.b32.xlu0 %v5015_v47, %s4791_s12 }
 0x12e   :  { %2556 = vrot.lane.b32.xlu2 %v4976_v38, %s4792_s3  ;;  %2540 = vrot.lane.b32.xlu1 %v4960_v34, %s4792_s3  ;;  %v1789_v27 = vpop.permute.xlu1 %1788  ;;  %v4400_v34 = vld [vmem:[%s8939_s10 + $0xc] sm:$0x3] }
 0x12f   :  { %v1807_v36 = vpop.permute.xlu0 %1806  ;;  %v5521_v14 = vpop.permute.xlu2 %2134  ;;  %v5525_v10 = vsel %vm1820_vm3, %v1789_v27, %v1805_v19  ;;  %v5529_v13 = vsel %vm1820_vm3, %v1805_v19, %v1789_v27 }
 0x130   :  { %9048 = vst [vmem:[#allocation33_spill] sm:$0xff] %v5525_v10  ;;  %v5533_v30 = vsel %vm1820_vm3, %v1791_v24, %v1807_v36  ;;  %v5537_v38 = vsel %vm1820_vm3, %v1807_v36, %v1791_v24  ;;  %v5545_v10 = vperm.slane %v4400_v34, 1 }
 0x131   :  { %9049 = vst [vmem:[#allocation34_spill] sm:$0xff] %v5529_v13 }
 0x132   :  { %9050 = vst [vmem:[#allocation35_spill] sm:$0xff] %v5533_v30 }
 0x135   :  { %2739 = vrot.lane.b32.xlu0 %v5025_v49, %s4791_s12 }
 0x136   :  { %2538 = vrot.lane.b32.xlu2 %v5020_v48, %s4792_s3  ;;  %2755 = vrot.lane.b32.xlu1 %v5053_v53, %s4791_s12  ;;  %v2356_v19 = vpop.permute.xlu1 %2355  ;;  %v4375_v48 = vld [vmem:[%s8939_s10 + $0xa] sm:$0x3] }
 0x137   :  { %v2340_v24 = vpop.permute.xlu0 %2339  ;;  %v2350_v27 = vpop.permute.xlu2 %2349  ;;  %v5564_v34 = vperm.slane %v4375_v48, 1 }
 0x138   :  { %v5553_v36 = vsel %vm2357_vm4, %v2340_v24, %v2356_v19  ;;  %v2373_v30 = vsel %vm2357_vm4, %v2356_v19, %v2340_v24 }
 0x139   :  { %9051 = vst [vmem:[#allocation36_spill] sm:$0xff] %v5553_v36  ;;  %v5558_v16 = vmul.f32 %v5545_v10, %v2373_v30 }
 0x13b   :  { %9052 = vst [vmem:[#allocation37_spill] sm:$0xff] %v5558_v16 }
 0x13d   :  { %2554 = vrot.lane.b32.xlu0 %v5015_v47, %s4792_s3 }
 0x13e   :  { %2753 = vrot.lane.b32.xlu2 %v5058_v54, %s4791_s12  ;;  %2737 = vrot.lane.b32.xlu1 %v5048_v52, %s4791_s12  ;;  %v2137_v19 = vpop.permute.xlu1 %2136 }
 0x13f   :  { %v2354_v30 = vpop.permute.xlu0 %2353  ;;  %v5574_v24 = vsel %vm2154_vm5, %v2137_v19, %v2153_v20  ;;  %v2170_v16 = vsel %vm2154_vm5, %v2153_v20, %v2137_v19 }
 0x140   :  { %v5580_v48 = vsel %vm2357_vm4, %v2338_v43, %v2354_v30  ;;  %v2372_v47 = vsel %vm2357_vm4, %v2354_v30, %v2338_v43  ;;  %v2332_v36 = vpop.permute.xlu2 %2331  ;;  %v5585_v17 = vmul.f32 %v5564_v34, %v2170_v16 }
 0x141   :  { %9053 = vst [vmem:[#allocation38_spill] sm:$0xff] %v5580_v48  ;;  %v5588_v13 = vmul.f32 %v5545_v10, %v2372_v47 }
 0x142   :  { %9054 = vst [vmem:[#allocation39_spill] sm:$0xff] %v5585_v17 }
 0x143   :  { %9055 = vst [vmem:[#allocation40_spill] sm:$0xff] %v5588_v13 }
 0x145   :  { %2536 = vrot.lane.b32.xlu0 %v5025_v49, %s4792_s3 }
 0x146   :  { %2735 = vrot.lane.b32.xlu2 %v5071_v55, %s4791_s12  ;;  %2552 = vrot.lane.b32.xlu1 %v5053_v53, %s4792_s3  ;;  %v2352_v20 = vpop.permute.xlu1 %2351 }
 0x147   :  { %v2336_v19 = vpop.permute.xlu0 %2335 }
 0x148   :  { %v5596_v48 = vpop.permute.xlu2 %2146  ;;  %v5600_v16 = vsel %vm2357_vm4, %v2336_v19, %v2352_v20  ;;  %v2371_v43 = vsel %vm2357_vm4, %v2352_v20, %v2336_v19 }
 0x149   :  { %9056 = vst [vmem:[#allocation41_spill] sm:$0xff] %v5600_v16  ;;  %v5605_v30 = vmul.f32 %v5545_v10, %v2371_v43 }
 0x14b   :  { %9057 = vst [vmem:[#allocation42_spill] sm:$0xff] %v5605_v30 }
 0x14d   :  { %2751 = vrot.lane.b32.xlu0 %v5076_v56, %s4791_s12 }
 0x14e   :  { %2550 = vrot.lane.b32.xlu2 %v5058_v54, %s4792_s3  ;;  %2534 = vrot.lane.b32.xlu1 %v5048_v52, %s4792_s3 }
 0x14f   :  { %v5613_v49 = vpop.permute.xlu0 %2150 }
 0x150   :  { %v2169_v53 = vsel %vm2154_vm5, %v5613_v49, %v5521_v14  ;;  %v5619_v47 = vpop.permute.xlu2 %2128  ;;  %v2334_v20 = vpop.permute.xlu1 %2333 }
 0x151   :  { %9058 = vst [vmem:[#allocation43_spill] sm:$0xff] %v5619_v47  ;;  %v5622_v19 = vmul.f32 %v5564_v34, %v2169_v53  ;;  %v5626_v43 = vsel %vm2357_vm4, %v2334_v20, %v2350_v27  ;;  %v2370_v52 = vsel %vm2357_vm4, %v2350_v27, %v2334_v20 }
 0x152   :  { %9060 = vst [vmem:[#allocation45_spill] sm:$0xff] %v5626_v43  ;;  %v5631_v54 = vmul.f32 %v5545_v10, %v2370_v52  ;;  %v450_v43 = vld [vmem:[%s8940_s2 + $0x40] sm:$0xff] }
 0x153   :  { %9059 = vst [vmem:[#allocation44_spill] sm:$0xff] %v5622_v19 }
 0x154   :  { %9061 = vst [vmem:[#allocation46_spill] sm:$0xff] %v5631_v54 }
 0x155   :  { %2733 = vrot.lane.b32.xlu0 %v5038_v50, %s4791_s12 }
 0x156   :  { %2532 = vrot.lane.b32.xlu2 %v5071_v55, %s4792_s3  ;;  %2749 = vrot.lane.b32.xlu1 %v5043_v51, %s4791_s12 }
 0x157   :  { %v5639_v53 = vpop.permute.xlu0 %2132 }
 0x158   :  { %v5641_v30 = vpop.permute.xlu2 %2343  ;;  %v5643_v13 = vpop.permute.xlu1 %2148 }
 0x159   :  { %v2168_v27 = vsel %vm2154_vm5, %v5643_v13, %v5639_v53 }
 0x15a   :  { %v5650_v20 = vmul.f32 %v5564_v34, %v2168_v27  ;;  %v456_v27 = vld [vmem:[%s8940_s2 + $0x70] sm:$0xff] }
 0x15b   :  { %577 = vmatpush.msrb.mxu2 %v456_v27  ;;  %v448_v27 = vld [vmem:[%s8940_s2 + $0x30] sm:$0xff] }
 0x15c   :  { %9062 = vst [vmem:[#allocation47_spill] sm:$0xff] %v5650_v20  ;;  %v457_v20 = vld [vmem:[%s8940_s2 + $0x78] sm:$0xff] }
 0x15d   :  { %2548 = vrot.lane.b32.xlu0 %v5076_v56, %s4792_s3  ;;  %v454_v56 = vld [vmem:[%s8940_s2 + $0x60] sm:$0xff]  ;;  %618 = vmatpush.msra.mxu0 %v457_v20 }
 0x15e   :  { %2747 = vrot.lane.b32.xlu2 %v5010_v46, %s4791_s12  ;;  %2731 = vrot.lane.b32.xlu1 %v5005_v45, %s4791_s12 }
 0x15f   :  { %v2348_v55 = vpop.permute.xlu0 %2347  ;;  %495 = vmatpush.msra.mxu3 %v454_v56  ;;  %4547 = vmatpush.msrb.mxu1 %v457_v20  ;;  %v446_v56 = vld [vmem:[%s8940_s2 + $0x20] sm:$0xff]  ;;  %v444_v20 = vld [vmem:[%s8940_s2 + $0x10] sm:$0xff] }
 0x160   :  { %v5660_v52 = vsel %vm2357_vm4, %v2332_v36, %v2348_v55  ;;  %v2369_v54 = vsel %vm2357_vm4, %v2348_v55, %v2332_v36  ;;  %v5664_v19 = vpop.permute.xlu1 %2130  ;;  %v5682_v55 = vpop.permute.xlu2 %2325 }
 0x161   :  { %9063 = vst [vmem:[#allocation48_spill] sm:$0xff] %v5660_v52  ;;  %v5676_v17 = vmul.f32 %v5545_v10, %v2369_v54  ;;  %v2167_v36 = vsel %vm2154_vm5, %v5596_v48, %v5664_v19  ;;  %v452_v54 = vld [vmem:[%s8940_s2 + $0x50] sm:$0xff]  ;;  %496 = vmatpush.msra.mxu3 %v450_v43  ;;  %v442_v43 = vld [vmem:[%s8940_s2] sm:$0xff] }
 0x162   :  { %9064 = vst [vmem:[#allocation49_spill] sm:$0xff] %v5664_v19  ;;  %v5685_v52 = vmul.f32 %v5564_v34, %v2167_v36  ;;  %578 = vmatpush.msrb.mxu2 %v452_v54  ;;  %v449_v36 = vld [vmem:[%s8940_s2 + $0x38] sm:$0xff] }
 0x163   :  { %9065 = vst [vmem:[#allocation50_spill] sm:$0xff] %v5676_v17  ;;  %v453_v17 = vld [vmem:[%s8940_s2 + $0x58] sm:$0xff]  ;;  %497 = vmatpush.msra.mxu3 %v446_v56 }
 0x164   :  { %9066 = vst [vmem:[#allocation51_spill] sm:$0xff] %v5685_v52  ;;  %619 = vmatpush.msra.mxu0 %v453_v17  ;;  %579 = vmatpush.msrb.mxu2 %v448_v27 }
 0x165   :  { %2530 = vrot.lane.b32.xlu0 %v5038_v50, %s4792_s3  ;;  %v445_v50 = vld [vmem:[%s8940_s2 + $0x18] sm:$0xff]  ;;  %498 = vmatpush.msra.mxu3 %v442_v43  ;;  %v1147_v43 = vld [vmem:[%s8942_s8] sm:$0xff] }
 0x166   :  { %2528 = vrot.lane.b32.xlu2 %v5005_v45, %s4792_s3  ;;  %2546 = vrot.lane.b32.xlu1 %v5043_v51, %s4792_s3 }
 0x167   :  { %v2330_v54 = vpop.permute.xlu0 %2329  ;;  %620 = vmatpush.msra.mxu0 %v449_v36  ;;  %4548 = vmatpush.msrb.mxu1 %v453_v17  ;;  %v2934_v17 = vld [vmem:[%s8941_s6] sm:$0xff] }
 0x168   :  { %v2346_v56 = vpop.permute.xlu1 %2345  ;;  %580 = vmatpush.msrb.mxu2 %v444_v20 }
 0x169   :  { %v5722_v45 = vsel %vm2357_vm4, %v2330_v54, %v2346_v56  ;;  %v2368_v51 = vsel %vm2357_vm4, %v2346_v56, %v2330_v54  ;;  %v266_v52 = vpop.f32.mrf.mxu0  ;;  %621 = vmatpush.msra.mxu0 %v445_v50  ;;  %4549 = vmatpush.msrb.mxu1 %v449_v36 }
 0x16a   :  { %9067 = vst [vmem:[#allocation52_spill] sm:$0xff] %v5722_v45  ;;  %v5727_v27 = vmul.f32 %v5545_v10, %v2368_v51  ;;  %v267_v16 = vadd.f32 %v266_v52, %v5152_v61  ;;  %v5736_v45 = vpop.permute.xlu2 %2140 }
 0x16b   :  { %9069 = vst [vmem:[#allocation54_spill] sm:$0xff] %v5736_v45  ;;  %4550 = vmatpush.msrb.mxu1 %v445_v50 }
 0x16c   :  { %9068 = vst [vmem:[#allocation53_spill] sm:$0xff] %v5727_v27  ;;  %v4220_v54 = vmul.f32 -1.442695, %v267_v16 }
 0x16d   :  { %2544 = vrot.lane.b32.xlu0 %v5010_v46, %s4792_s3 }
 0x16e   :  { %4564 = vpow2.f32 %v4220_v54  ;;  %2944 = vperm.xlu2 %4563, %v2934_v17   ;;  %1157 = vperm.xlu1 %4562, %v1147_v43   ;;  %v1083_v17 = vld [vmem:[%s8943_s7] sm:$0xff]  ;;  %v1084_v43 = vld [vmem:[%s8943_s7 + $0x8] sm:$0xff] }
 0x16f   :  { %v269_v61 = vpop.f32.mrf.mxu2  ;;  %v5740_v52 = vpop.permute.xlu0 %2144  ;;  %v2935_v54 = vld [vmem:[%s8941_s6 + $0x8] sm:$0xff] }
 0x170   :  { %9070 = vst [vmem:[#allocation55_spill] sm:$0xff] %v5740_v52  ;;  %v270_v36 = vadd.f32 %v269_v61, %v5164_v0  ;;  %v2166_v20 = vsel %vm2154_vm5, %v5740_v52, %v5619_v47  ;;  %v2328_v56 = vpop.permute.xlu1 %2327 }
 0x171   :  { %v5748_v16 = vmul.f32 %v5564_v34, %v2166_v20  ;;  %v5753_v46 = vsel %vm2357_vm4, %v2328_v56, %v5641_v30  ;;  %v2367_v50 = vsel %vm2357_vm4, %v5641_v30, %v2328_v56 }
 0x172   :  { %9072 = vst [vmem:[#allocation57_spill] sm:$0xff] %v5753_v46  ;;  %v4221_v51 = vmul.f32 -1.442695, %v270_v36  ;;  %v5759_v0 = vmul.f32 %v5545_v10, %v2367_v50  ;;  %v5770_v30 = vpop.permute.xlu2 %2745 }
 0x173   :  { %9071 = vst [vmem:[#allocation56_spill] sm:$0xff] %v5748_v16 }
 0x174   :  { %9073 = vst [vmem:[#allocation58_spill] sm:$0xff] %v5759_v0  ;;  %v4565_v61 = vpop.eup %4564  ;;  %4566 = vpow2.f32 %v4221_v51 }
 0x175   :  { %v314_v20 = vadd.f32 1.0, %v4565_v61  ;;  %1093 = vperm.xlu0 %4561, %v1083_v17  }
 0x176   :  { %1098 = vperm.xlu2 %4563, %v1084_v43   ;;  %2949 = vperm.xlu1 %4562, %v2935_v54   ;;  %v1148_v43 = vld [vmem:[%s8942_s8 + $0x8] sm:$0xff] }
 0x177   :  { %4568 = vrcp.f32 %v314_v20  ;;  %v272_v36 = vpop.f32.mrf.mxu2  ;;  %v5772_v56 = vpop.permute.xlu0 %2126  ;;  %vm327_vm7 = vweird.f32 %v314_v20 }
 0x178   :  { %9074 = vst [vmem:[#allocation59_spill] sm:$0xff] %v5772_v56  ;;  %v273_v50 = vadd.f32 %v272_v36, %v5150_v60  ;;  %v5775_v0 = vpop.permute.xlu1 %2142  ;;  %v1149_v60 = vld [vmem:[%s8942_s8 + $0x10] sm:$0xff] }
 0x179   :  { %9075 = vst [vmem:[#allocation60_spill] sm:$0xff] %v5775_v0  ;;  %v2165_v27 = vsel %vm2154_vm5, %v5775_v0, %v5772_v56  ;;  %v1085_v36 = vld [vmem:[%s8943_s7 + $0x10] sm:$0xff] }
 0x17a   :  { %v4567_v51 = vpop.eup %4566  ;;  %v4222_v61 = vmul.f32 -1.442695, %v273_v50  ;;  %v5782_v17 = vmul.f32 %v5564_v34, %v2165_v27 }
 0x17b   :  { %v5787_v54 = vadd.f32 1.0, %v4567_v51  ;;  %v5796_v51 = vpop.permute.xlu2 %2759 }
 0x17c   :  { %9076 = vst [vmem:[#allocation61_spill] sm:$0xff] %v5782_v17  ;;  %4570 = vpow2.f32 %v4222_v61 }
 0x17d   :  { %v4569_v16 = vpop.eup %4568  ;;  %4572 = vrcp.f32 %v5787_v54  ;;  %1162 = vperm.xlu0 %4561, %v1148_v43   ;;  %vm342_vm12 = vweird.f32 %v5787_v54 }
 0x17e   :  { %1167 = vperm.xlu2 %4563, %v1149_v60   ;;  %1103 = vperm.xlu1 %4562, %v1085_v36   ;;  %v323_v27 = vmul.f32 %v4569_v16, %v314_v20  ;;  %v331_v36 = vand.u32 2147483647, %v314_v20  ;;  %vm328_vm6 = vweird.f32 %v4569_v16 }
 0x17f   :  { %v275_v50 = vpop.f32.mrf.mxu2  ;;  %v2342_v17 = vpop.permute.xlu0 %2341  ;;  %vm329_vm8 = vmor %vm327_vm7, %vm328_vm6 }
 0x180   :  { %v276_v46 = vadd.f32 %v275_v50, %v5162_v63  ;;  %v5802_v56 = vsel %vm2357_vm4, %v5682_v55, %v2342_v17  ;;  %v2366_v61 = vsel %vm2357_vm4, %v2342_v17, %v5682_v55  ;;  %v5807_v0 = vpop.permute.xlu1 %2124  ;;  %v324_v43 = vsub.f32 1.0, %v323_v27  ;;  %v2936_v55 = vld [vmem:[%s8941_s6 + $0x10] sm:$0xff] }
 0x181   :  { %9077 = vst [vmem:[#allocation62_spill] sm:$0xff] %v5802_v56  ;;  %v5810_v60 = vmul.f32 %v5545_v10, %v2366_v61  ;;  %v2164_v63 = vsel %vm2154_vm5, %v5736_v45, %v5807_v0  ;;  %v333_v50 = vand.u32 2147483648, %v314_v20  ;;  %v1150_v61 = vld [vmem:[%s8942_s8 + $0x18] sm:$0xff]  ;;  %vm332_vm10 = vcmp.eq.f32.partialorder %v331_v36, 8.507059e+37 }
 0x182   :  { %9078 = vst [vmem:[#allocation63_spill] sm:$0xff] %v5807_v0  ;;  %v4571_v47 = vpop.eup %4570  ;;  %v4223_v52 = vmul.f32 -1.442695, %v276_v46  ;;  %v5817_v56 = vmul.f32 %v5564_v34, %v2164_v63  ;;  %v325_v17 = vmul.f32 %v4569_v16, %v324_v43 }
 0x183   :  { %9079 = vst [vmem:[#allocation64_spill] sm:$0xff] %v5810_v60  ;;  %v4573_v10 = vpop.eup %4572  ;;  %v5822_v27 = vadd.f32 1.0, %v4571_v47  ;;  %v334_v63 = vor.u32 1.1754944e-38, %v333_v50 }
 0x184   :  { %9080 = vst [vmem:[#allocation65_spill] sm:$0xff] %v5817_v56  ;;  %4574 = vpow2.f32 %v4223_v52  ;;  %v326_v60 = vadd.f32 %v4569_v16, %v325_v17  ;;  %v338_v46 = vmul.f32 %v4573_v10, %v5787_v54  ;;  %vm343_vm11 = vweird.f32 %v4573_v10  ;;  %v1086_v17 = vld [vmem:[%s8943_s7 + $0x18] sm:$0xff] }
 0x185   :  { %4576 = vrcp.f32 %v5822_v27  ;;  %2954 = vperm.xlu0 %4561, %v2936_v55   ;;  %vm344_vm13 = vmor %vm342_vm12, %vm343_vm11  ;;  %vm357_vm4 = vweird.f32 %v5822_v27 }
 0x186   :  { %1172 = vperm.xlu1 %4562, %v1150_v61   ;;  %v330_v43 = vsel %vm329_vm8, %v4569_v16, %v326_v60  ;;  %v339_v47 = vsub.f32 1.0, %v338_v46  ;;  %v5848_v60 = vpop.permute.xlu2 %2741  ;;  %v346_v46 = vand.u32 2147483647, %v5787_v54  ;;  %vm2560_vm8 = vcmp.lt.s32.totalorder %v5344_v41, 112 }
 0x187   :  { %v278_v56 = vpop.f32.mrf.mxu2  ;;  %v5829_v0 = vpop.permute.xlu0 %2122  ;;  %v5831_v45 = vsel %vm332_vm10, %v334_v63, %v330_v43 }
 0x188   :  { %9081 = vst [vmem:[#allocation66_spill] sm:$0xff] %v5829_v0  ;;  %v279_v52 = vadd.f32 %v278_v56, %v5122_v57  ;;  %v5834_v20 = vpop.permute.xlu1 %2138  ;;  %4228 = vmatmul.msk.f32.vlgmr.msra.gmra.mxu3 %vm458_vm9, %v5831_v45  ;;  %4244 = vmatmul.msk.f32.vlgmr.msrb.gmra.mxu2 %vm458_vm9, %v5831_v45  ;;  %v340_v50 = vmul.f32 %v4573_v10, %v339_v47  ;;  %v348_v57 = vand.u32 2147483648, %v5787_v54  ;;  %v4450_v47 = vld [vmem:[%s8939_s10 + $0x10] sm:$0x3]  ;;  %vm347_vm15 = vcmp.eq.f32.partialorder %v346_v46, 8.507059e+37 }
 0x189   :  { %9082 = vst [vmem:[#allocation67_spill] sm:$0xff] %v5834_v20  ;;  %v2163_v16 = vsel %vm2154_vm5, %v5834_v20, %v5829_v0  ;;  %4252 = vmatmul.msk.f32.vlgmr.msra.gmra.mxu0 %vm458_vm9, %v5831_v45 }
 0x18a   :  { %v4575_v56 = vpop.eup %4574  ;;  %v4224_v36 = vmul.f32 -1.442695, %v279_v52  ;;  %v5851_v55 = vmul.f32 %v5564_v34, %v2163_v16  ;;  %v341_v61 = vadd.f32 %v4573_v10, %v340_v50  ;;  %v5865_v50 = vperm.slane %v4450_v47, 1 }
 0x18b   :  { %v4577_v63 = vpop.eup %4576  ;;  %v5857_v43 = vadd.f32 1.0, %v4575_v56  ;;  %v349_v54 = vor.u32 1.1754944e-38, %v348_v57  ;;  %v361_v57 = vand.u32 2147483647, %v5822_v27 }
 0x18c   :  { %9083 = vst [vmem:[#allocation68_spill] sm:$0xff] %v5851_v55  ;;  %4578 = vpow2.f32 %v4224_v36  ;;  %v345_v52 = vsel %vm344_vm13, %v4573_v10, %v341_v61  ;;  %v353_v34 = vmul.f32 %v4577_v63, %v5822_v27  ;;  %vm358_vm3 = vweird.f32 %v4577_v63 }
 0x18d   :  { %4580 = vrcp.f32 %v5857_v43  ;;  %1108 = vperm.xlu0 %4561, %v1086_v17   ;;  %v5867_v36 = vsel %vm347_vm15, %v349_v54, %v345_v52  ;;  %vm359_vm6 = vmor %vm357_vm4, %vm358_vm3  ;;  %vm362_vm7 = vcmp.eq.f32.partialorder %v361_v57, 8.507059e+37  ;;  %vm372_vm11 = vweird.f32 %v5857_v43 }
 0x18e   :  { %v354_v16 = vsub.f32 1.0, %v353_v34 }
 0x18f   :  { %v281_v56 = vpop.f32.mrf.mxu2  ;;  %v2762_v55 = vpop.permute.xlu0 %2761 }
 0x190   :  { %v282_v0 = vadd.f32 %v281_v56, %v5134_v58  ;;  %v5873_v10 = vsel %vm2763_vm14, %v5770_v30, %v2762_v55  ;;  %v2779_v17 = vsel %vm2763_vm14, %v2762_v55, %v5770_v30  ;;  %v2744_v61 = vpop.permute.xlu1 %2743  ;;  %4229 = vmatmul.msk.f32.gmra.mxu3 %vm458_vm9, %v5867_v36  ;;  %4245 = vmatmul.msk.f32.gmra.mxu2 %vm458_vm9, %v5867_v36  ;;  %v363_v55 = vand.u32 2147483648, %v5822_v27 }
 0x191   :  { %9084 = vst [vmem:[#allocation69_spill] sm:$0xff] %v5873_v10  ;;  %v5884_v58 = vmul.f32 %v5865_v50, %v2779_v17  ;;  %v5889_v46 = vsel %vm2763_vm14, %v2744_v61, %v5796_v51  ;;  %v2778_v30 = vsel %vm2763_vm14, %v5796_v51, %v2744_v61  ;;  %4253 = vmatmul.msk.f32.gmra.mxu0 %vm458_vm9, %v5867_v36 }
 0x192   :  { %9086 = vst [vmem:[#allocation71_spill] sm:$0xff] %v5889_v46  ;;  %v4579_v47 = vpop.eup %4578  ;;  %v4225_v52 = vmul.f32 -1.442695, %v282_v0  ;;  %v5898_v34 = vmul.f32 %v5865_v50, %v2778_v30  ;;  %v355_v54 = vmul.f32 %v4577_v63, %v354_v16  ;;  %v4425_v0 = vld [vmem:[%s8939_s10 + $0xe] sm:$0x3]  ;;  %v364_v16 = vor.u32 1.1754944e-38, %v363_v55 }
 0x193   :  { %9085 = vst [vmem:[#allocation70_spill] sm:$0xff] %v5884_v58  ;;  %v4581_v56 = vpop.eup %4580  ;;  %v5900_v17 = vadd.f32 1.0, %v4579_v47  ;;  %v5902_v58 = vpop.permute.xlu2 %2556  ;;  %v5910_v61 = vperm.slane %v4425_v0, 1  ;;  %v376_v0 = vand.u32 2147483647, %v5857_v43 }
 0x194   :  { %9087 = vst [vmem:[#allocation72_spill] sm:$0xff] %v5898_v34  ;;  %4582 = vpow2.f32 %v4225_v52  ;;  %v356_v46 = vadd.f32 %v4577_v63, %v355_v54  ;;  %v368_v51 = vmul.f32 %v4581_v56, %v5857_v43  ;;  %vm373_vm10 = vweird.f32 %v4581_v56 }
 0x195   :  { %9088 = vst [vmem:[#allocation73_spill] sm:$0xff] %v5902_v58  ;;  %4584 = vrcp.f32 %v5900_v17  ;;  %vm374_vm12 = vmor %vm372_vm11, %vm373_vm10  ;;  %vm377_vm13 = vcmp.eq.f32.partialorder %v376_v0, 8.507059e+37  ;;  %vm387_vm3 = vweird.f32 %v5900_v17 }
 0x196   :  { %v360_v30 = vsel %vm359_vm6, %v4577_v63, %v356_v46  ;;  %v369_v47 = vsub.f32 1.0, %v368_v51 }
 0x197   :  { %v284_v34 = vpop.f32.mrf.mxu2  ;;  %v5912_v52 = vpop.permute.xlu0 %2542  ;;  %v5914_v54 = vsel %vm362_vm7, %v364_v16, %v360_v30  ;;  %v455_v16 = vld [vmem:[%s8940_s2 + $0x68] sm:$0xff] }
 0x198   :  { %9089 = vst [vmem:[#allocation74_spill] sm:$0xff] %v5912_v52  ;;  %v285_v27 = vadd.f32 %v284_v34, %v5176_v3  ;;  %v5918_v10 = vpop.permute.xlu1 %2558  ;;  %4230 = vmatmul.msk.f32.gmra.mxu3 %vm458_vm9, %v5914_v54  ;;  %4246 = vmatmul.msk.f32.gmra.mxu2 %vm458_vm9, %v5914_v54  ;;  %v370_v63 = vmul.f32 %v4581_v56, %v369_v47  ;;  %v378_v3 = vand.u32 2147483648, %v5857_v43 }
 0x199   :  { %9090 = vst [vmem:[#allocation75_spill] sm:$0xff] %v5918_v10  ;;  %v2576_v57 = vsel %vm2560_vm8, %v5918_v10, %v5912_v52  ;;  %4254 = vmatmul.msk.f32.gmra.mxu0 %vm458_vm9, %v5914_v54  ;;  %536 = vmatpush.msrb.mxu3 %v455_v16 }
 0x19a   :  { %v4583_v46 = vpop.eup %4582  ;;  %v4226_v55 = vmul.f32 -1.442695, %v285_v27  ;;  %v5933_v34 = vmul.f32 %v5910_v61, %v2576_v57  ;;  %v371_v51 = vadd.f32 %v4581_v56, %v370_v63  ;;  %v379_v27 = vor.u32 1.1754944e-38, %v378_v3 }
 0x19b   :  { %v4585_v30 = vpop.eup %4584  ;;  %v5939_v47 = vadd.f32 1.0, %v4583_v46  ;;  %v5943_v57 = vpop.permute.xlu2 %2538 }
 0x19c   :  { %9091 = vst [vmem:[#allocation76_spill] sm:$0xff] %v5933_v34  ;;  %4586 = vpow2.f32 %v4226_v55  ;;  %v375_v52 = vsel %vm374_vm12, %v4581_v56, %v371_v51  ;;  %v383_v10 = vmul.f32 %v4585_v30, %v5900_v17  ;;  %vm388_vm15 = vweird.f32 %v4585_v30 }
 0x19d   :  { %4588 = vrcp.f32 %v5939_v47  ;;  %9092 = vst [vmem:[#allocation77_spill] sm:$0xff] %v5943_v57  ;;  %v5945_v20 = vsel %vm377_vm13, %v379_v27, %v375_v52  ;;  %v393_v52 = vand.u32 2147483648, %v5900_v17  ;;  %v451_v27 = vld [vmem:[%s8940_s2 + $0x48] sm:$0xff]  ;;  %vm389_vm4 = vmor %vm387_vm3, %vm388_vm15  ;;  %vm402_vm10 = vweird.f32 %v5939_v47 }
 0x19e   :  { %v384_v43 = vsub.f32 1.0, %v383_v10  ;;  %537 = vmatpush.msrb.mxu3 %v451_v27 }
 0x19f   :  { %v287_v63 = vpop.f32.mrf.mxu2  ;;  %v2758_v34 = vpop.permute.xlu0 %2757 }
 0x1a0   :  { %v288_v46 = vadd.f32 %v287_v63, %v5174_v2  ;;  %v5951_v55 = vsel %vm2763_vm14, %v5848_v60, %v2758_v34  ;;  %v2777_v56 = vsel %vm2763_vm14, %v2758_v34, %v5848_v60  ;;  %v5956_v3 = vpop.permute.xlu1 %2540  ;;  %4231 = vmatmul.msk.f32.gmra.mxu3 %vm458_vm9, %v5945_v20  ;;  %4247 = vmatmul.msk.f32.gmra.mxu2 %vm458_vm9, %v5945_v20  ;;  %v391_v60 = vand.u32 2147483647, %v5900_v17  ;;  %v447_v63 = vld [vmem:[%s8940_s2 + $0x28] sm:$0xff] }
 0x1a1   :  { %9093 = vst [vmem:[#allocation78_spill] sm:$0xff] %v5951_v55  ;;  %v5963_v10 = vmul.f32 %v5865_v50, %v2777_v56  ;;  %v2575_v2 = vsel %vm2560_vm8, %v5902_v58, %v5956_v3  ;;  %4255 = vmatmul.msk.f32.gmra.mxu0 %vm458_vm9, %v5945_v20  ;;  %v385_v16 = vmul.f32 %v4585_v30, %v384_v43  ;;  %v443_v43 = vld [vmem:[%s8940_s2 + $0x8] sm:$0xff] }
 0x1a2   :  { %9094 = vst [vmem:[#allocation79_spill] sm:$0xff] %v5956_v3  ;;  %v4587_v34 = vpop.eup %4586  ;;  %v4227_v51 = vmul.f32 -1.442695, %v288_v46  ;;  %v5974_v0 = vmul.f32 %v5910_v61, %v2575_v2  ;;  %v394_v2 = vor.u32 1.1754944e-38, %v393_v52  ;;  %538 = vmatpush.msrb.mxu3 %v447_v63  ;;  %vm392_vm6 = vcmp.eq.f32.partialorder %v391_v60, 8.507059e+37 }
 0x1a3   :  { %9095 = vst [vmem:[#allocation80_spill] sm:$0xff] %v5963_v10  ;;  %v4589_v56 = vpop.eup %4588  ;;  %v5982_v10 = vadd.f32 1.0, %v4587_v34  ;;  %v386_v55 = vadd.f32 %v4585_v30, %v385_v16  ;;  %v408_v16 = vand.u32 2147483648, %v5939_v47  ;;  %v2754_v17 = vpop.permute.xlu2 %2753 }
 0x1a4   :  { %9096 = vst [vmem:[#allocation81_spill] sm:$0xff] %v5974_v0  ;;  %4590 = vpow2.f32 %v4227_v51  ;;  %v398_v46 = vmul.f32 %v4589_v56, %v5939_v47  ;;  %539 = vmatpush.msrb.mxu3 %v443_v43  ;;  %vm403_vm7 = vweird.f32 %v4589_v56 }
 0x1a5   :  { %4592 = vrcp.f32 %v5982_v10  ;;  %v390_v0 = vsel %vm389_vm4, %v4585_v30, %v386_v55  ;;  %v406_v30 = vand.u32 2147483647, %v5939_v47  ;;  %vm404_vm11 = vmor %vm402_vm10, %vm403_vm7  ;;  %vm417_vm15 = vweird.f32 %v5982_v10 }
 0x1a6   :  { %v399_v34 = vsub.f32 1.0, %v398_v46  ;;  %v5990_v3 = vsel %vm392_vm6, %v394_v2, %v390_v0  ;;  %v409_v2 = vor.u32 1.1754944e-38, %v408_v16  ;;  %v421_v16 = vand.u32 2147483647, %v5982_v10 }
 0x1a7   :  { %v2740_v51 = vpop.permute.xlu0 %2739  ;;  %4256 = vmatmul.msk.f32.vlgmr.msrb.gmra.mxu1 %vm458_vm9, %v5990_v3  ;;  %vm407_vm12 = vcmp.eq.f32.partialorder %v406_v30, 8.507059e+37 }
 0x1a8   :  { %v2756_v27 = vpop.permute.xlu1 %2755  ;;  %4232 = vmatmul.msk.f32.gmra.mxu3 %vm458_vm9, %v5990_v3  ;;  %v400_v58 = vmul.f32 %v4589_v56, %v399_v34  ;;  %4248 = vmatmul.msk.f32.gmra.mxu2 %vm458_vm9, %v5990_v3  ;;  %vm422_vm4 = vcmp.eq.f32.partialorder %v421_v16, 8.507059e+37 }
 0x1a9   :  { %v6000_v55 = vsel %vm2763_vm14, %v2740_v51, %v2756_v27  ;;  %v2776_v60 = vsel %vm2763_vm14, %v2756_v27, %v2740_v51 }
 0x1aa   :  { %9097 = vst [vmem:[#allocation82_spill] sm:$0xff] %v6000_v55  ;;  %v4591_v52 = vpop.eup %4590  ;;  %v6007_v0 = vmul.f32 %v5865_v50, %v2776_v60  ;;  %v401_v63 = vadd.f32 %v4589_v56, %v400_v58  ;;  %v423_v60 = vand.u32 2147483648, %v5982_v10 }
 0x1ab   :  { %v4593_v46 = vpop.eup %4592  ;;  %v321_v43 = vadd.f32 1.0, %v4591_v52 }
 0x1ac   :  { %9098 = vst [vmem:[#allocation83_spill] sm:$0xff] %v6007_v0  ;;  %v405_v34 = vsel %vm404_vm11, %v4589_v56, %v401_v63  ;;  %v413_v55 = vmul.f32 %v4593_v46, %v5982_v10  ;;  %vm418_vm13 = vweird.f32 %v4593_v46  ;;  %v2736_v63 = vpop.permute.xlu2 %2735 }
 0x1ad   :  { %4594 = vrcp.f32 %v321_v43  ;;  %v6011_v51 = vsel %vm407_vm12, %v409_v2, %v405_v34  ;;  %vm419_vm3 = vmor %vm417_vm15, %vm418_vm13  ;;  %vm432_vm7 = vweird.f32 %v321_v43 }
 0x1ae   :  { %v414_v27 = vsub.f32 1.0, %v413_v55 }
 0x1af   :  { %v6013_v19 = vpop.permute.xlu0 %2554  ;;  %4257 = vmatmul.msk.f32.gmra.mxu1 %vm458_vm9, %v6011_v51 }
 0x1b0   :  { %9099 = vst [vmem:[#allocation84_spill] sm:$0xff] %v6013_v19  ;;  %v2574_v58 = vsel %vm2560_vm8, %v6013_v19, %v5943_v57  ;;  %v2738_v47 = vpop.permute.xlu1 %2737  ;;  %4233 = vmatmul.msk.f32.gmra.mxu3 %vm458_vm9, %v6011_v51  ;;  %v415_v56 = vmul.f32 %v4593_v46, %v414_v27  ;;  %4249 = vmatmul.msk.f32.gmra.mxu2 %vm458_vm9, %v6011_v51 }
 0x1b1   :  { %v6026_v30 = vmul.f32 %v5910_v61, %v2574_v58  ;;  %v6030_v55 = vsel %vm2763_vm14, %v2738_v47, %v2754_v17  ;;  %v2775_v52 = vsel %vm2763_vm14, %v2754_v17, %v2738_v47  ;;  %v424_v58 = vor.u32 1.1754944e-38, %v423_v60 }
 0x1b2   :  { %9101 = vst [vmem:[#allocation86_spill] sm:$0xff] %v6030_v55  ;;  %v6037_v2 = vmul.f32 %v5865_v50, %v2775_v52  ;;  %v416_v34 = vadd.f32 %v4593_v46, %v415_v56  ;;  %v438_v47 = vand.u32 2147483648, %v321_v43  ;;  %v436_v60 = vand.u32 2147483647, %v321_v43 }
 0x1b3   :  { %9100 = vst [vmem:[#allocation85_spill] sm:$0xff] %v6026_v30  ;;  %v4595_v27 = vpop.eup %4594 }
 0x1b4   :  { %9102 = vst [vmem:[#allocation87_spill] sm:$0xff] %v6037_v2  ;;  %v420_v0 = vsel %vm419_vm3, %v4593_v46, %v416_v34  ;;  %v428_v30 = vmul.f32 %v4595_v27, %v321_v43  ;;  %vm433_vm6 = vweird.f32 %v4595_v27  ;;  %v439_v16 = vor.u32 1.1754944e-38, %v438_v47 }
 0x1b5   :  { %v6040_v55 = vsel %vm422_vm4, %v424_v58, %v420_v0  ;;  %vm434_vm10 = vmor %vm432_vm7, %vm433_vm6  ;;  %vm437_vm11 = vcmp.eq.f32.partialorder %v436_v60, 8.507059e+37 }
 0x1b6   :  { %v429_v57 = vsub.f32 1.0, %v428_v30  ;;  %v6059_v30 = vpop.permute.xlu2 %2550 }
 0x1b7   :  { %v6042_v17 = vpop.permute.xlu0 %2536  ;;  %4258 = vmatmul.msk.f32.gmra.mxu1 %vm458_vm9, %v6040_v55  ;;  %9106 = vst [vmem:[#allocation91_spill] sm:$0xff] %v6059_v30 }
 0x1b8   :  { %9103 = vst [vmem:[#allocation88_spill] sm:$0xff] %v6042_v17  ;;  %v6046_v52 = vpop.permute.xlu1 %2552  ;;  %4234 = vmatmul.msk.f32.gmra.mxu3 %vm458_vm9, %v6040_v55  ;;  %v430_v10 = vmul.f32 %v4595_v27, %v429_v57  ;;  %4250 = vmatmul.msk.f32.gmra.mxu2 %vm458_vm9, %v6040_v55 }
 0x1b9   :  { %9104 = vst [vmem:[#allocation89_spill] sm:$0xff] %v6046_v52  ;;  %v2573_v0 = vsel %vm2560_vm8, %v6046_v52, %v6042_v17 }
 0x1ba   :  { %v6057_v46 = vmul.f32 %v5910_v61, %v2573_v0  ;;  %v431_v56 = vadd.f32 %v4595_v27, %v430_v10 }
 0x1bc   :  { %9105 = vst [vmem:[#allocation90_spill] sm:$0xff] %v6057_v46  ;;  %v435_v57 = vsel %vm434_vm10, %v4595_v27, %v431_v56 }
 0x1bd   :  { %v6061_v34 = vsel %vm437_vm11, %v439_v16, %v435_v57 }
 0x1bf   :  { %v2752_v58 = vpop.permute.xlu0 %2751  ;;  %4259 = vmatmul.msk.f32.gmra.mxu1 %vm458_vm9, %v6061_v34 }
 0x1c0   :  { %v6067_v2 = vsel %vm2763_vm14, %v2736_v63, %v2752_v58  ;;  %v2774_v10 = vsel %vm2763_vm14, %v2752_v58, %v2736_v63  ;;  %v6071_v43 = vpop.permute.xlu1 %2534  ;;  %4235 = vmatmul.msk.f32.gmra.mxu3 %vm458_vm9, %v6061_v34  ;;  %4251 = vmatmul.msk.f32.gmra.mxu2 %vm458_vm9, %v6061_v34  ;;  %v6087_v63 = vpop.permute.xlu2 %2532 }
 0x1c1   :  { %9107 = vst [vmem:[#allocation92_spill] sm:$0xff] %v6067_v2  ;;  %v6076_v27 = vmul.f32 %v5865_v50, %v2774_v10  ;;  %v2572_v47 = vsel %vm2560_vm8, %v6059_v30, %v6071_v43  ;;  %v1258_v2 = vsel %vm1245_vm2, %v5286_v42, %v5316_v7  ;;  %v6379_v30 = vld [vmem:[%s8939_s10 + $0x6] sm:$0x3] }
 0x1c2   :  { %9108 = vst [vmem:[#allocation93_spill] sm:$0xff] %v6071_v43  ;;  %v6085_v60 = vmul.f32 %v5910_v61, %v2572_v47 }
 0x1c3   :  { %9109 = vst [vmem:[#allocation94_spill] sm:$0xff] %v6076_v27 }
 0x1c4   :  { %9110 = vst [vmem:[#allocation95_spill] sm:$0xff] %v6085_v60 }
 0x1c5   :  { %9111 = vst [vmem:[#allocation96_spill] sm:$0xff] %v6087_v63 }
 0x1c7   :  { %v2734_v0 = vpop.permute.xlu0 %2733 }
 0x1c8   :  { %v2750_v56 = vpop.permute.xlu1 %2749  ;;  %4236 = vmatmul.msk.f32.vlgmr.msrb.gmra.mxu3 %vm458_vm9, %v5831_v45  ;;  %v2748_v47 = vpop.permute.xlu2 %2747 }
 0x1c9   :  { %v6093_v16 = vsel %vm2763_vm14, %v2734_v0, %v2750_v56  ;;  %v2773_v57 = vsel %vm2763_vm14, %v2750_v56, %v2734_v0 }
 0x1ca   :  { %9112 = vst [vmem:[#allocation97_spill] sm:$0xff] %v6093_v16  ;;  %v6098_v58 = vmul.f32 %v5865_v50, %v2773_v57  ;;  %v8979_v57 = vmov 0.00390625  }
 0x1cb   :  { %679 = vmatpush.msra.mxu1 %v8979_v57  ;;  %777 = vmatpush.msra.mxu2 %v8979_v57 }
 0x1cc   :  { %9113 = vst [vmem:[#allocation98_spill] sm:$0xff] %v6098_v58  ;;  %720 = vmatpush.msra.mxu3 %v8979_v57  ;;  %818 = vmatpush.msrb.mxu0 %v8979_v57 }
 0x1cd   :  { %680 = vmatpush.msra.mxu1 %v8979_v57  ;;  %778 = vmatpush.msra.mxu2 %v8979_v57 }
 0x1ce   :  { %721 = vmatpush.msra.mxu3 %v8979_v57  ;;  %819 = vmatpush.msrb.mxu0 %v8979_v57 }
 0x1cf   :  { %v6100_v10 = vpop.permute.xlu0 %2548  ;;  %681 = vmatpush.msra.mxu1 %v8979_v57  ;;  %779 = vmatpush.msra.mxu2 %v8979_v57 }
 0x1d0   :  { %9114 = vst [vmem:[#allocation99_spill] sm:$0xff] %v6100_v10  ;;  %v2571_v27 = vsel %vm2560_vm8, %v6100_v10, %v6087_v63  ;;  %v2732_v60 = vpop.permute.xlu1 %2731  ;;  %4237 = vmatmul.msk.f32.gmra.mxu3 %vm458_vm9, %v5867_v36  ;;  %820 = vmatpush.msrb.mxu0 %v8979_v57 }
 0x1d1   :  { %v6109_v45 = vmul.f32 %v5910_v61, %v2571_v27  ;;  %v6113_v0 = vsel %vm2763_vm14, %v2732_v60, %v2748_v47  ;;  %v2772_v56 = vsel %vm2763_vm14, %v2748_v47, %v2732_v60  ;;  %722 = vmatpush.msra.mxu3 %v8979_v57  ;;  %682 = vmatpush.msra.mxu1 %v8979_v57  ;;  %vm1324_vm14 = vcmp.lt.s32.totalorder %v5344_v41, 16 }
 0x1d2   :  { %9116 = vst [vmem:[#allocation101_spill] sm:$0xff] %v6113_v0  ;;  %v6119_v58 = vmul.f32 %v5865_v50, %v2772_v56  ;;  %780 = vmatpush.msra.mxu2 %v8979_v57  ;;  %821 = vmatpush.msrb.mxu0 %v8979_v57  ;;  %v1336_v16 = vsel %vm1324_vm14, %v5178_v4, %v5210_v11 }
 0x1d3   :  { %9115 = vst [vmem:[#allocation100_spill] sm:$0xff] %v6109_v45  ;;  %683 = vmatpush.msra.mxu1 %v8979_v57  ;;  %723 = vmatpush.msra.mxu3 %v8979_v57  ;;  %v1331_v45 = vsel %vm1324_vm14, %v5186_v5, %v5154_v62 }
 0x1d4   :  { %9117 = vst [vmem:[#allocation102_spill] sm:$0xff] %v6119_v58  ;;  %781 = vmatpush.msra.mxu2 %v8979_v57  ;;  %822 = vmatpush.msrb.mxu0 %v8979_v57 }
 0x1d5   :  { %684 = vmatpush.msra.mxu1 %v8979_v57  ;;  %724 = vmatpush.msra.mxu3 %v8979_v57 }
 0x1d6   :  { %782 = vmatpush.msra.mxu2 %v8979_v57  ;;  %823 = vmatpush.msrb.mxu0 %v8979_v57 }
 0x1d7   :  { %v6131_v50 = vpop.permute.xlu0 %2530  ;;  %685 = vmatpush.msra.mxu1 %v8979_v57  ;;  %725 = vmatpush.msra.mxu3 %v8979_v57 }
 0x1d8   :  { %9118 = vst [vmem:[#allocation103_spill] sm:$0xff] %v6131_v50  ;;  %v6135_v36 = vpop.permute.xlu1 %2546  ;;  %4238 = vmatmul.msk.f32.gmra.mxu3 %vm458_vm9, %v5914_v54  ;;  %783 = vmatpush.msra.mxu2 %v8979_v57  ;;  %v6159_v54 = vpop.permute.xlu2 %2528 }
 0x1d9   :  { %9119 = vst [vmem:[#allocation104_spill] sm:$0xff] %v6135_v36  ;;  %v2570_v27 = vsel %vm2560_vm8, %v6135_v36, %v6131_v50  ;;  %686 = vmatpush.msra.mxu1 %v8979_v57  ;;  %726 = vmatpush.msra.mxu3 %v8979_v57  ;;  %v9135_v36 = vld [vmem:[#allocation3_spill] sm:$0xff] }
 0x1da   :  { %v6147_v60 = vmul.f32 %v5910_v61, %v2570_v27  ;;  %9121 = vst [vmem:[#allocation106_spill] sm:$0xff] %v6159_v54  ;;  %784 = vmatpush.msra.mxu2 %v8979_v57  ;;  %824 = vmatpush.msrb.mxu0 %v8979_v57 }
 0x1db   :  { %687 = vmatpush.msra.mxu1 %v8979_v57  ;;  %727 = vmatpush.msra.mxu3 %v8979_v57 }
 0x1dc   :  { %9120 = vst [vmem:[#allocation105_spill] sm:$0xff] %v6147_v60  ;;  %785 = vmatpush.msra.mxu2 %v8979_v57  ;;  %825 = vmatpush.msrb.mxu0 %v8979_v57 }
 0x1dd   :  { %688 = vmatpush.msra.mxu1 %v8979_v57  ;;  %728 = vmatpush.msra.mxu3 %v8979_v57 }
 0x1de   :  { %786 = vmatpush.msra.mxu2 %v8979_v57  ;;  %826 = vmatpush.msrb.mxu0 %v8979_v57 }
 0x1df   :  { %v6161_v47 = vpop.permute.xlu0 %2544  ;;  %689 = vmatpush.msra.mxu1 %v8979_v57  ;;  %729 = vmatpush.msra.mxu3 %v8979_v57 }
 0x1e0   :  { %9122 = vst [vmem:[#allocation107_spill] sm:$0xff] %v6161_v47  ;;  %v2569_v56 = vsel %vm2560_vm8, %v6161_v47, %v6159_v54  ;;  %4239 = vmatmul.msk.f32.gmra.mxu3 %vm458_vm9, %v5945_v20  ;;  %v4260_v20 = vld [vmem:[%s8939_s10 + $0x2] sm:$0x3]  ;;  %787 = vmatpush.msra.mxu2 %v8979_v57 }
 0x1e1   :  { %v6173_v27 = vmul.f32 %v5910_v61, %v2569_v56  ;;  %v1262_v61 = vld [vmem:[%s8939_s10] sm:$0x3]  ;;  %690 = vmatpush.msra.mxu1 %v8979_v57  ;;  %730 = vmatpush.msra.mxu3 %v8979_v57  ;;  %v6199_v56 = vperm.slane %v4260_v20, 0  ;;  %v6203_v58 = vperm.slane %v4260_v20, 1  ;;  %v1261_v20 = vsel %vm1245_vm2, %v5230_v18, %v5270_v32 }
 0x1e2   :  { %788 = vmatpush.msra.mxu2 %v8979_v57  ;;  %v6209_v60 = vperm.slane %v1262_v61, 0  ;;  %827 = vmatpush.msrb.mxu0 %v8979_v57 }
 0x1e3   :  { %9123 = vst [vmem:[#allocation108_spill] sm:$0xff] %v6173_v27  ;;  %691 = vmatpush.msra.mxu1 %v8979_v57  ;;  %731 = vmatpush.msra.mxu3 %v8979_v57  ;;  %v1340_v27 = vsel %vm1324_vm14, %v5188_v6, %v5142_v59  ;;  %v1361_v50 = vmul.f32 %v6203_v58, %v1331_v45 }
 0x1e4   :  { %789 = vmatpush.msra.mxu2 %v8979_v57  ;;  %828 = vmatpush.msrb.mxu0 %v8979_v57  ;;  %v1362_v0 = vmul.f32 %v6199_v56, %v1340_v27  ;;  %v6238_v27 = vperm.slane %v1262_v61, 1  ;;  %v1330_v45 = vsel %vm1324_vm14, %v5200_v9, %v5198_v8  ;;  %v1272_v19 = vmul.f32 %v6209_v60, %v5382_v31 }
 0x1e5   :  { %692 = vmatpush.msra.mxu1 %v8979_v57  ;;  %732 = vmatpush.msra.mxu3 %v8979_v57  ;;  %v1359_v17 = vmul.f32 %v6203_v58, %v1330_v45  ;;  %v1329_v31 = vsel %vm1324_vm14, %v5166_v1, %v5212_v12 }
 0x1e6   :  { %790 = vmatpush.msra.mxu2 %v8979_v57  ;;  %829 = vmatpush.msrb.mxu0 %v8979_v57 }
 0x1e7   :  { %693 = vmatpush.msra.mxu1 %v8979_v57  ;;  %733 = vmatpush.msra.mxu3 %v8979_v57 }
 0x1e8   :  { %4240 = vmatmul.msk.f32.gmra.mxu3 %vm458_vm9, %v5990_v3  ;;  %v1332_v3 = vsel %vm1324_vm14, %v5142_v59, %v5188_v6  ;;  %v1282_v6 = vmul.f32 %v6209_v60, %v1261_v20  ;;  %791 = vmatpush.msra.mxu2 %v8979_v57 }
 0x1e9   :  { %v1363_v59 = vmul.f32 %v6203_v58, %v1332_v3  ;;  %694 = vmatpush.msra.mxu1 %v8979_v57  ;;  %734 = vmatpush.msra.mxu3 %v8979_v57  ;;  %v1253_v3 = vsel %vm1245_vm2, %v5270_v32, %v5230_v18  ;;  %v6256_v18 = vld [vmem:[%s8937_s0] sm:$0xff] }
 0x1ea   :  { %792 = vmatpush.msra.mxu2 %v8979_v57  ;;  %830 = vmatpush.msrb.mxu0 %v8979_v57  ;;  %9124 = vst [vmem:[#allocation109_spill] sm:$0xff] %v6256_v18 }
 0x1eb   :  { %1405 = vmatpush.msrb.mxu1 %v1362_v0  ;;  %735 = vmatpush.msra.mxu3 %v8979_v57 }
 0x1ec   :  { %1511 = vmatpush.msrb.mxu2 %v1282_v6  ;;  %831 = vmatpush.msrb.mxu0 %v8979_v57 }
 0x1ed   :  { %1446 = vmatpush.msrb.mxu3 %v1363_v59 }
 0x1ee   :  { %832 = vmatpush.msrb.mxu0 %v8979_v57 }
 0x1ef   :  { %1447 = vmatpush.msrb.mxu3 %v1361_v50  ;;  %v6369_v50 = vld [vmem:[%s8937_s0 + $0x40] sm:$0xff] }
 0x1f0   :  { %4241 = vmatmul.msk.f32.gmra.mxu3 %vm458_vm9, %v6011_v51  ;;  %v1283_v51 = vmul.f32 %v6238_v27, %v1253_v3  ;;  %833 = vmatpush.msrb.mxu0 %v8979_v57 }
 0x1f1   :  { %1448 = vmatpush.msrb.mxu3 %v1359_v17  ;;  %v1268_v17 = vmul.f32 %v6209_v60, %v5428_v25 }
 0x1f2   :  { %1552 = vmatpush.msra.mxu0 %v1283_v51 }
 0x1f8   :  { %4242 = vmatmul.msk.f32.gmra.mxu3 %vm458_vm9, %v6040_v55 }
 0x200   :  { %4243 = vmatmul.msk.f32.gmra.mxu3 %vm458_vm9, %v6061_v34  ;;  %v6267_v34 = vld [vmem:[%s8937_s0 + $0x10] sm:$0xff] }
 0x201   :  { %9126 = vst [vmem:[#allocation111_spill] sm:$0xff] %v6267_v34 }
 0x20b   :  { %v500_v0 = vpop.f32.mrf.mxu3  ;;  %v582_v61 = vpop.f32.mrf.mxu2 }
 0x20c   :  { %v647_v32 = vmul.f32 %v6256_v18, %v500_v0 }
 0x20e   :  { %v6259_v20 = vmul.f32 %v647_v32, %v582_v61 }
 0x210   :  { %9125 = vst [vmem:[#allocation110_spill] sm:$0xff] %v6259_v20  ;;  %v761_v55 = vmul.f32 %v6259_v20, %v6259_v20  ;;  %695 = vmatmul.f32.vlgmr.msra.gmra.mxu1 %v6259_v20 }
 0x212   :  { %793 = vmatmul.f32.vlgmr.msra.gmra.mxu2 %v761_v55  ;;  %v6278_v55 = vld [vmem:[%s8937_s0 + $0x20] sm:$0xff] }
 0x213   :  { %v503_v59 = vpop.f32.mrf.mxu3  ;;  %v585_v6 = vpop.f32.mrf.mxu2 }
 0x214   :  { %v649_v3 = vmul.f32 %v6267_v34, %v503_v59 }
 0x216   :  { %v6270_v51 = vmul.f32 %v649_v3, %v585_v6  ;;  %v1339_v6 = vsel %vm1324_vm14, %v5154_v62, %v5186_v5  ;;  %v1338_v3 = vsel %vm1324_vm14, %v5198_v8, %v5200_v9 }
 0x217   :  { %v1360_v46 = vmul.f32 %v6199_v56, %v1339_v6 }
 0x218   :  { %9127 = vst [vmem:[#allocation112_spill] sm:$0xff] %v6270_v51  ;;  %698 = vmatmul.f32.gmra.mxu1 %v6270_v51  ;;  %v763_v0 = vmul.f32 %v6270_v51, %v6270_v51 }
 0x219   :  { %1406 = vmatpush.msrb.mxu1 %v1360_v46  ;;  %v1257_v46 = vsel %vm1245_vm2, %v5355_v15, %v5298_v40 }
 0x21a   :  { %796 = vmatmul.f32.gmra.mxu2 %v763_v0  ;;  %v1274_v63 = vmul.f32 %v6209_v60, %v1257_v46 }
 0x21b   :  { %v506_v61 = vpop.f32.mrf.mxu3  ;;  %v588_v32 = vpop.f32.mrf.mxu2 }
 0x21c   :  { %v651_v57 = vmul.f32 %v6278_v55, %v506_v61 }
 0x21e   :  { %v6281_v20 = vmul.f32 %v651_v57, %v588_v32  ;;  %v1260_v57 = vsel %vm1245_vm2, %v5296_v29, %v5246_v23  ;;  %v1337_v32 = vsel %vm1324_vm14, %v5212_v12, %v5166_v1  ;;  %v1328_v1 = vsel %vm1324_vm14, %v5210_v11, %v5178_v4 }
 0x21f   :  { %v1280_v47 = vmul.f32 %v6209_v60, %v1260_v57  ;;  %v1356_v62 = vmul.f32 %v6199_v56, %v1337_v32  ;;  %v1276_v57 = vmul.f32 %v6209_v60, %v1258_v2  ;;  %v9134_v2 = vld [vmem:[#allocation7_spill] sm:$0xff]  ;;  %v1357_v12 = vmul.f32 %v6203_v58, %v1329_v31 }
 0x220   :  { %9128 = vst [vmem:[#allocation113_spill] sm:$0xff] %v6281_v20  ;;  %701 = vmatmul.f32.gmra.mxu1 %v6281_v20  ;;  %v765_v59 = vmul.f32 %v6281_v20, %v6281_v20  ;;  %v6309_v20 = vld [vmem:[%s8937_s0 + $0x30] sm:$0xff]  ;;  %v1333_v8 = vsel %vm1324_vm14, %v9135_v36, %v9134_v2 }
 0x221   :  { %1512 = vmatpush.msrb.mxu2 %v1280_v47  ;;  %v9130_v47 = vld [vmem:[#allocation6_spill] sm:$0xff]  ;;  %v1348_v18 = vmul.f32 %v6199_v56, %v1333_v8  ;;  %1449 = vmatpush.msrb.mxu3 %v1357_v12 }
 0x222   :  { %799 = vmatmul.f32.gmra.mxu2 %v765_v59  ;;  %v1259_v59 = vsel %vm1245_vm2, %v5306_v33, %v5308_v26 }
 0x223   :  { %v509_v0 = vpop.f32.mrf.mxu3  ;;  %v591_v61 = vpop.f32.mrf.mxu2  ;;  %v1278_v5 = vmul.f32 %v6209_v60, %v1259_v59  ;;  %v9132_v59 = vld [vmem:[#allocation2_spill] sm:$0xff] }
 0x224   :  { %v653_v51 = vmul.f32 %v6309_v20, %v509_v0  ;;  %v1358_v0 = vmul.f32 %v6199_v56, %v1338_v3  ;;  %v1354_v3 = vmul.f32 %v6199_v56, %v1336_v16 }
 0x225   :  { %1513 = vmatpush.msrb.mxu2 %v1278_v5  ;;  %v9137_v5 = vld [vmem:[#allocation9_spill] sm:$0xff] }
 0x226   :  { %v6325_v54 = vmul.f32 %v653_v51, %v591_v61  ;;  %v6338_v51 = vld [vmem:[%s8939_s10 + $0x4] sm:$0x3]  ;;  %1407 = vmatpush.msrb.mxu1 %v1358_v0  ;;  %v9131_v61 = vld [vmem:[#allocation5_spill] sm:$0xff] }
 0x227   :  { %v1335_v32 = vsel %vm1324_vm14, %v9131_v61, %v9130_v47  ;;  %v6363_v9 = vperm.slane %v6338_v51, 0  ;;  %1514 = vmatpush.msrb.mxu2 %v1276_v57  ;;  %v1327_v4 = vsel %vm1324_vm14, %v9130_v47, %v9131_v61 }
 0x228   :  { %9129 = vst [vmem:[#allocation114_spill] sm:$0xff] %v6325_v54  ;;  %704 = vmatmul.f32.gmra.mxu1 %v6325_v54  ;;  %v767_v6 = vmul.f32 %v6325_v54, %v6325_v54  ;;  %v9133_v54 = vld [vmem:[#allocation8_spill] sm:$0xff]  ;;  %v1352_v46 = vmul.f32 %v6199_v56, %v1335_v32  ;;  %v1353_v8 = vmul.f32 %v6203_v58, %v1327_v4 }
 0x229   :  { %v1334_v0 = vsel %vm1324_vm14, %v9133_v54, %v9132_v59  ;;  %1408 = vmatpush.msrb.mxu1 %v1356_v62  ;;  %v9136_v62 = vld [vmem:[#allocation10_spill] sm:$0xff]  ;;  %1515 = vmatpush.msrb.mxu2 %v1274_v63  ;;  %v6406_v63 = vld [vmem:[%s8937_s0 + $0x50] sm:$0xff] }
 0x22a   :  { %802 = vmatmul.f32.gmra.mxu2 %v767_v6  ;;  %v1633_v43 = vsel %vm1617_vm1, %v9137_v5, %v9136_v62  ;;  %v9140_v4 = vld [vmem:[#allocation4_spill] sm:$0xff] }
 0x22b   :  { %v512_v16 = vpop.f32.mrf.mxu3  ;;  %v594_v10 = vpop.f32.mrf.mxu2  ;;  %1409 = vmatpush.msrb.mxu1 %v1354_v3  ;;  %v1655_v34 = vmul.f32 %v6363_v9, %v1633_v43  ;;  %v1840_v3 = vperm.slane %v6379_v30, 0  ;;  %1516 = vmatpush.msrb.mxu2 %v1272_v19 }
 0x22c   :  { %v655_v6 = vmul.f32 %v6369_v50, %v512_v16  ;;  %v1350_v16 = vmul.f32 %v6199_v56, %v1334_v0 }
 0x22d   :  { %1410 = vmatpush.msrb.mxu1 %v1352_v46  ;;  %v1858_v56 = vmul.f32 %v1840_v3, %v5455_v35  ;;  %v1856_v35 = vmul.f32 %v1840_v3, %v5447_v37  ;;  %v1852_v11 = vmul.f32 %v1840_v3, %v5499_v22  ;;  %v1848_v61 = vmul.f32 %v1840_v3, %v5513_v39  ;;  %v9138_v46 = vld [vmem:[#allocation34_spill] sm:$0xff]  ;;  %v6450_v39 = vld [vmem:[%s8937_s0 + $0x70] sm:$0xff] }
 0x22e   :  { %v6383_v52 = vmul.f32 %v655_v6, %v594_v10  ;;  %v1270_v10 = vmul.f32 %v6209_v60, %v5400_v44  ;;  %v1355_v60 = vmul.f32 %v6203_v58, %v1328_v1  ;;  %v1846_v6 = vmul.f32 %v1840_v3, %v5537_v38 }
 0x22f   :  { %1411 = vmatpush.msrb.mxu1 %v1350_v16  ;;  %v1844_v16 = vmul.f32 %v1840_v3, %v9138_v46  ;;  %v1325_v38 = vsel %vm1324_vm14, %v9134_v2, %v9135_v36  ;;  %v1625_v36 = vsel %vm1617_vm1, %v9136_v62, %v9137_v5  ;;  %v4748_v2 = vld [vmem:[%s8939_s10 + $0xa] sm:$0x3]  ;;  %v6486_v62 = vld [vmem:[%s8944_s5 + $0x40] sm:$0xff]  ;;  %v2161_v5 = vsel %vm2154_vm5, %v5521_v14, %v5613_v49 }
 0x230   :  { %707 = vmatmul.f32.gmra.mxu1 %v6383_v52  ;;  %v769_v57 = vmul.f32 %v6383_v52, %v6383_v52  ;;  %1517 = vmatpush.msrb.mxu2 %v1270_v10 }
 0x231   :  { %1412 = vmatpush.msrb.mxu1 %v1348_v18  ;;  %v1854_v18 = vmul.f32 %v1840_v3, %v5473_v28  ;;  %1450 = vmatpush.msrb.mxu3 %v1355_v60  ;;  %v1850_v28 = vmul.f32 %v1840_v3, %v5491_v21  ;;  %v1326_v21 = vsel %vm1324_vm14, %v9132_v59, %v9133_v54  ;;  %v623_v3 = vpop.f32.mrf.mxu0 }
 0x232   :  { %805 = vmatmul.f32.gmra.mxu2 %v769_v57  ;;  %v1351_v54 = vmul.f32 %v6203_v58, %v1326_v21  ;;  %v9143_v21 = vld [vmem:[#allocation43_spill] sm:$0xff] }
 0x233   :  { %v515_v43 = vpop.f32.mrf.mxu3  ;;  %v597_v45 = vpop.f32.mrf.mxu2  ;;  %1698 = vmatpush.msra.mxu1 %v1655_v34  ;;  %1518 = vmatpush.msrb.mxu2 %v1268_v17  ;;  %v6430_v34 = vld [vmem:[%s8937_s0 + $0x60] sm:$0xff] }
 0x234   :  { %v657_v44 = vmul.f32 %v6406_v63, %v515_v43  ;;  %1451 = vmatpush.msrb.mxu3 %v1353_v8  ;;  %v1349_v43 = vmul.f32 %v6203_v58, %v1325_v38  ;;  %v6479_v58 = vld [vmem:[%s8937_s0 + $0x8] sm:$0xff]  ;;  %v6528_v8 = vld [vmem:[%s8937_s0 + $0x18] sm:$0xff] }
 0x235   :  { %1901 = vmatpush.msra.mxu2 %v1858_v56  ;;  %v6465_v56 = vperm.slane %v6338_v51, 1 }
 0x236   :  { %v6414_v25 = vmul.f32 %v657_v44, %v597_v45  ;;  %1452 = vmatpush.msrb.mxu3 %v1351_v54  ;;  %v6474_v44 = vperm.slane %v4748_v2, 0  ;;  %v9144_v54 = vld [vmem:[#allocation14_spill] sm:$0xff]  ;;  %v9147_v2 = vld [vmem:[#allocation59_spill] sm:$0xff] }
 0x237   :  { %1902 = vmatpush.msra.mxu2 %v1856_v35  ;;  %v1656_v1 = vmul.f32 %v6465_v56, %v1625_v36  ;;  %v9146_v36 = vld [vmem:[#allocation60_spill] sm:$0xff] }
 0x238   :  { %710 = vmatmul.f32.gmra.mxu1 %v6414_v25  ;;  %v771_v19 = vmul.f32 %v6414_v25, %v6414_v25  ;;  %1453 = vmatpush.msrb.mxu3 %v1349_v43  ;;  %v2192_v35 = vmul.f32 %v6474_v44, %v5574_v24  ;;  %v2190_v14 = vmul.f32 %v6474_v44, %v2161_v5  ;;  %v9148_v5 = vld [vmem:[#allocation54_spill] sm:$0xff] }
 0x239   :  { %1903 = vmatpush.msra.mxu2 %v1854_v18  ;;  %v626_v49 = vpop.f32.mrf.mxu0  ;;  %v9139_v18 = vld [vmem:[#allocation12_spill] sm:$0xff] }
 0x23a   :  { %808 = vmatmul.f32.gmra.mxu2 %v771_v19  ;;  %v6499_v19 = vld [vmem:[%s8944_s5] sm:$0xff]  ;;  %v1624_v24 = vsel %vm1617_vm1, %v9140_v4, %v9139_v18 }
 0x23b   :  { %v518_v37 = vpop.f32.mrf.mxu3  ;;  %v600_v0 = vpop.f32.mrf.mxu2  ;;  %1904 = vmatpush.msra.mxu2 %v1852_v11  ;;  %v1632_v11 = vsel %vm1617_vm1, %v9139_v18, %v9140_v4  ;;  %v6585_v4 = vld [vmem:[%s8944_s5 + $0x50] sm:$0xff] }
 0x23c   :  { %v659_v32 = vmul.f32 %v6430_v34, %v518_v37  ;;  %v2160_v37 = vsel %vm2154_vm5, %v5639_v53, %v5643_v13  ;;  %v6535_v53 = vld [vmem:[%s8944_s5 + $0x48] sm:$0xff] }
 0x23d   :  { %1905 = vmatpush.msra.mxu2 %v1850_v28  ;;  %v2188_v13 = vmul.f32 %v6474_v44, %v2160_v37  ;;  %v9150_v37 = vld [vmem:[#allocation67_spill] sm:$0xff] }
 0x23e   :  { %v6435_v47 = vmul.f32 %v659_v32, %v600_v0  ;;  %v9141_v0 = vld [vmem:[#allocation49_spill] sm:$0xff] }
 0x23f   :  { %1906 = vmatpush.msra.mxu2 %v1848_v61  ;;  %v2159_v28 = vsel %vm2154_vm5, %v9141_v0, %v5596_v48  ;;  %v9142_v48 = vld [vmem:[#allocation55_spill] sm:$0xff] }
 0x240   :  { %713 = vmatmul.f32.gmra.mxu1 %v6435_v47  ;;  %v773_v22 = vmul.f32 %v6435_v47, %v6435_v47  ;;  %v2158_v46 = vsel %vm2154_vm5, %v9143_v21, %v9142_v48  ;;  %v1252_v48 = vsel %vm1245_vm2, %v5246_v23, %v5296_v29  ;;  %v9152_v21 = vld [vmem:[#allocation16_spill] sm:$0xff]  ;;  %v6624_v23 = vld [vmem:[%s8937_s0 + $0x38] sm:$0xff] }
 0x241   :  { %1907 = vmatpush.msra.mxu2 %v1846_v6  ;;  %v1654_v6 = vmul.f32 %v6465_v56, %v1624_v24 }
 0x242   :  { %811 = vmatmul.f32.gmra.mxu2 %v773_v22  ;;  %v1653_v22 = vmul.f32 %v6363_v9, %v1632_v11 }
 0x243   :  { %v521_v57 = vpop.f32.mrf.mxu3  ;;  %v603_v31 = vpop.f32.mrf.mxu2  ;;  %1908 = vmatpush.msra.mxu2 %v1844_v16 }
 0x244   :  { %v661_v10 = vmul.f32 %v6450_v39, %v521_v57  ;;  %v2186_v57 = vmul.f32 %v6474_v44, %v2159_v28  ;;  %1699 = vmatpush.msra.mxu1 %v1653_v22 }
 0x246   :  { %v6458_v59 = vmul.f32 %v661_v10, %v603_v31  ;;  %v6549_v10 = vld [vmem:[%s8944_s5 + $0x8] sm:$0xff]  ;;  %v2184_v31 = vmul.f32 %v6474_v44, %v2158_v46 }
 0x247   :  { %v9153_v46 = vld [vmem:[#allocation11_spill] sm:$0xff] }
 0x248   :  { %716 = vmatmul.f32.gmra.mxu1 %v6458_v59  ;;  %v775_v17 = vmul.f32 %v6458_v59, %v6458_v59 }
 0x24a   :  { %814 = vmatmul.f32.gmra.mxu2 %v775_v17 }
 0x24b   :  { %v541_v45 = vpop.f32.mrf.mxu3 }
 0x24c   :  { %v648_v51 = vmul.f32 %v6479_v58, %v541_v45  ;;  %v2157_v45 = vsel %vm2154_vm5, %v9147_v2, %v9146_v36  ;;  %v1281_v36 = vmul.f32 %v6238_v27, %v1252_v48  ;;  %v1249_v2 = vsel %vm1245_vm2, %v5298_v40, %v5355_v15  ;;  %v6684_v48 = vld [vmem:[%s8937_s0 + $0x48] sm:$0xff] }
 0x24d   :  { %v2182_v18 = vmul.f32 %v6474_v44, %v2157_v45 }
 0x24e   :  { %v6492_v12 = vmul.f32 %v648_v51, %v623_v3  ;;  %v9145_v3 = vld [vmem:[#allocation15_spill] sm:$0xff]  ;;  %v629_v51 = vpop.f32.mrf.mxu0  ;;  %1553 = vmatpush.msra.mxu0 %v1281_v36 }
 0x24f   :  { %v1623_v17 = vsel %vm1617_vm1, %v9145_v3, %v9144_v54  ;;  %v1631_v43 = vsel %vm1617_vm1, %v9144_v54, %v9145_v3  ;;  %v9154_v54 = vld [vmem:[#allocation13_spill] sm:$0xff] }
 0x250   :  { %736 = vmatmul.f32.vlgmr.msra.gmra.mxu3 %v6492_v12  ;;  %4269 = vmatmul.msk.f32.vlgmr.msrb.gmra.mxu1 %vm224_vm0, %v6486_v62  ;;  %v762_v60 = vmul.f32 %v6492_v12, %v6492_v12  ;;  %v1651_v24 = vmul.f32 %v6363_v9, %v1631_v43  ;;  %v1652_v11 = vmul.f32 %v6465_v56, %v1623_v17  ;;  %v9155_v3 = vld [vmem:[#allocation17_spill] sm:$0xff] }
 0x251   :  { %1739 = vmatpush.msra.mxu3 %v1656_v1  ;;  %v1629_v17 = vsel %vm1617_vm1, %v9155_v3, %v9154_v54  ;;  %v6642_v43 = vld [vmem:[%s8944_s5 + $0x58] sm:$0xff] }
 0x252   :  { %834 = vmatmul.f32.vlgmr.msrb.gmra.mxu0 %v762_v60  ;;  %4285 = vmatmul.msk.f32.vlgmr.msrb.gmra.mxu2 %vm224_vm0, %v6499_v19 }
 0x253   :  { %v544_v32 = vpop.f32.mrf.mxu3  ;;  %2235 = vmatpush.msrb.mxu2 %v2192_v35  ;;  %1740 = vmatpush.msra.mxu3 %v1654_v6  ;;  %v9149_v35 = vld [vmem:[#allocation63_spill] sm:$0xff] }
 0x254   :  { %v650_v61 = vmul.f32 %v6528_v8, %v544_v32  ;;  %v2156_v60 = vsel %vm2154_vm5, %v9149_v35, %v9148_v5  ;;  %v9151_v32 = vld [vmem:[#allocation66_spill] sm:$0xff]  ;;  %1700 = vmatpush.msra.mxu1 %v1651_v24  ;;  %v635_v35 = vpop.f32.mrf.mxu1 }
 0x255   :  { %2236 = vmatpush.msrb.mxu2 %v2190_v14  ;;  %v6578_v14 = vld [vmem:[%s8937_s0 + $0x28] sm:$0xff]  ;;  %v2155_v0 = vsel %vm2154_vm5, %v9151_v32, %v9150_v37  ;;  %1741 = vmatpush.msra.mxu3 %v1652_v11  ;;  %v9158_v37 = vld [vmem:[#allocation21_spill] sm:$0xff] }
 0x256   :  { %v6543_v16 = vmul.f32 %v650_v61, %v626_v49  ;;  %v2180_v61 = vmul.f32 %v6474_v44, %v2156_v60  ;;  %v2178_v6 = vmul.f32 %v6474_v44, %v2155_v0  ;;  %v1251_v44 = vsel %vm1245_vm2, %v5308_v26, %v5306_v33  ;;  %v632_v33 = vpop.f32.mrf.mxu0  ;;  %v6660_v60 = vld [vmem:[%s8944_s5 + $0x18] sm:$0xff]  ;;  %v9159_v0 = vld [vmem:[#allocation22_spill] sm:$0xff] }
 0x257   :  { %2237 = vmatpush.msrb.mxu2 %v2188_v13  ;;  %v6599_v13 = vld [vmem:[%s8944_s5 + $0x10] sm:$0xff]  ;;  %v1250_v26 = vsel %vm1245_vm2, %v5316_v7, %v5286_v42  ;;  %v9156_v42 = vld [vmem:[#allocation19_spill] sm:$0xff]  ;;  %v1643_v32 = vmul.f32 %v6363_v9, %v9158_v37 }
 0x258   :  { %739 = vmatmul.f32.gmra.mxu3 %v6543_v16  ;;  %4270 = vmatmul.msk.f32.gmra.mxu1 %vm224_vm0, %v6535_v53  ;;  %v764_v38 = vmul.f32 %v6543_v16, %v6543_v16  ;;  %v1277_v15 = vmul.f32 %v6238_v27, %v1250_v26  ;;  %v6707_v26 = vld [vmem:[%s8944_s5 + $0x20] sm:$0xff]  ;;  %v6747_v37 = vld [vmem:[%s8944_s5 + $0x28] sm:$0xff] }
 0x259   :  { %2238 = vmatpush.msrb.mxu2 %v2186_v57  ;;  %v1630_v57 = vsel %vm1617_vm1, %v9153_v46, %v9152_v21 }
 0x25a   :  { %837 = vmatmul.f32.gmra.mxu0 %v764_v38  ;;  %4286 = vmatmul.msk.f32.gmra.mxu2 %vm224_vm0, %v6549_v10  ;;  %v1649_v7 = vmul.f32 %v6363_v9, %v1630_v57 }
 0x25b   :  { %v547_v1 = vpop.f32.mrf.mxu3  ;;  %2239 = vmatpush.msrb.mxu2 %v2184_v31  ;;  %v1622_v31 = vsel %vm1617_vm1, %v9152_v21, %v9153_v46  ;;  %v9160_v46 = vld [vmem:[#allocation25_spill] sm:$0xff] }
 0x25c   :  { %v652_v49 = vmul.f32 %v6578_v14, %v547_v1  ;;  %v9157_v1 = vld [vmem:[#allocation18_spill] sm:$0xff]  ;;  %1701 = vmatpush.msra.mxu1 %v1649_v7  ;;  %v1650_v24 = vmul.f32 %v6465_v56, %v1622_v31  ;;  %v1641_v57 = vmul.f32 %v6363_v9, %v9160_v46  ;;  %v1621_v31 = vsel %vm1617_vm1, %v9154_v54, %v9155_v3  ;;  %v638_v3 = vpop.f32.mrf.mxu1 }
 0x25d   :  { %2240 = vmatpush.msrb.mxu2 %v2182_v18  ;;  %v1628_v5 = vsel %vm1617_vm1, %v9157_v1, %v9156_v42  ;;  %v1275_v18 = vmul.f32 %v6238_v27, %v1249_v2 }
 0x25e   :  { %v6593_v28 = vmul.f32 %v652_v49, %v629_v51  ;;  %v1279_v51 = vmul.f32 %v6238_v27, %v1251_v44  ;;  %v1647_v49 = vmul.f32 %v6363_v9, %v1629_v17  ;;  %v1645_v11 = vmul.f32 %v6363_v9, %v1628_v5  ;;  %1742 = vmatpush.msra.mxu3 %v1650_v24  ;;  %v9161_v44 = vld [vmem:[#allocation23_spill] sm:$0xff]  ;;  %v9162_v17 = vld [vmem:[#allocation26_spill] sm:$0xff]  ;;  %v6725_v5 = vld [vmem:[%s8937_s0 + $0x58] sm:$0xff] }
 0x25f   :  { %2241 = vmatpush.msrb.mxu2 %v2180_v61  ;;  %v1273_v61 = vmul.f32 %v6238_v27, %v9159_v0  ;;  %v1269_v9 = vmul.f32 %v6238_v27, %v9162_v17  ;;  %v9166_v24 = vld [vmem:[#allocation31_spill] sm:$0xff] }
 0x260   :  { %742 = vmatmul.f32.gmra.mxu3 %v6593_v28  ;;  %4271 = vmatmul.msk.f32.gmra.mxu1 %vm224_vm0, %v6585_v4  ;;  %v766_v22 = vmul.f32 %v6593_v28, %v6593_v28 }
 0x261   :  { %2242 = vmatpush.msrb.mxu2 %v2178_v6  ;;  %1554 = vmatpush.msra.mxu0 %v1279_v51  ;;  %v6679_v6 = vperm.slane %v6379_v30, 1  ;;  %v1648_v51 = vmul.f32 %v6465_v56, %v1621_v31  ;;  %v9171_v31 = vld [vmem:[#allocation35_spill] sm:$0xff] }
 0x262   :  { %840 = vmatmul.f32.gmra.mxu0 %v766_v22  ;;  %4287 = vmatmul.msk.f32.gmra.mxu2 %vm224_vm0, %v6599_v13 }
 0x263   :  { %v550_v38 = vpop.f32.mrf.mxu3  ;;  %1555 = vmatpush.msra.mxu0 %v1277_v15  ;;  %1702 = vmatpush.msra.mxu1 %v1647_v49  ;;  %v6733_v49 = vld [vmem:[%s8944_s5 + $0x68] sm:$0xff]  ;;  %v1847_v17 = vmul.f32 %v6679_v6, %v9171_v31  ;;  %v6851_v31 = vld [vmem:[%s8944_s5 + $0xc0] sm:$0xff] }
 0x264   :  { %v654_v29 = vmul.f32 %v6624_v23, %v550_v38  ;;  %v1271_v38 = vmul.f32 %v6238_v27, %v9161_v44  ;;  %v9164_v27 = vld [vmem:[#allocation27_spill] sm:$0xff]  ;;  %1743 = vmatpush.msra.mxu3 %v1648_v51  ;;  %v9170_v44 = vld [vmem:[#allocation24_spill] sm:$0xff] }
 0x265   :  { %1556 = vmatpush.msra.mxu0 %v1275_v18  ;;  %1703 = vmatpush.msra.mxu1 %v1645_v11  ;;  %v1857_v2 = vmul.f32 %v6679_v6, %v9164_v27  ;;  %v1620_v18 = vsel %vm1617_vm1, %v9156_v42, %v9157_v1  ;;  %v1853_v11 = vmul.f32 %v6679_v6, %v9166_v24  ;;  %v9168_v1 = vld [vmem:[#allocation20_spill] sm:$0xff]  ;;  %v4756_v27 = vld [vmem:[%s8937_s0 + $0x78] sm:$0xff] }
 0x266   :  { %v6649_v45 = vmul.f32 %v654_v29, %v632_v33  ;;  %v6694_v29 = vld [vmem:[%s8944_s5 + $0x60] sm:$0xff]  ;;  %v9163_v33 = vld [vmem:[#allocation28_spill] sm:$0xff]  ;;  %v1644_v0 = vmul.f32 %v6465_v56, %v9168_v1  ;;  %v9176_v1 = vld [vmem:[#allocation75_spill] sm:$0xff] }
 0x267   :  { %1557 = vmatpush.msra.mxu0 %v1273_v61  ;;  %1704 = vmatpush.msra.mxu1 %v1643_v32  ;;  %v1859_v36 = vmul.f32 %v6679_v6, %v9163_v33  ;;  %v9167_v32 = vld [vmem:[#allocation30_spill] sm:$0xff]  ;;  %v9169_v61 = vld [vmem:[#allocation32_spill] sm:$0xff]  ;;  %v9172_v33 = vld [vmem:[#allocation33_spill] sm:$0xff] }
 0x268   :  { %745 = vmatmul.f32.gmra.mxu3 %v6649_v45  ;;  %4272 = vmatmul.msk.f32.gmra.mxu1 %vm224_vm0, %v6642_v43  ;;  %v768_v40 = vmul.f32 %v6649_v45, %v6649_v45  ;;  %v1851_v42 = vmul.f32 %v6679_v6, %v9167_v32  ;;  %v9175_v32 = vld [vmem:[#allocation36_spill] sm:$0xff] }
 0x269   :  { %1558 = vmatpush.msra.mxu0 %v1271_v38  ;;  %1705 = vmatpush.msra.mxu1 %v1641_v57  ;;  %v1642_v38 = vmul.f32 %v6465_v56, %v9170_v44  ;;  %v9180_v44 = vld [vmem:[#allocation79_spill] sm:$0xff] }
 0x26a   :  { %843 = vmatmul.f32.gmra.mxu0 %v768_v40  ;;  %4288 = vmatmul.msk.f32.gmra.mxu2 %vm224_vm0, %v6660_v60  ;;  %v9165_v40 = vld [vmem:[#allocation29_spill] sm:$0xff] }
 0x26b   :  { %v553_v22 = vpop.f32.mrf.mxu3  ;;  %1559 = vmatpush.msra.mxu0 %v1269_v9  ;;  %2032 = vmatpush.msrb.mxu1 %v6450_v39  ;;  %v1855_v15 = vmul.f32 %v6679_v6, %v9165_v40  ;;  %v6776_v9 = vld [vmem:[%s8944_s5 + $0x70] sm:$0xff]  ;;  %v6810_v40 = vld [vmem:[%s8944_s5 + $0x38] sm:$0xff] }
 0x26c   :  { %v656_v21 = vmul.f32 %v6684_v48, %v553_v22  ;;  %v1849_v22 = vmul.f32 %v6679_v6, %v9169_v61 }
 0x26d   :  { %1942 = vmatpush.msrb.mxu0 %v1859_v36  ;;  %2033 = vmatpush.msrb.mxu1 %v6430_v34  ;;  %v1845_v36 = vmul.f32 %v6679_v6, %v9172_v33  ;;  %v9181_v33 = vld [vmem:[#allocation41_spill] sm:$0xff] }
 0x26e   :  { %v6696_v30 = vmul.f32 %v656_v21, %v635_v35  ;;  %v641_v21 = vpop.f32.mrf.mxu1 }
 0x26f   :  { %1943 = vmatpush.msrb.mxu0 %v1857_v2  ;;  %2034 = vmatpush.msrb.mxu1 %v6406_v63  ;;  %v1646_v63 = vmul.f32 %v6465_v56, %v1620_v18  ;;  %v6786_v56 = vld [vmem:[%s8944_s5 + $0x30] sm:$0xff]  ;;  %v4757_v18 = vld [vmem:[%s8939_s10 + $0xc] sm:$0x3] }
 0x270   :  { %748 = vmatmul.f32.gmra.mxu3 %v6696_v30  ;;  %4273 = vmatmul.msk.f32.gmra.mxu1 %vm224_vm0, %v6694_v29  ;;  %v770_v54 = vmul.f32 %v6696_v30, %v6696_v30  ;;  %v6820_v24 = vperm.slane %v4757_v18, 0  ;;  %v9187_v18 = vld [vmem:[#allocation88_spill] sm:$0xff] }
 0x271   :  { %1944 = vmatpush.msrb.mxu0 %v1855_v15  ;;  %2035 = vmatpush.msrb.mxu1 %v6369_v50  ;;  %v4755_v50 = vld [vmem:[%s8937_s0 + $0x68] sm:$0xff] }
 0x272   :  { %846 = vmatmul.f32.gmra.mxu0 %v770_v54  ;;  %4289 = vmatmul.msk.f32.gmra.mxu2 %vm224_vm0, %v6707_v26  ;;  %v9173_v54 = vld [vmem:[#allocation111_spill] sm:$0xff] }
 0x273   :  { %v556_v7 = vpop.f32.mrf.mxu3  ;;  %1945 = vmatpush.msrb.mxu0 %v1853_v11  ;;  %2036 = vmatpush.msrb.mxu1 %v6309_v20  ;;  %v4758_v11 = vld [vmem:[%s8939_s10 + $0xe] sm:$0x3] }
 0x274   :  { %v658_v35 = vmul.f32 %v6725_v5, %v556_v7  ;;  %1744 = vmatpush.msra.mxu3 %v1646_v63  ;;  %v6803_v7 = vld [vmem:[%s8944_s5 + $0x78] sm:$0xff] }
 0x275   :  { %1946 = vmatpush.msrb.mxu0 %v1851_v42  ;;  %2037 = vmatpush.msrb.mxu1 %v6278_v55  ;;  %v2395_v42 = vmul.f32 %v6820_v24, %v9175_v32  ;;  %v9188_v32 = vld [vmem:[#allocation44_spill] sm:$0xff] }
 0x276   :  { %v6736_v39 = vmul.f32 %v658_v35, %v638_v3  ;;  %1745 = vmatpush.msra.mxu3 %v1644_v0  ;;  %v9174_v3 = vld [vmem:[#allocation109_spill] sm:$0xff]  ;;  %v644_v51 = vpop.f32.mrf.mxu1  ;;  %v9177_v0 = vld [vmem:[#allocation74_spill] sm:$0xff] }
 0x277   :  { %1947 = vmatpush.msrb.mxu0 %v1849_v22  ;;  %2038 = vmatpush.msrb.mxu1 %v9173_v54  ;;  %v2568_v63 = vsel %vm2560_vm8, %v9177_v0, %v9176_v1  ;;  %v6840_v22 = vld [vmem:[%s8944_s5 + $0x80] sm:$0xff]  ;;  %v6891_v1 = vld [vmem:[%s8944_s5 + $0xc8] sm:$0xff] }
 0x278   :  { %751 = vmatmul.f32.gmra.mxu3 %v6736_v39  ;;  %4274 = vmatmul.msk.f32.gmra.mxu1 %vm224_vm0, %v6733_v49  ;;  %v772_v34 = vmul.f32 %v6736_v39, %v6736_v39 }
 0x279   :  { %1746 = vmatpush.msra.mxu3 %v1642_v38  ;;  %1948 = vmatpush.msrb.mxu0 %v1847_v17 }
 0x27a   :  { %849 = vmatmul.f32.gmra.mxu0 %v772_v34  ;;  %4290 = vmatmul.msk.f32.gmra.mxu2 %vm224_vm0, %v6747_v37  ;;  %v6827_v34 = vperm.slane %v4758_v11, 0 }
 0x27b   :  { %v559_v46 = vpop.f32.mrf.mxu3  ;;  %2039 = vmatpush.msrb.mxu1 %v9174_v3  ;;  %1949 = vmatpush.msrb.mxu0 %v1845_v36  ;;  %v2391_v36 = vmul.f32 %v6820_v24, %v9181_v33  ;;  %v9184_v3 = vld [vmem:[#allocation77_spill] sm:$0xff]  ;;  %v9195_v33 = vld [vmem:[#allocation96_spill] sm:$0xff] }
 0x27c   :  { %v660_v57 = vmul.f32 %v4755_v50, %v559_v46  ;;  %v2598_v17 = vmul.f32 %v6827_v34, %v2568_v63  ;;  %v9190_v63 = vld [vmem:[#allocation91_spill] sm:$0xff] }
 0x27e   :  { %v6779_v20 = vmul.f32 %v660_v57, %v641_v21  ;;  %v9178_v21 = vld [vmem:[#allocation38_spill] sm:$0xff]  ;;  %v9179_v57 = vld [vmem:[#allocation73_spill] sm:$0xff] }
 0x27f   :  { %v2393_v46 = vmul.f32 %v6820_v24, %v9178_v21  ;;  %v2567_v38 = vsel %vm2560_vm8, %v9180_v44, %v9179_v57  ;;  %v9191_v21 = vld [vmem:[#allocation93_spill] sm:$0xff]  ;;  %v9193_v44 = vld [vmem:[#allocation52_spill] sm:$0xff] }
 0x280   :  { %754 = vmatmul.f32.gmra.mxu3 %v6779_v20  ;;  %4275 = vmatmul.msk.f32.gmra.mxu1 %vm224_vm0, %v6776_v9  ;;  %v774_v55 = vmul.f32 %v6779_v20, %v6779_v20  ;;  %v2596_v54 = vmul.f32 %v6827_v34, %v2567_v38  ;;  %v2385_v38 = vmul.f32 %v6820_v24, %v9193_v44 }
 0x282   :  { %852 = vmatmul.f32.gmra.mxu0 %v774_v55  ;;  %4291 = vmatmul.msk.f32.gmra.mxu2 %vm224_vm0, %v6786_v56  ;;  %v9182_v55 = vld [vmem:[#allocation45_spill] sm:$0xff] }
 0x283   :  { %v562_v6 = vpop.f32.mrf.mxu3 }
 0x284   :  { %v662_v2 = vmul.f32 %v4756_v27, %v562_v6  ;;  %v2389_v6 = vmul.f32 %v6820_v24, %v9182_v55 }
 0x286   :  { %v6805_v35 = vmul.f32 %v662_v2, %v644_v51 }
 0x288   :  { %757 = vmatmul.f32.gmra.mxu3 %v6805_v35  ;;  %4276 = vmatmul.msk.f32.gmra.mxu1 %vm224_vm0, %v6803_v7  ;;  %v776_v15 = vmul.f32 %v6805_v35, %v6805_v35 }
 0x28a   :  { %855 = vmatmul.f32.gmra.mxu0 %v776_v15  ;;  %4292 = vmatmul.msk.f32.gmra.mxu2 %vm224_vm0, %v6810_v40 }
 0x28d   :  { %v6835_v61 = vpop.f32.mrf.mxu1 }
 0x290   :  { %4277 = vmatmul.msk.f32.vlgmr.msrb.gmra.mxu3 %vm224_vm0, %v6486_v62  ;;  %4310 = vmatmul.msk.f32.vlgmr.msra.gmra.mxu1 %vm224_vm0, %v6840_v22  ;;  %v9183_v62 = vld [vmem:[#allocation84_spill] sm:$0xff] }
 0x291   :  { %2073 = vmatpush.msrb.mxu3 %v4756_v27  ;;  %2438 = vmatpush.msra.mxu1 %v2395_v42  ;;  %v2566_v2 = vsel %vm2560_vm8, %v9184_v3, %v9183_v62  ;;  %v9185_v27 = vld [vmem:[#allocation39_spill] sm:$0xff]  ;;  %v9198_v62 = vld [vmem:[#allocation104_spill] sm:$0xff] }
 0x292   :  { %4293 = vmatmul.msk.f32.vlgmr.msra.gmra.mxu0 %vm224_vm0, %v6499_v19  ;;  %4335 = vmatmul.msk.f32.vlgmr.msra.gmra.mxu2 %vm224_vm0, %v6851_v31  ;;  %v6879_v19 = vld [vmem:[%s8944_s5 + $0x88] sm:$0xff]  ;;  %v2594_v42 = vmul.f32 %v6827_v34, %v2566_v2 }
 0x293   :  { %2074 = vmatpush.msrb.mxu3 %v4755_v50  ;;  %2439 = vmatpush.msra.mxu1 %v2393_v46  ;;  %v9186_v50 = vld [vmem:[#allocation89_spill] sm:$0xff]  ;;  %v2564_v46 = vsel %vm2560_vm8, %v9191_v21, %v9190_v63  ;;  %v9199_v3 = vld [vmem:[#allocation103_spill] sm:$0xff] }
 0x294   :  { %2276 = vmatpush.msra.mxu0 %v9185_v27  ;;  %2641 = vmatpush.msra.mxu2 %v2598_v17  ;;  %v2565_v11 = vsel %vm2560_vm8, %v9187_v18, %v9186_v50  ;;  %v9194_v17 = vld [vmem:[#allocation99_spill] sm:$0xff]  ;;  %v2562_v2 = vsel %vm2560_vm8, %v9199_v3, %v9198_v62  ;;  %v9200_v27 = vld [vmem:[#allocation56_spill] sm:$0xff]  ;;  %v9204_v63 = vld [vmem:[#allocation61_spill] sm:$0xff] }
 0x295   :  { %v6872_v51 = vpop.f32.mrf.mxu1  ;;  %v6874_v15 = vpop.f32.mrf.mxu2  ;;  %2075 = vmatpush.msrb.mxu3 %v6725_v5  ;;  %2440 = vmatpush.msra.mxu1 %v2391_v36  ;;  %v9189_v5 = vld [vmem:[#allocation48_spill] sm:$0xff]  ;;  %v2592_v57 = vmul.f32 %v6827_v34, %v2565_v11  ;;  %v9196_v36 = vld [vmem:[#allocation51_spill] sm:$0xff]  ;;  %v6969_v21 = vld [vmem:[%s8944_s5 + $0x98] sm:$0xff] }
 0x296   :  { %2277 = vmatpush.msra.mxu0 %v9188_v32  ;;  %2642 = vmatpush.msra.mxu2 %v2596_v54  ;;  %v2387_v0 = vmul.f32 %v6820_v24, %v9189_v5  ;;  %v9197_v54 = vld [vmem:[#allocation57_spill] sm:$0xff]  ;;  %v6941_v18 = vld [vmem:[%s8944_s5 + $0xd0] sm:$0xff]  ;;  %v9202_v32 = vld [vmem:[#allocation107_spill] sm:$0xff] }
 0x297   :  { %2076 = vmatpush.msrb.mxu3 %v6684_v48  ;;  %2441 = vmatpush.msra.mxu1 %v2389_v6  ;;  %v9192_v48 = vld [vmem:[#allocation47_spill] sm:$0xff]  ;;  %v2383_v55 = vmul.f32 %v6820_v24, %v9197_v54  ;;  %v9207_v54 = vld [vmem:[#allocation69_spill] sm:$0xff]  ;;  %v7085_v3 = vld [vmem:[%s8944_s5 + $0x100] sm:$0xff] }
 0x298   :  { %4278 = vmatmul.msk.f32.gmra.mxu3 %vm224_vm0, %v6535_v53  ;;  %4311 = vmatmul.msk.f32.gmra.mxu1 %vm224_vm0, %v6879_v19  ;;  %v2590_v53 = vmul.f32 %v6827_v34, %v2564_v46 }
 0x299   :  { %2077 = vmatpush.msrb.mxu3 %v6624_v23  ;;  %2278 = vmatpush.msra.mxu0 %v9192_v48  ;;  %v2563_v23 = vsel %vm2560_vm8, %v9195_v33, %v9194_v17  ;;  %v6992_v48 = vld [vmem:[%s8944_s5 + $0xa0] sm:$0xff]  ;;  %v7036_v17 = vld [vmem:[%s8944_s5 + $0xb0] sm:$0xff] }
 0x29a   :  { %4294 = vmatmul.msk.f32.gmra.mxu0 %vm224_vm0, %v6549_v10  ;;  %4336 = vmatmul.msk.f32.gmra.mxu2 %vm224_vm0, %v6891_v1  ;;  %v2588_v50 = vmul.f32 %v6827_v34, %v2563_v23  ;;  %v7058_v23 = vld [vmem:[%s8944_s5 + $0xb8] sm:$0xff] }
 0x29b   :  { %2078 = vmatpush.msrb.mxu3 %v6578_v14  ;;  %2643 = vmatpush.msra.mxu2 %v2594_v42  ;;  %v6929_v14 = vld [vmem:[%s8944_s5 + $0x90] sm:$0xff]  ;;  %v9203_v42 = vld [vmem:[#allocation106_spill] sm:$0xff] }
 0x29c   :  { %2279 = vmatpush.msra.mxu0 %v9196_v36  ;;  %2442 = vmatpush.msra.mxu1 %v2387_v0  ;;  %v2561_v5 = vsel %vm2560_vm8, %v9203_v42, %v9202_v32  ;;  %v2586_v0 = vmul.f32 %v6827_v34, %v2562_v2  ;;  %v9210_v32 = vld [vmem:[#allocation40_spill] sm:$0xff]  ;;  %v9211_v42 = vmov 0.00390625  }
 0x29d   :  { %v6922_v10 = vpop.f32.mrf.mxu1  ;;  %v6924_v6 = vpop.f32.mrf.mxu2  ;;  %2079 = vmatpush.msrb.mxu3 %v6528_v8  ;;  %2644 = vmatpush.msra.mxu2 %v2592_v57  ;;  %v9201_v8 = vld [vmem:[#allocation62_spill] sm:$0xff]  ;;  %v2584_v41 = vmul.f32 %v6827_v34, %v2561_v5  ;;  %v6975_v34 = vld [vmem:[%s8944_s5 + $0xd8] sm:$0xff] }
 0x29e   :  { %2280 = vmatpush.msra.mxu0 %v9200_v27  ;;  %2443 = vmatpush.msra.mxu1 %v2385_v38  ;;  %v2381_v11 = vmul.f32 %v6820_v24, %v9201_v8  ;;  %v7014_v38 = vld [vmem:[%s8944_s5 + $0xa8] sm:$0xff]  ;;  %v7090_v27 = vld [vmem:[%s8944_s5 + $0x140] sm:$0xff]  ;;  %v9209_v8 = vld [vmem:[#allocation37_spill] sm:$0xff] }
 0x29f   :  { %2080 = vmatpush.msrb.mxu3 %v6479_v58  ;;  %2645 = vmatpush.msra.mxu2 %v2590_v53  ;;  %v9205_v58 = vld [vmem:[#allocation65_spill] sm:$0xff] }
 0x2a0   :  { %4279 = vmatmul.msk.f32.gmra.mxu3 %vm224_vm0, %v6585_v4  ;;  %4312 = vmatmul.msk.f32.gmra.mxu1 %vm224_vm0, %v6929_v14 }
 0x2a1   :  { %2281 = vmatpush.msra.mxu0 %v9204_v63  ;;  %2444 = vmatpush.msra.mxu1 %v2383_v55 }
 0x2a2   :  { %4295 = vmatmul.msk.f32.gmra.mxu0 %vm224_vm0, %v6599_v13  ;;  %4337 = vmatmul.msk.f32.gmra.mxu2 %vm224_vm0, %v6941_v18  ;;  %v9206_v13 = vld [vmem:[#allocation68_spill] sm:$0xff] }
 0x2a3   :  { %2646 = vmatpush.msra.mxu2 %v2588_v50  ;;  %2282 = vmatpush.msra.mxu0 %v9205_v58 }
 0x2a4   :  { %2445 = vmatpush.msra.mxu1 %v2381_v11 }
 0x2a5   :  { %v6962_v4 = vpop.f32.mrf.mxu1  ;;  %v6964_v24 = vpop.f32.mrf.mxu2  ;;  %2647 = vmatpush.msra.mxu2 %v2586_v0  ;;  %2283 = vmatpush.msra.mxu0 %v9206_v13 }
 0x2a7   :  { %2648 = vmatpush.msra.mxu2 %v2584_v41  ;;  %v7110_v41 = vld [vmem:[%s8944_s5 + $0x108] sm:$0xff] }
 0x2a8   :  { %4280 = vmatmul.msk.f32.gmra.mxu3 %vm224_vm0, %v6642_v43  ;;  %4313 = vmatmul.msk.f32.gmra.mxu1 %vm224_vm0, %v6969_v21  ;;  %v6997_v43 = vld [vmem:[%s8944_s5 + $0xe0] sm:$0xff] }
 0x2aa   :  { %4296 = vmatmul.msk.f32.gmra.mxu0 %vm224_vm0, %v6660_v60  ;;  %4338 = vmatmul.msk.f32.gmra.mxu2 %vm224_vm0, %v6975_v34 }
 0x2ad   :  { %v6985_v46 = vpop.f32.mrf.mxu1  ;;  %v6987_v57 = vpop.f32.mrf.mxu2 }
 0x2b0   :  { %4281 = vmatmul.msk.f32.gmra.mxu3 %vm224_vm0, %v6694_v29  ;;  %4314 = vmatmul.msk.f32.gmra.mxu1 %vm224_vm0, %v6992_v48  ;;  %v7019_v29 = vld [vmem:[%s8944_s5 + $0xe8] sm:$0xff] }
 0x2b2   :  { %4297 = vmatmul.msk.f32.gmra.mxu0 %vm224_vm0, %v6707_v26  ;;  %4339 = vmatmul.msk.f32.gmra.mxu2 %vm224_vm0, %v6997_v43 }
 0x2b5   :  { %v7007_v60 = vpop.f32.mrf.mxu1  ;;  %v7009_v44 = vpop.f32.mrf.mxu2 }
 0x2b8   :  { %4282 = vmatmul.msk.f32.gmra.mxu3 %vm224_vm0, %v6733_v49  ;;  %4315 = vmatmul.msk.f32.gmra.mxu1 %vm224_vm0, %v7014_v38  ;;  %v7041_v49 = vld [vmem:[%s8944_s5 + $0xf0] sm:$0xff] }
 0x2ba   :  { %4298 = vmatmul.msk.f32.gmra.mxu0 %vm224_vm0, %v6747_v37  ;;  %4340 = vmatmul.msk.f32.gmra.mxu2 %vm224_vm0, %v7019_v29 }
 0x2bd   :  { %v7029_v26 = vpop.f32.mrf.mxu1  ;;  %v7031_v53 = vpop.f32.mrf.mxu2 }
 0x2c0   :  { %4283 = vmatmul.msk.f32.gmra.mxu3 %vm224_vm0, %v6776_v9  ;;  %4316 = vmatmul.msk.f32.gmra.mxu1 %vm224_vm0, %v7036_v17  ;;  %v7063_v9 = vld [vmem:[%s8944_s5 + $0xf8] sm:$0xff] }
 0x2c2   :  { %4299 = vmatmul.msk.f32.gmra.mxu0 %vm224_vm0, %v6786_v56  ;;  %4341 = vmatmul.msk.f32.gmra.mxu2 %vm224_vm0, %v7041_v49  ;;  %v4759_v56 = vld [vmem:[%s8939_s10 + $0x10] sm:$0x3] }
 0x2c3   :  { %v7072_v36 = vperm.slane %v4759_v56, 0 }
 0x2c5   :  { %v7051_v37 = vpop.f32.mrf.mxu1  ;;  %v7053_v33 = vpop.f32.mrf.mxu2  ;;  %v2801_v55 = vmul.f32 %v7072_v36, %v9207_v54 }
 0x2c8   :  { %4284 = vmatmul.msk.f32.gmra.mxu3 %vm224_vm0, %v6803_v7  ;;  %4317 = vmatmul.msk.f32.gmra.mxu1 %vm224_vm0, %v7058_v23 }
 0x2ca   :  { %4300 = vmatmul.msk.f32.gmra.mxu0 %vm224_vm0, %v6810_v40  ;;  %4342 = vmatmul.msk.f32.gmra.mxu2 %vm224_vm0, %v7063_v9  ;;  %v9208_v40 = vld [vmem:[#allocation71_spill] sm:$0xff] }
 0x2cb   :  { %v2799_v50 = vmul.f32 %v7072_v36, %v9208_v40  ;;  %v9215_v40 = vld [vmem:[#allocation46_spill] sm:$0xff] }
 0x2cd   :  { %v7080_v62 = vpop.f32.mrf.mxu2  ;;  %v1414_v7 = vpop.f32.mrf.mxu1 }
 0x2cf   :  { %v835_v2 = vpop.f32.mrf.mxu0 }
 0x2d0   :  { %4318 = vmatmul.msk.f32.vlgmr.msra.gmra.mxu3 %vm224_vm0, %v6840_v22  ;;  %4359 = vmatmul.msk.f32.vlgmr.msrb.gmra.mxu1 %vm224_vm0, %v7085_v3  ;;  %v9212_v22 = vld [vmem:[#allocation76_spill] sm:$0xff]  ;;  %v836_v58 = vadd.f32 %v835_v2, %v6874_v15  ;;  %v9218_v2 = vld [vmem:[#allocation82_spill] sm:$0xff] }
 0x2d1   :  { %2479 = vmatpush.msra.mxu3 %v9209_v8  ;;  %2844 = vmatpush.msrb.mxu1 %v2801_v55  ;;  %v7121_v55 = vld [vmem:[%s8944_s5 + $0x148] sm:$0xff] }
 0x2d2   :  { %4343 = vmatmul.msk.f32.vlgmr.msrb.gmra.mxu0 %vm224_vm0, %v6851_v31  ;;  %4384 = vmatmul.msk.f32.vlgmr.msrb.gmra.mxu2 %vm224_vm0, %v7090_v27  ;;  %v9213_v31 = vld [vmem:[#allocation42_spill] sm:$0xff] }
 0x2d3   :  { %v737_v11 = vpop.f32.mrf.mxu3  ;;  %2480 = vmatpush.msra.mxu3 %v9210_v32  ;;  %2998 = vmatpush.msrb.mxu2 %v9211_v42 }
 0x2d4   :  { %v738_v5 = vadd.f32 %v737_v11, %v6835_v61  ;;  %2682 = vmatpush.msrb.mxu0 %v9212_v22  ;;  %2845 = vmatpush.msrb.mxu1 %v2799_v50  ;;  %v9214_v61 = vld [vmem:[#allocation81_spill] sm:$0xff]  ;;  %v9216_v50 = vld [vmem:[#allocation78_spill] sm:$0xff]  ;;  %v2795_v11 = vmul.f32 %v7072_v36, %v9218_v2  ;;  %v7161_v2 = vld [vmem:[%s8944_s5 + $0x150] sm:$0xff] }
 0x2d5   :  { %v1417_v0 = vpop.f32.mrf.mxu1  ;;  %v1520_v63 = vpop.f32.mrf.mxu2  ;;  %2481 = vmatpush.msra.mxu3 %v9213_v31  ;;  %2999 = vmatpush.msrb.mxu2 %v9211_v42  ;;  %v2797_v8 = vmul.f32 %v7072_v36, %v9216_v50  ;;  %v9219_v22 = vld [vmem:[#allocation53_spill] sm:$0xff] }
 0x2d6   :  { %v859_v13 = vmul.f32 %v738_v5, %v738_v5  ;;  %v7115_v56 = vadd.f32 %v1520_v63, %v1414_v7  ;;  %885 = vperm.xlu1 %4562, %v738_v5   ;;  %2683 = vmatpush.msrb.mxu0 %v9214_v61  ;;  %v9217_v7 = vld [vmem:[#allocation50_spill] sm:$0xff]  ;;  %v9220_v31 = vld [vmem:[#allocation85_spill] sm:$0xff] }
 0x2d7   :  { %v838_v54 = vpop.f32.mrf.mxu0  ;;  %2482 = vmatpush.msra.mxu3 %v9215_v40  ;;  %3000 = vmatpush.msrb.mxu2 %v9211_v42  ;;  %v9221_v61 = vld [vmem:[#allocation58_spill] sm:$0xff] }
 0x2d8   :  { %v867_v15 = vsub.f32 %v836_v58, %v859_v13  ;;  %4319 = vmatmul.msk.f32.gmra.mxu3 %vm224_vm0, %v6879_v19  ;;  %4360 = vmatmul.msk.f32.gmra.mxu1 %vm224_vm0, %v7110_v41  ;;  %v839_v40 = vadd.f32 %v838_v54, %v6924_v6  ;;  %v9224_v6 = vld [vmem:[#allocation92_spill] sm:$0xff]  ;;  %v9225_v54 = vld [vmem:[#allocation90_spill] sm:$0xff] }
 0x2d9   :  { %2483 = vmatpush.msra.mxu3 %v9217_v7  ;;  %3001 = vmatpush.msrb.mxu2 %v9211_v42 }
 0x2da   :  { %v875_v32 = vmax.f32 %v867_v15, 0.0  ;;  %4344 = vmatmul.msk.f32.gmra.mxu0 %vm224_vm0, %v6891_v1  ;;  %4385 = vmatmul.msk.f32.gmra.mxu2 %vm224_vm0, %v7121_v55  ;;  %v7148_v1 = vld [vmem:[%s8944_s5 + $0x110] sm:$0xff] }
 0x2db   :  { %v740_v5 = vpop.f32.mrf.mxu3  ;;  %2484 = vmatpush.msra.mxu3 %v9219_v22  ;;  %3002 = vmatpush.msrb.mxu2 %v9211_v42  ;;  %v9226_v22 = vld [vmem:[#allocation97_spill] sm:$0xff] }
 0x2dc   :  { %v7141_v19 = vadd.f32 1e-05, %v875_v32  ;;  %v741_v63 = vadd.f32 %v740_v5, %v6872_v51  ;;  %2846 = vmatpush.msrb.mxu1 %v2797_v8  ;;  %2684 = vmatpush.msrb.mxu0 %v9220_v31  ;;  %v9222_v8 = vld [vmem:[#allocation86_spill] sm:$0xff]  ;;  %v9223_v32 = vld [vmem:[#allocation64_spill] sm:$0xff] }
 0x2dd   :  { %v1420_v58 = vpop.f32.mrf.mxu1  ;;  %v1523_v13 = vpop.f32.mrf.mxu2  ;;  %2485 = vmatpush.msra.mxu3 %v9221_v61  ;;  %3003 = vmatpush.msrb.mxu2 %v9211_v42  ;;  %v2793_v15 = vmul.f32 %v7072_v36, %v9222_v8 }
 0x2de   :  { %4596 = vrsqrt.f32 %v7141_v19  ;;  %v860_v50 = vmul.f32 %v741_v63, %v741_v63  ;;  %v7154_v51 = vadd.f32 %v1523_v13, %v1417_v0  ;;  %890 = vperm.xlu0 %4561, %v741_v63   ;;  %2847 = vmatpush.msrb.mxu1 %v2795_v11  ;;  %v2791_v0 = vmul.f32 %v7072_v36, %v9224_v6  ;;  %v9228_v6 = vld [vmem:[#allocation100_spill] sm:$0xff] }
 0x2df   :  { %v841_v7 = vpop.f32.mrf.mxu0  ;;  %2486 = vmatpush.msra.mxu3 %v9223_v32  ;;  %3004 = vmatpush.msrb.mxu2 %v9211_v42  ;;  %v7188_v32 = vld [vmem:[%s8944_s5 + $0x118] sm:$0xff]  ;;  %vm953_vm2 = vweird.f32 %v7141_v19 }
 0x2e0   :  { %v868_v5 = vsub.f32 %v839_v40, %v860_v50  ;;  %4320 = vmatmul.msk.f32.gmra.mxu3 %vm224_vm0, %v6929_v14  ;;  %4361 = vmatmul.msk.f32.gmra.mxu1 %vm224_vm0, %v7148_v1  ;;  %v2789_v14 = vmul.f32 %v7072_v36, %v9226_v22  ;;  %v9227_v40 = vld [vmem:[#allocation95_spill] sm:$0xff] }
 0x2e1   :  { %3005 = vmatpush.msrb.mxu2 %v9211_v42  ;;  %2685 = vmatpush.msrb.mxu0 %v9225_v54  ;;  %v9229_v54 = vld [vmem:[#allocation101_spill] sm:$0xff] }
 0x2e2   :  { %v876_v11 = vmax.f32 %v868_v5, 0.0  ;;  %4345 = vmatmul.msk.f32.gmra.mxu0 %vm224_vm0, %v6941_v18  ;;  %4386 = vmatmul.msk.f32.gmra.mxu2 %vm224_vm0, %v7161_v2 }
 0x2e3   :  { %v743_v63 = vpop.f32.mrf.mxu3  ;;  %3006 = vmatpush.msrb.mxu2 %v9211_v42  ;;  %2848 = vmatpush.msrb.mxu1 %v2793_v15  ;;  %v842_v15 = vadd.f32 %v841_v7, %v6964_v24 }
 0x2e4   :  { %v4597_v31 = vpop.eup %4596  ;;  %v7180_v13 = vadd.f32 1e-05, %v876_v11  ;;  %v744_v61 = vadd.f32 %v743_v63, %v6922_v10  ;;  %2686 = vmatpush.msrb.mxu0 %v9227_v40  ;;  %v2787_v11 = vmul.f32 %v7072_v36, %v9229_v54  ;;  %v7201_v63 = vld [vmem:[%s8944_s5 + $0x158] sm:$0xff] }
 0x2e5   :  { %v948_v50 = vmul.f32 %v4597_v31, %v7141_v19  ;;  %v1423_v18 = vpop.f32.mrf.mxu1  ;;  %v1526_v8 = vpop.f32.mrf.mxu2  ;;  %3007 = vmatpush.msrb.mxu2 %v9211_v42  ;;  %2849 = vmatpush.msrb.mxu1 %v2791_v0  ;;  %v9230_v36 = vld [vmem:[#allocation105_spill] sm:$0xff]  ;;  %vm954_vm1 = vweird.f32 %v4597_v31 }
 0x2e6   :  { %4598 = vrsqrt.f32 %v7180_v13  ;;  %v861_v5 = vmul.f32 %v744_v61, %v744_v61  ;;  %v7193_v10 = vadd.f32 %v1526_v8, %v1420_v58  ;;  %895 = vperm.xlu2 %4563, %v744_v61   ;;  %2687 = vmatpush.msrb.mxu0 %v9228_v6  ;;  %v9231_v8 = vld [vmem:[#allocation108_spill] sm:$0xff]  ;;  %v7223_v6 = vld [vmem:[%s8944_s5 + $0x120] sm:$0xff]  ;;  %vm955_vm5 = vmor %vm953_vm2, %vm954_vm1  ;;  %vm963_vm8 = vweird.f32 %v7180_v13 }
 0x2e7   :  { %v844_v22 = vpop.f32.mrf.mxu0  ;;  %v949_v0 = vmul.f32 %v4597_v31, %v948_v50  ;;  %3008 = vmatpush.msrb.mxu2 %v9211_v42  ;;  %2850 = vmatpush.msrb.mxu1 %v2789_v14 }
 0x2e8   :  { %v869_v24 = vsub.f32 %v842_v15, %v861_v5  ;;  %4321 = vmatmul.msk.f32.gmra.mxu3 %vm224_vm0, %v6969_v21  ;;  %4362 = vmatmul.msk.f32.gmra.mxu1 %vm224_vm0, %v7188_v32 }
 0x2e9   :  { %v950_v58 = vmul.f32 0.5, %v949_v0  ;;  %3009 = vmatpush.msrb.mxu2 %v9211_v42  ;;  %2688 = vmatpush.msrb.mxu0 %v9230_v36  ;;  %v7235_v36 = vld [vmem:[%s8944_s5 + $0x160] sm:$0xff] }
 0x2ea   :  { %v877_v7 = vmax.f32 %v869_v24, 0.0  ;;  %4346 = vmatmul.msk.f32.gmra.mxu0 %vm224_vm0, %v6975_v34  ;;  %4387 = vmatmul.msk.f32.gmra.mxu2 %vm224_vm0, %v7201_v63 }
 0x2eb   :  { %v746_v14 = vpop.f32.mrf.mxu3  ;;  %v951_v61 = vsub.f32 1.5, %v950_v58  ;;  %3010 = vmatpush.msrb.mxu2 %v9211_v42  ;;  %2851 = vmatpush.msrb.mxu1 %v2787_v11 }
 0x2ec   :  { %v4599_v21 = vpop.eup %4598  ;;  %v7215_v40 = vadd.f32 1e-05, %v877_v7  ;;  %v747_v50 = vadd.f32 %v746_v14, %v6962_v4  ;;  %2689 = vmatpush.msrb.mxu0 %v9231_v8  ;;  %v845_v4 = vadd.f32 %v844_v22, %v6987_v57 }
 0x2ed   :  { %v958_v15 = vmul.f32 %v4599_v21, %v7180_v13  ;;  %v1426_v5 = vpop.f32.mrf.mxu1  ;;  %v1529_v34 = vpop.f32.mrf.mxu2  ;;  %v952_v54 = vmul.f32 %v4597_v31, %v951_v61  ;;  %3011 = vmatpush.msrb.mxu2 %v9211_v42  ;;  %vm964_vm9 = vweird.f32 %v4599_v21  ;;  %v7268_v13 = vld [vmem:[%s8944_s5 + $0x168] sm:$0xff] }
 0x2ee   :  { %4600 = vrsqrt.f32 %v7215_v40  ;;  %v862_v11 = vmul.f32 %v747_v50, %v747_v50  ;;  %v7229_v0 = vadd.f32 %v1529_v34, %v1423_v18  ;;  %900 = vperm.xlu1 %4562, %v747_v50   ;;  %v7254_v34 = vld [vmem:[%s8944_s5 + $0x128] sm:$0xff]  ;;  %vm965_vm12 = vmor %vm963_vm8, %vm964_vm9  ;;  %vm973_vm15 = vweird.f32 %v7215_v40 }
 0x2ef   :  { %v847_v24 = vpop.f32.mrf.mxu0  ;;  %v956_v58 = vsel %vm955_vm5, %v4597_v31, %v952_v54  ;;  %v959_v19 = vmul.f32 %v4599_v21, %v958_v15  ;;  %3012 = vmatpush.msrb.mxu2 %v9211_v42 }
 0x2f0   :  { %9232 = vst [vmem:[#allocation6_spill] sm:$0xff] %v7229_v0  ;;  %v870_v7 = vsub.f32 %v845_v4, %v862_v11  ;;  %4363 = vmatmul.msk.f32.gmra.mxu1 %vm224_vm0, %v7223_v6  ;;  %1029 = vperm.xlu2 %4563, %v956_v58   ;;  %v848_v54 = vadd.f32 %v847_v24, %v7009_v44 }
 0x2f1   :  { %4322 = vmatmul.msk.f32.gmra.mxu3 %vm224_vm0, %v6992_v48  ;;  %v960_v57 = vmul.f32 0.5, %v959_v19  ;;  %3013 = vmatpush.msrb.mxu2 %v9211_v42 }
 0x2f2   :  { %v878_v31 = vmax.f32 %v870_v7, 0.0  ;;  %4347 = vmatmul.msk.f32.gmra.mxu0 %vm224_vm0, %v6997_v43  ;;  %4388 = vmatmul.msk.f32.gmra.mxu2 %vm224_vm0, %v7235_v36 }
 0x2f3   :  { %v749_v18 = vpop.f32.mrf.mxu3  ;;  %v961_v22 = vsub.f32 1.5, %v960_v57 }
 0x2f4   :  { %v4601_v14 = vpop.eup %4600  ;;  %v7247_v61 = vadd.f32 1e-05, %v878_v31  ;;  %v750_v50 = vadd.f32 %v749_v18, %v6985_v46  ;;  %v2937_v46 = vld [vmem:[%s8941_s6 + $0x18] sm:$0xff] }
 0x2f5   :  { %v968_v48 = vmul.f32 %v4601_v14, %v7215_v40  ;;  %v1429_v8 = vpop.f32.mrf.mxu1  ;;  %v1532_v15 = vpop.f32.mrf.mxu2  ;;  %v962_v43 = vmul.f32 %v4599_v21, %v961_v22  ;;  %vm974_vm13 = vweird.f32 %v4601_v14 }
 0x2f6   :  { %4602 = vrsqrt.f32 %v7247_v61  ;;  %v863_v4 = vmul.f32 %v750_v50, %v750_v50  ;;  %v7259_v11 = vadd.f32 %v1532_v15, %v1426_v5  ;;  %905 = vperm.xlu0 %4561, %v750_v50   ;;  %vm975_vm3 = vmor %vm973_vm15, %vm974_vm13  ;;  %vm983_vm6 = vweird.f32 %v7247_v61 }
 0x2f7   :  { %v850_v58 = vpop.f32.mrf.mxu0  ;;  %v966_v19 = vsel %vm965_vm12, %v4599_v21, %v962_v43  ;;  %v969_v7 = vmul.f32 %v4601_v14, %v968_v48 }
 0x2f8   :  { %9233 = vst [vmem:[#allocation5_spill] sm:$0xff] %v7259_v11  ;;  %v871_v57 = vsub.f32 %v848_v54, %v863_v4  ;;  %4364 = vmatmul.msk.f32.gmra.mxu1 %vm224_vm0, %v7254_v34  ;;  %1034 = vperm.xlu1 %4562, %v966_v19   ;;  %v851_v43 = vadd.f32 %v850_v58, %v7031_v53  ;;  %v2938_v4 = vld [vmem:[%s8941_s6 + $0x20] sm:$0xff]  ;;  %v7307_v53 = vld [vmem:[%s8944_s5 + $0x170] sm:$0xff] }
 0x2f9   :  { %2959 = vperm.xlu2 %4563, %v2937_v46   ;;  %4323 = vmatmul.msk.f32.gmra.mxu3 %vm224_vm0, %v7014_v38  ;;  %v970_v44 = vmul.f32 0.5, %v969_v7  ;;  %v1087_v46 = vld [vmem:[%s8943_s7 + $0x20] sm:$0xff] }
 0x2fa   :  { %v879_v5 = vmax.f32 %v871_v57, 0.0  ;;  %4348 = vmatmul.msk.f32.gmra.mxu0 %vm224_vm0, %v7019_v29  ;;  %4389 = vmatmul.msk.f32.gmra.mxu2 %vm224_vm0, %v7268_v13  ;;  %v7287_v29 = vld [vmem:[%s8944_s5 + $0x130] sm:$0xff] }
 0x2fb   :  { %v752_v21 = vpop.f32.mrf.mxu3  ;;  %v971_v24 = vsub.f32 1.5, %v970_v44 }
 0x2fc   :  { %v4603_v31 = vpop.eup %4602  ;;  %v7278_v18 = vadd.f32 1e-05, %v879_v5  ;;  %v7281_v22 = vadd.f32 %v752_v21, %v7007_v60 }
 0x2fd   :  { %v978_v50 = vmul.f32 %v4603_v31, %v7247_v61  ;;  %v1432_v38 = vpop.f32.mrf.mxu1  ;;  %v1535_v48 = vpop.f32.mrf.mxu2  ;;  %v972_v15 = vmul.f32 %v4601_v14, %v971_v24  ;;  %vm984_vm4 = vweird.f32 %v4603_v31 }
 0x2fe   :  { %4604 = vrsqrt.f32 %v7278_v18  ;;  %v864_v60 = vmul.f32 %v7281_v22, %v7281_v22  ;;  %v7294_v54 = vadd.f32 %v1535_v48, %v1429_v8  ;;  %vm985_vm7 = vmor %vm983_vm6, %vm984_vm4  ;;  %vm993_vm11 = vweird.f32 %v7278_v18 }
 0x2ff   :  { %v853_v19 = vpop.f32.mrf.mxu0  ;;  %v976_v40 = vsel %vm975_vm3, %v4601_v14, %v972_v15  ;;  %v979_v7 = vmul.f32 %v4603_v31, %v978_v50 }
 0x300   :  { %9234 = vst [vmem:[#allocation2_spill] sm:$0xff] %v7294_v54  ;;  %v872_v57 = vsub.f32 %v851_v43, %v864_v60  ;;  %4365 = vmatmul.msk.f32.gmra.mxu1 %vm224_vm0, %v7287_v29  ;;  %1039 = vperm.xlu0 %4561, %v976_v40   ;;  %v7628_v54 = vld [vmem:[%s8944_s5 + $0x1b8] sm:$0xff] }
 0x301   :  { %2964 = vperm.xlu1 %4562, %v2938_v4   ;;  %1113 = vperm.xlu2 %4563, %v1087_v46   ;;  %v980_v8 = vmul.f32 0.5, %v979_v7  ;;  %v1088_v46 = vld [vmem:[%s8943_s7 + $0x28] sm:$0xff] }
 0x302   :  { %v880_v58 = vmax.f32 %v872_v57, 0.0  ;;  %4324 = vmatmul.msk.f32.gmra.mxu3 %vm224_vm0, %v7036_v17  ;;  %4349 = vmatmul.msk.f32.gmra.mxu0 %vm224_vm0, %v7041_v49  ;;  %v7324_v17 = vld [vmem:[%s8944_s5 + $0x138] sm:$0xff]  ;;  %v1151_v49 = vld [vmem:[%s8942_s8 + $0x20] sm:$0xff] }
 0x303   :  { %4390 = vmatmul.msk.f32.gmra.mxu2 %vm224_vm0, %v7307_v53  ;;  %v755_v14 = vpop.f32.mrf.mxu3  ;;  %v981_v44 = vsub.f32 1.5, %v980_v8 }
 0x304   :  { %v4605_v5 = vpop.eup %4604  ;;  %v7315_v21 = vadd.f32 1e-05, %v880_v58  ;;  %v7318_v24 = vadd.f32 %v755_v14, %v7029_v26  ;;  %v854_v26 = vadd.f32 %v853_v19, %v7053_v33  ;;  %v7345_v33 = vld [vmem:[%s8944_s5 + $0x178] sm:$0xff] }
 0x305   :  { %v988_v50 = vmul.f32 %v4605_v5, %v7278_v18  ;;  %v1435_v48 = vpop.f32.mrf.mxu1  ;;  %v1538_v15 = vpop.f32.mrf.mxu2  ;;  %v982_v43 = vmul.f32 %v4603_v31, %v981_v44  ;;  %vm994_vm10 = vweird.f32 %v4605_v5  ;;  %v7380_v18 = vld [vmem:[%s8944_s5 + $0x1c0] sm:$0xff] }
 0x306   :  { %4606 = vrsqrt.f32 %v7315_v21  ;;  %v865_v60 = vmul.f32 %v7318_v24, %v7318_v24  ;;  %v7334_v4 = vadd.f32 %v1538_v15, %v1432_v38  ;;  %vm995_vm14 = vmor %vm993_vm11, %vm994_vm10  ;;  %vm1003_vm2 = vweird.f32 %v7315_v21 }
 0x307   :  { %v856_v40 = vpop.f32.mrf.mxu0  ;;  %v986_v7 = vsel %vm985_vm7, %v4603_v31, %v982_v43  ;;  %v989_v57 = vmul.f32 %v4605_v5, %v988_v50 }
 0x308   :  { %9235 = vst [vmem:[#allocation8_spill] sm:$0xff] %v7334_v4  ;;  %v873_v8 = vsub.f32 %v854_v26, %v865_v60  ;;  %4366 = vmatmul.msk.f32.gmra.mxu1 %vm224_vm0, %v7324_v17  ;;  %1177 = vperm.xlu0 %4561, %v1151_v49  }
 0x309   :  { %1118 = vperm.xlu1 %4562, %v1088_v46   ;;  %1044 = vperm.xlu2 %4563, %v986_v7   ;;  %v990_v61 = vmul.f32 0.5, %v989_v57 }
 0x30a   :  { %v881_v38 = vmax.f32 %v873_v8, 0.0  ;;  %4325 = vmatmul.msk.f32.gmra.mxu3 %vm224_vm0, %v7058_v23  ;;  %4350 = vmatmul.msk.f32.gmra.mxu0 %vm224_vm0, %v7063_v9  ;;  %v7362_v23 = vld [vmem:[%s8944_s5 + $0x180] sm:$0xff]  ;;  %v2939_v9 = vld [vmem:[%s8941_s6 + $0x28] sm:$0xff] }
 0x30b   :  { %4391 = vmatmul.msk.f32.gmra.mxu2 %vm224_vm0, %v7345_v33  ;;  %v758_v31 = vpop.f32.mrf.mxu3  ;;  %v991_v19 = vsub.f32 1.5, %v990_v61 }
 0x30c   :  { %v4607_v58 = vpop.eup %4606  ;;  %v7353_v14 = vadd.f32 1e-05, %v881_v38  ;;  %v7356_v44 = vadd.f32 %v758_v31, %v7051_v37  ;;  %v857_v37 = vadd.f32 %v856_v40, %v7080_v62  ;;  %v9237_v38 = vld [vmem:[#allocation70_spill] sm:$0xff] }
 0x30d   :  { %v998_v50 = vmul.f32 %v4607_v58, %v7315_v21  ;;  %v1541_v15 = vpop.f32.mrf.mxu2  ;;  %v1707_v49 = vpop.f32.mrf.mxu1  ;;  %v992_v43 = vmul.f32 %v4605_v5, %v991_v19  ;;  %vm1004_vm1 = vweird.f32 %v4607_v58  ;;  %v9239_v21 = vld [vmem:[#allocation80_spill] sm:$0xff] }
 0x30e   :  { %4608 = vrsqrt.f32 %v7353_v14  ;;  %v866_v26 = vmul.f32 %v7356_v44, %v7356_v44  ;;  %v7372_v60 = vadd.f32 %v1541_v15, %v1435_v48  ;;  %v1772_v40 = vadd.f32 %v1707_v49, %v7115_v56  ;;  %v9238_v49 = vld [vmem:[#allocation72_spill] sm:$0xff]  ;;  %vm1005_vm5 = vmor %vm1003_vm2, %vm1004_vm1 }
 0x30f   :  { %v1561_v46 = vpop.f32.mrf.mxu0  ;;  %v996_v7 = vsel %vm995_vm14, %v4605_v5, %v992_v43  ;;  %v999_v57 = vmul.f32 %v4607_v58, %v998_v50  ;;  %v7403_v50 = vld [vmem:[%s8944_s5 + $0x188] sm:$0xff]  ;;  %vm1013_vm8 = vweird.f32 %v7353_v14 }
 0x310   :  { %9236 = vst [vmem:[#allocation7_spill] sm:$0xff] %v7372_v60  ;;  %v874_v8 = vsub.f32 %v857_v37, %v866_v26  ;;  %4409 = vmatmul.msk.f32.vlgmr.msra.gmra.mxu1 %vm224_vm0, %v7362_v23  ;;  %2969 = vperm.xlu0 %4561, %v2939_v9   ;;  %v1152_v43 = vld [vmem:[%s8942_s8 + $0x28] sm:$0xff] }
 0x311   :  { %1049 = vperm.xlu1 %4562, %v996_v7   ;;  %910 = vperm.xlu2 %4563, %v7281_v22   ;;  %v1000_v62 = vmul.f32 0.5, %v999_v57  ;;  %v7422_v7 = vld [vmem:[%s8944_s5 + $0x1c8] sm:$0xff] }
 0x312   :  { %v882_v48 = vmax.f32 %v874_v8, 0.0  ;;  %4367 = vmatmul.msk.f32.vlgmr.msrb.gmra.mxu3 %vm224_vm0, %v7085_v3  ;;  %4392 = vmatmul.msk.f32.vlgmr.msra.gmra.mxu0 %vm224_vm0, %v7090_v27 }
 0x313   :  { %4434 = vmatmul.msk.f32.vlgmr.msra.gmra.mxu2 %vm224_vm0, %v7380_v18  ;;  %v1455_v5 = vpop.f32.mrf.mxu3  ;;  %v1001_v61 = vsub.f32 1.5, %v1000_v62  ;;  %2885 = vmatpush.msrb.mxu3 %v9237_v38  ;;  %v9240_v62 = vld [vmem:[#allocation83_spill] sm:$0xff] }
 0x314   :  { %v4609_v31 = vpop.eup %4608  ;;  %v7391_v22 = vadd.f32 1e-05, %v882_v48  ;;  %v7393_v19 = vadd.f32 %v1561_v46, %v1455_v5  ;;  %3039 = vmatpush.msra.mxu0 %v9211_v42  ;;  %3080 = vmatpush.msra.mxu1 %v9211_v42  ;;  %v1089_v5 = vld [vmem:[%s8943_s7 + $0x30] sm:$0xff]  ;;  %v9242_v38 = vld [vmem:[#allocation87_spill] sm:$0xff] }
 0x315   :  { %v1008_v3 = vmul.f32 %v4609_v31, %v7353_v14  ;;  %v7398_v27 = vpop.f32.mrf.mxu1  ;;  %v1910_v56 = vpop.f32.mrf.mxu2  ;;  %v1002_v15 = vmul.f32 %v4607_v58, %v1001_v61  ;;  %2886 = vmatpush.msrb.mxu3 %v9238_v49  ;;  %vm1014_vm9 = vweird.f32 %v4609_v31  ;;  %v7462_v14 = vld [vmem:[%s8944_s5 + $0x1d0] sm:$0xff] }
 0x316   :  { %4610 = vrsqrt.f32 %v7391_v22  ;;  %v7408_v9 = vadd.f32 %v1910_v56, %v1772_v40  ;;  %3040 = vmatpush.msra.mxu0 %v9211_v42  ;;  %3081 = vmatpush.msra.mxu1 %v9211_v42  ;;  %vm1015_vm12 = vmor %vm1013_vm8, %vm1014_vm9  ;;  %vm1023_vm15 = vweird.f32 %v7391_v22 }
 0x317   :  { %v1564_v37 = vpop.f32.mrf.mxu0  ;;  %v1006_v26 = vsel %vm1005_vm5, %v4607_v58, %v1002_v15  ;;  %v1009_v46 = vmul.f32 %v4609_v31, %v1008_v3  ;;  %2887 = vmatpush.msrb.mxu3 %v9239_v21  ;;  %v1153_v3 = vld [vmem:[%s8942_s8 + $0x30] sm:$0xff] }
 0x318   :  { %4410 = vmatmul.msk.f32.gmra.mxu1 %vm224_vm0, %v7403_v50  ;;  %1054 = vperm.xlu0 %4561, %v1006_v26  }
 0x319   :  { %915 = vperm.xlu1 %4562, %v7318_v24   ;;  %1182 = vperm.xlu2 %4563, %v1152_v43   ;;  %v1010_v57 = vmul.f32 0.5, %v1009_v46  ;;  %v9243_v43 = vld [vmem:[#allocation94_spill] sm:$0xff]  ;;  %v7464_v46 = vpop.permute.xlu1 %1157 }
 0x31a   :  { %4368 = vmatmul.msk.f32.gmra.mxu3 %vm224_vm0, %v7110_v41  ;;  %4393 = vmatmul.msk.f32.gmra.mxu0 %vm224_vm0, %v7121_v55  ;;  %v7442_v55 = vld [vmem:[%s8944_s5 + $0x190] sm:$0xff] }
 0x31b   :  { %4435 = vmatmul.msk.f32.gmra.mxu2 %vm224_vm0, %v7422_v7  ;;  %v1458_v58 = vpop.f32.mrf.mxu3  ;;  %v1011_v8 = vsub.f32 1.5, %v1010_v57  ;;  %2888 = vmatpush.msrb.mxu3 %v9240_v62  ;;  %v9244_v57 = vld [vmem:[#allocation98_spill] sm:$0xff] }
 0x31c   :  { %v4611_v48 = vpop.eup %4610  ;;  %v7432_v40 = vadd.f32 %v1564_v37, %v1458_v58  ;;  %3041 = vmatpush.msra.mxu0 %v9211_v42  ;;  %3082 = vmatpush.msra.mxu1 %v9211_v42  ;;  %v9246_v62 = vld [vmem:[#allocation102_spill] sm:$0xff] }
 0x31d   :  { %v1018_v41 = vmul.f32 %v4611_v48, %v7391_v22  ;;  %v7437_v24 = vpop.f32.mrf.mxu1  ;;  %v1012_v61 = vmul.f32 %v4609_v31, %v1011_v8  ;;  %2889 = vmatpush.msrb.mxu3 %v9242_v38  ;;  %v7455_v37 = vpop.f32.mrf.mxu2  ;;  %vm1024_vm13 = vweird.f32 %v4611_v48  ;;  %v7499_v22 = vld [vmem:[%s8944_s5 + $0x1d8] sm:$0xff] }
 0x31e   :  { %9241 = vst [vmem:[#allocation3_spill] sm:$0xff] %v7437_v24  ;;  %3042 = vmatpush.msra.mxu0 %v9211_v42  ;;  %3083 = vmatpush.msra.mxu1 %v9211_v42  ;;  %vm1025_vm3 = vmor %vm1023_vm15, %vm1024_vm13 }
 0x31f   :  { %v1567_v56 = vpop.f32.mrf.mxu0  ;;  %v1016_v15 = vsel %vm1015_vm12, %v4609_v31, %v1012_v61  ;;  %v1019_v49 = vmul.f32 %v4611_v48, %v1018_v41  ;;  %2890 = vmatpush.msrb.mxu3 %v9243_v43  ;;  %v7486_v41 = vpop.permute.xlu2 %2944  ;;  %v2941_v43 = vld [vmem:[%s8941_s6 + $0x38] sm:$0xff] }
 0x320   :  { %4411 = vmatmul.msk.f32.gmra.mxu1 %vm224_vm0, %v7442_v55  ;;  %1123 = vperm.xlu0 %4561, %v1089_v5   ;;  %9247 = vst [vmem:[#allocation9_spill] sm:$0xff] %v7486_v41  ;;  %v2940_v5 = vld [vmem:[%s8941_s6 + $0x30] sm:$0xff] }
 0x321   :  { %1187 = vperm.xlu1 %4562, %v1153_v3   ;;  %1059 = vperm.xlu2 %4563, %v1016_v15   ;;  %v1020_v26 = vmul.f32 0.5, %v1019_v49  ;;  %v1090_v49 = vld [vmem:[%s8943_s7 + $0x38] sm:$0xff] }
 0x322   :  { %4369 = vmatmul.msk.f32.gmra.mxu3 %vm224_vm0, %v7148_v1  ;;  %4394 = vmatmul.msk.f32.gmra.mxu0 %vm224_vm0, %v7161_v2  ;;  %v7482_v1 = vld [vmem:[%s8944_s5 + $0x198] sm:$0xff] }
 0x323   :  { %4436 = vmatmul.msk.f32.gmra.mxu2 %vm224_vm0, %v7462_v14  ;;  %v1461_v31 = vpop.f32.mrf.mxu3  ;;  %v1021_v21 = vsub.f32 1.5, %v1020_v26  ;;  %2891 = vmatpush.msrb.mxu3 %v9244_v57 }
 0x324   :  { %v7473_v58 = vadd.f32 %v1567_v56, %v1461_v31  ;;  %3043 = vmatpush.msra.mxu0 %v9211_v42  ;;  %3084 = vmatpush.msra.mxu1 %v9211_v42 }
 0x325   :  { %v7477_v8 = vpop.f32.mrf.mxu1  ;;  %v1022_v2 = vmul.f32 %v4611_v48, %v1021_v21  ;;  %2892 = vmatpush.msrb.mxu3 %v9246_v62  ;;  %v7501_v3 = vpop.f32.mrf.mxu2  ;;  %v7541_v21 = vld [vmem:[%s8944_s5 + $0x1e0] sm:$0xff] }
 0x326   :  { %9245 = vst [vmem:[#allocation10_spill] sm:$0xff] %v7477_v8  ;;  %3044 = vmatpush.msra.mxu0 %v9211_v42  ;;  %3085 = vmatpush.msra.mxu1 %v9211_v42 }
 0x327   :  { %v1570_v61 = vpop.f32.mrf.mxu0  ;;  %v1026_v38 = vsel %vm1025_vm3, %v4611_v48, %v1022_v2  ;;  %9248 = vst [vmem:[#allocation34_spill] sm:$0xff] %v7501_v3  ;;  %v7534_v31 = vpop.permute.xlu2 %1098 }
 0x328   :  { %4412 = vmatmul.msk.f32.gmra.mxu1 %vm224_vm0, %v7482_v1  ;;  %920 = vperm.xlu0 %4561, %v7356_v44   ;;  %v7510_v44 = vpop.permute.xlu1 %2949 }
 0x329   :  { %2974 = vperm.xlu2 %4563, %v2940_v5   ;;  %1064 = vperm.xlu1 %4562, %v1026_v38   ;;  %9249 = vst [vmem:[#allocation12_spill] sm:$0xff] %v7510_v44  ;;  %v7572_v38 = vld [vmem:[%s8944_s5 + $0x1e8] sm:$0xff] }
 0x32a   :  { %4370 = vmatmul.msk.f32.gmra.mxu3 %vm224_vm0, %v7188_v32  ;;  %4395 = vmatmul.msk.f32.gmra.mxu0 %vm224_vm0, %v7201_v63  ;;  %v7520_v32 = vld [vmem:[%s8944_s5 + $0x1a0] sm:$0xff]  ;;  %v1154_v63 = vld [vmem:[%s8942_s8 + $0x38] sm:$0xff] }
 0x32b   :  { %4437 = vmatmul.msk.f32.gmra.mxu2 %vm224_vm0, %v7499_v22  ;;  %v1464_v48 = vpop.f32.mrf.mxu3  ;;  %3045 = vmatpush.msra.mxu0 %v9211_v42 }
 0x32c   :  { %v7512_v56 = vadd.f32 %v1570_v61, %v1464_v48  ;;  %3086 = vmatpush.msra.mxu1 %v9211_v42 }
 0x32d   :  { %v7515_v15 = vpop.f32.mrf.mxu1  ;;  %3046 = vmatpush.msra.mxu0 %v9211_v42  ;;  %v7550_v2 = vpop.f32.mrf.mxu2 }
 0x32e   :  { %9250 = vst [vmem:[#allocation4_spill] sm:$0xff] %v7515_v15  ;;  %3087 = vmatpush.msra.mxu1 %v9211_v42 }
 0x32f   :  { %v1573_v26 = vpop.f32.mrf.mxu0  ;;  %3047 = vmatpush.msra.mxu0 %v9211_v42  ;;  %9251 = vst [vmem:[#allocation49_spill] sm:$0xff] %v7550_v2  ;;  %v7576_v48 = vpop.permute.xlu2 %1167 }
 0x330   :  { %4413 = vmatmul.msk.f32.gmra.mxu1 %vm224_vm0, %v7520_v32  ;;  %1192 = vperm.xlu0 %4561, %v1154_v63  }
 0x331   :  { %1128 = vperm.xlu2 %4563, %v1090_v49   ;;  %2979 = vperm.xlu1 %4562, %v2941_v43   ;;  %v7585_v49 = vpop.permute.xlu0 %1093 }
 0x332   :  { %4371 = vmatmul.msk.f32.gmra.mxu3 %vm224_vm0, %v7223_v6  ;;  %4396 = vmatmul.msk.f32.gmra.mxu0 %vm224_vm0, %v7235_v36  ;;  %v7560_v6 = vld [vmem:[%s8944_s5 + $0x1a8] sm:$0xff]  ;;  %v7563_v36 = vpop.permute.xlu1 %1103 }
 0x333   :  { %4438 = vmatmul.msk.f32.gmra.mxu2 %vm224_vm0, %v7541_v21  ;;  %v1467_v57 = vpop.f32.mrf.mxu3  ;;  %3048 = vmatpush.msra.mxu0 %v9211_v42 }
 0x334   :  { %v7552_v62 = vadd.f32 %v1573_v26, %v1467_v57  ;;  %3088 = vmatpush.msra.mxu1 %v9211_v42 }
 0x335   :  { %v7555_v5 = vpop.f32.mrf.mxu1  ;;  %3049 = vmatpush.msra.mxu0 %v9211_v42 }
 0x336   :  { %9252 = vst [vmem:[#allocation55_spill] sm:$0xff] %v7555_v5  ;;  %3089 = vmatpush.msra.mxu1 %v9211_v42 }
 0x337   :  { %v1576_v61 = vpop.f32.mrf.mxu0  ;;  %3050 = vmatpush.msra.mxu0 %v9211_v42 }
 0x338   :  { %4414 = vmatmul.msk.f32.gmra.mxu1 %vm224_vm0, %v7560_v6 }
 0x339   :  { %3051 = vmatpush.msra.mxu0 %v9211_v42  ;;  %3090 = vmatpush.msra.mxu1 %v9211_v42 }
 0x33a   :  { %4372 = vmatmul.msk.f32.gmra.mxu3 %vm224_vm0, %v7254_v34  ;;  %4397 = vmatmul.msk.f32.gmra.mxu0 %vm224_vm0, %v7268_v13  ;;  %v7595_v34 = vld [vmem:[%s8944_s5 + $0x1b0] sm:$0xff]  ;;  %v7598_v13 = vpop.f32.mrf.mxu2 }
 0x33b   :  { %4439 = vmatmul.msk.f32.gmra.mxu2 %vm224_vm0, %v7572_v38  ;;  %v1470_v63 = vpop.f32.mrf.mxu3  ;;  %3052 = vmatpush.msra.mxu0 %v9211_v42  ;;  %9254 = vst [vmem:[#allocation14_spill] sm:$0xff] %v7598_v13 }
 0x33c   :  { %v7587_v43 = vadd.f32 %v1576_v61, %v1470_v63  ;;  %3091 = vmatpush.msra.mxu1 %v9211_v42  ;;  %v7602_v61 = vpop.permute.xlu1 %1172  ;;  %v7609_v63 = vld [vmem:[%s8944_s5 + $0x1f0] sm:$0xff] }
 0x33d   :  { %v7590_v26 = vpop.f32.mrf.mxu1  ;;  %3053 = vmatpush.msra.mxu0 %v9211_v42 }
 0x33e   :  { %9253 = vst [vmem:[#allocation43_spill] sm:$0xff] %v7590_v26  ;;  %3092 = vmatpush.msra.mxu1 %v9211_v42 }
 0x33f   :  { %v1579_v57 = vpop.f32.mrf.mxu0  ;;  %3054 = vmatpush.msra.mxu0 %v9211_v42 }
 0x340   :  { %4415 = vmatmul.msk.f32.gmra.mxu1 %vm224_vm0, %v7595_v34  ;;  %v7612_v60 = vpop.permute.xlu2 %895 }
 0x341   :  { %3093 = vmatpush.msra.mxu1 %v9211_v42 }
 0x342   :  { %4373 = vmatmul.msk.f32.gmra.mxu3 %vm224_vm0, %v7287_v29  ;;  %4398 = vmatmul.msk.f32.gmra.mxu0 %vm224_vm0, %v7307_v53  ;;  %v7631_v29 = vpop.permute.xlu0 %1162  ;;  %v7633_v13 = vpop.f32.mrf.mxu2 }
 0x343   :  { %4440 = vmatmul.msk.f32.gmra.mxu2 %vm224_vm0, %v7609_v63  ;;  %v1473_v26 = vpop.f32.mrf.mxu3  ;;  %3094 = vmatpush.msra.mxu1 %v9211_v42  ;;  %9256 = vst [vmem:[#allocation60_spill] sm:$0xff] %v7633_v13 }
 0x344   :  { %v7621_v4 = vadd.f32 %v1579_v57, %v1473_v26  ;;  %v7640_v26 = vld [vmem:[%s8944_s5 + $0x1f8] sm:$0xff]  ;;  %v9257_v57 = vld [vmem:[#allocation110_spill] sm:$0xff] }
 0x345   :  { %v7623_v5 = vpop.f32.mrf.mxu1  ;;  %3095 = vmatpush.msra.mxu1 %v9211_v42 }
 0x346   :  { %9255 = vst [vmem:[#allocation15_spill] sm:$0xff] %v7623_v5 }
 0x347   :  { %v1582_v53 = vpop.f32.mrf.mxu0 }
 0x348   :  { %4416 = vmatmul.msk.f32.gmra.mxu1 %vm224_vm0, %v7628_v54  ;;  %v886_v15 = vpop.permute.xlu1 %885 }
 0x349   :  { %v923_v5 = vsub.f32 %v9257_v57, %v886_v15  ;;  %v924_v11 = vsub.f32 %v6492_v12, %v886_v15  ;;  %v7660_v12 = vld [vmem:[%s8944_s5 + $0x200] sm:$0xff] }
 0x34a   :  { %4374 = vmatmul.msk.f32.gmra.mxu3 %vm224_vm0, %v7324_v17  ;;  %v1030_v2 = vpop.permute.xlu2 %1029  ;;  %4399 = vmatmul.msk.f32.gmra.mxu0 %vm224_vm0, %v7345_v33  ;;  %v7665_v15 = vpop.permute.xlu0 %2954 }
 0x34b   :  { %4441 = vmatmul.msk.f32.gmra.mxu2 %vm224_vm0, %v7640_v26  ;;  %v1067_v13 = vmul.f32 %v1030_v2, %v923_v5  ;;  %v7650_v44 = vmul.f32 %v1030_v2, %v924_v11  ;;  %v1476_v8 = vpop.f32.mrf.mxu3  ;;  %9259 = vst [vmem:[#allocation54_spill] sm:$0xff] %v7665_v15  ;;  %v7669_v11 = vpop.f32.mrf.mxu2 }
 0x34c   :  { %v7652_v0 = vadd.f32 %v1582_v53, %v1476_v8  ;;  %9260 = vst [vmem:[#allocation63_spill] sm:$0xff] %v7669_v11  ;;  %v7685_v53 = vld [vmem:[%s8944_s5 + $0x208] sm:$0xff] }
 0x34d   :  { %v1131_v57 = vmul.f32 %v7585_v49, %v1067_v13  ;;  %v7655_v3 = vpop.f32.mrf.mxu1 }
 0x34f   :  { %v7663_v17 = vadd.f32 %v7464_v46, %v1131_v57  ;;  %v1951_v33 = vpop.f32.mrf.mxu0 }
 0x350   :  { %4459 = vmatmul.msk.f32.vlgmr.msrb.gmra.mxu1 %vm224_vm0, %v7660_v12 }
 0x351   :  { %9258 = vst [vmem:[#allocation59_spill] sm:$0xff] %v7663_v17 }
 0x352   :  { %4417 = vmatmul.msk.f32.vlgmr.msra.gmra.mxu3 %vm224_vm0, %v7362_v23  ;;  %4442 = vmatmul.msk.f32.vlgmr.msrb.gmra.mxu0 %vm224_vm0, %v7380_v18 }
 0x353   :  { %3014 = vmatmul.f32.vlgmr.msrb.gmra.mxu2 %v7663_v17  ;;  %v7676_v8 = vpop.permute.xlu2 %2959  ;;  %v1748_v2 = vpop.f32.mrf.mxu3  ;;  %3121 = vmatpush.msra.mxu3 %v9211_v42 }
 0x354   :  { %9261 = vst [vmem:[#allocation67_spill] sm:$0xff] %v7676_v8  ;;  %v1773_v5 = vadd.f32 %v1748_v2, %v7393_v19  ;;  %v7694_v19 = vpop.permute.xlu0 %1108  ;;  %v7703_v2 = vpop.f32.mrf.mxu2 }
 0x355   :  { %v7680_v13 = vpop.f32.mrf.mxu1  ;;  %3122 = vmatpush.msra.mxu3 %v9211_v42  ;;  %9263 = vst [vmem:[#allocation16_spill] sm:$0xff] %v7703_v2 }
 0x356   :  { %v7688_v23 = vadd.f32 %v1951_v33, %v1773_v5 }
 0x357   :  { %v1954_v18 = vpop.f32.mrf.mxu0  ;;  %3123 = vmatpush.msra.mxu3 %v9211_v42 }
 0x358   :  { %9262 = vst [vmem:[#allocation66_spill] sm:$0xff] %v7688_v23  ;;  %4460 = vmatmul.msk.f32.gmra.mxu1 %vm224_vm0, %v7685_v53  ;;  %v7711_v23 = vld [vmem:[%s8944_s5 + $0x210] sm:$0xff] }
 0x359   :  { %3124 = vmatpush.msra.mxu3 %v9211_v42 }
 0x35a   :  { %4418 = vmatmul.msk.f32.gmra.mxu3 %vm224_vm0, %v7403_v50  ;;  %4443 = vmatmul.msk.f32.gmra.mxu0 %vm224_vm0, %v7422_v7 }
 0x35b   :  { %v7700_v57 = vpop.permute.xlu2 %1113  ;;  %v1751_v33 = vpop.f32.mrf.mxu3  ;;  %3125 = vmatpush.msra.mxu3 %v9211_v42 }
 0x35c   :  { %v1775_v5 = vadd.f32 %v1751_v33, %v7432_v40  ;;  %v7721_v33 = vpop.permute.xlu0 %890 }
 0x35d   :  { %v7706_v17 = vpop.f32.mrf.mxu1  ;;  %3126 = vmatpush.msra.mxu3 %v9211_v42 }
 0x35e   :  { %9264 = vst [vmem:[#allocation11_spill] sm:$0xff] %v7706_v17  ;;  %v7714_v50 = vadd.f32 %v1954_v18, %v1775_v5 }
 0x35f   :  { %v1957_v7 = vpop.f32.mrf.mxu0  ;;  %3127 = vmatpush.msra.mxu3 %v9211_v42 }
 0x360   :  { %9265 = vst [vmem:[#allocation13_spill] sm:$0xff] %v7714_v50  ;;  %4461 = vmatmul.msk.f32.gmra.mxu1 %vm224_vm0, %v7711_v23  ;;  %v901_v2 = vpop.permute.xlu1 %900 }
 0x361   :  { %v930_v40 = vsub.f32 %v6649_v45, %v901_v2  ;;  %3128 = vmatpush.msra.mxu3 %v9211_v42  ;;  %v7734_v45 = vld [vmem:[%s8944_s5 + $0x218] sm:$0xff] }
 0x362   :  { %4419 = vmatmul.msk.f32.gmra.mxu3 %vm224_vm0, %v7442_v55  ;;  %4444 = vmatmul.msk.f32.gmra.mxu0 %vm224_vm0, %v7462_v14  ;;  %v7737_v55 = vpop.f32.mrf.mxu2 }
 0x363   :  { %v1045_v18 = vpop.permute.xlu2 %1044  ;;  %v1754_v5 = vpop.f32.mrf.mxu3  ;;  %3129 = vmatpush.msra.mxu3 %v9211_v42 }
 0x364   :  { %v1074_v50 = vmul.f32 %v1045_v18, %v930_v40  ;;  %v1777_v11 = vadd.f32 %v1754_v5, %v7473_v58  ;;  %v9269_v40 = vld [vmem:[#allocation112_spill] sm:$0xff] }
 0x365   :  { %v7729_v8 = vpop.f32.mrf.mxu1  ;;  %3130 = vmatpush.msra.mxu3 %v9211_v42  ;;  %v925_v5 = vsub.f32 %v9269_v40, %v7721_v33 }
 0x366   :  { %9266 = vst [vmem:[#allocation17_spill] sm:$0xff] %v7729_v8  ;;  %v1138_v14 = vmul.f32 %v7694_v19, %v1074_v50  ;;  %v7740_v17 = vadd.f32 %v1957_v7, %v1777_v11 }
 0x367   :  { %v1960_v15 = vpop.f32.mrf.mxu0  ;;  %3131 = vmatpush.msra.mxu3 %v9211_v42 }
 0x368   :  { %9267 = vst [vmem:[#allocation19_spill] sm:$0xff] %v7740_v17  ;;  %4462 = vmatmul.msk.f32.gmra.mxu1 %vm224_vm0, %v7734_v45  ;;  %v7746_v58 = vadd.f32 %v7602_v61, %v1138_v14  ;;  %v7751_v8 = vpop.permute.xlu0 %905 }
 0x369   :  { %3132 = vmatpush.msra.mxu3 %v9211_v42 }
 0x36a   :  { %9268 = vst [vmem:[#allocation18_spill] sm:$0xff] %v7746_v58  ;;  %4420 = vmatmul.msk.f32.gmra.mxu3 %vm224_vm0, %v7482_v1  ;;  %v7755_v11 = vpop.permute.xlu1 %1034  ;;  %4445 = vmatmul.msk.f32.gmra.mxu0 %vm224_vm0, %v7499_v22  ;;  %v7768_v1 = vld [vmem:[%s8944_s5 + $0x220] sm:$0xff] }
 0x36b   :  { %v1069_v50 = vmul.f32 %v7755_v11, %v925_v5  ;;  %v1757_v7 = vpop.f32.mrf.mxu3  ;;  %3133 = vmatpush.msra.mxu3 %v9211_v42 }
 0x36c   :  { %v1779_v14 = vadd.f32 %v1757_v7, %v7512_v56  ;;  %v7777_v56 = vpop.f32.mrf.mxu2 }
 0x36d   :  { %v1133_v40 = vmul.f32 %v7534_v31, %v1069_v50  ;;  %v7763_v17 = vpop.f32.mrf.mxu1  ;;  %3134 = vmatpush.msra.mxu3 %v9211_v42  ;;  %9273 = vst [vmem:[#allocation23_spill] sm:$0xff] %v7777_v56  ;;  %v9274_v50 = vld [vmem:[#allocation113_spill] sm:$0xff] }
 0x36e   :  { %9270 = vst [vmem:[#allocation21_spill] sm:$0xff] %v7763_v17  ;;  %v7771_v41 = vadd.f32 %v1960_v15, %v1779_v14  ;;  %v927_v7 = vsub.f32 %v9274_v50, %v7612_v60  ;;  %v928_v17 = vsub.f32 %v6593_v28, %v7612_v60  ;;  %v9275_v14 = vld [vmem:[#allocation114_spill] sm:$0xff] }
 0x36f   :  { %v1963_v22 = vpop.f32.mrf.mxu0  ;;  %v7774_v5 = vadd.f32 %v7631_v29, %v1133_v40  ;;  %3135 = vmatpush.msra.mxu3 %v9211_v42  ;;  %v929_v40 = vsub.f32 %v9275_v14, %v901_v2 }
 0x370   :  { %9271 = vst [vmem:[#allocation22_spill] sm:$0xff] %v7771_v41  ;;  %4463 = vmatmul.msk.f32.gmra.mxu1 %vm224_vm0, %v7768_v1 }
 0x371   :  { %9272 = vst [vmem:[#allocation25_spill] sm:$0xff] %v7774_v5  ;;  %3017 = vmatmul.f32.gmra.mxu2 %v7774_v5  ;;  %3136 = vmatpush.msra.mxu3 %v9211_v42 }
 0x372   :  { %4421 = vmatmul.msk.f32.gmra.mxu3 %vm224_vm0, %v7520_v32  ;;  %v1040_v15 = vpop.permute.xlu0 %1039  ;;  %4446 = vmatmul.msk.f32.gmra.mxu0 %vm224_vm0, %v7541_v21  ;;  %v7802_v32 = vld [vmem:[%s8944_s5 + $0x228] sm:$0xff]  ;;  %v1073_v21 = vmul.f32 %v1045_v18, %v929_v40  ;;  %v7834_v40 = vld [vmem:[%s8944_s5 + $0x230] sm:$0xff] }
 0x373   :  { %v1071_v41 = vmul.f32 %v1040_v15, %v927_v7  ;;  %v1072_v56 = vmul.f32 %v1040_v15, %v928_v17  ;;  %v7792_v24 = vpop.permute.xlu1 %2964 }
 0x374   :  { %v1760_v50 = vpop.f32.mrf.mxu3 }
 0x375   :  { %v1135_v28 = vmul.f32 %v7563_v36, %v1071_v41  ;;  %v1136_v60 = vmul.f32 %v7563_v36, %v1072_v56  ;;  %v1781_v42 = vadd.f32 %v1760_v50, %v7552_v62  ;;  %v7797_v5 = vpop.f32.mrf.mxu1  ;;  %v7812_v36 = vpop.permute.xlu2 %910 }
 0x376   :  { %v7817_v62 = vpop.f32.mrf.mxu2 }
 0x377   :  { %v1966_v2 = vpop.f32.mrf.mxu0  ;;  %v7805_v17 = vadd.f32 %v7576_v48, %v1135_v28  ;;  %v7808_v7 = vadd.f32 %v7576_v48, %v1136_v60  ;;  %v7810_v41 = vadd.f32 %v1963_v22, %v1781_v42  ;;  %v1137_v48 = vmul.f32 %v7694_v19, %v1073_v21 }
 0x378   :  { %4464 = vmatmul.msk.f32.gmra.mxu1 %vm224_vm0, %v7802_v32 }
 0x379   :  { %9276 = vst [vmem:[#allocation26_spill] sm:$0xff] %v7805_v17  ;;  %3020 = vmatmul.f32.gmra.mxu2 %v7805_v17  ;;  %v7837_v50 = vadd.f32 %v7602_v61, %v1137_v48 }
 0x37a   :  { %9277 = vst [vmem:[#allocation28_spill] sm:$0xff] %v7808_v7  ;;  %4422 = vmatmul.msk.f32.gmra.mxu3 %vm224_vm0, %v7560_v6  ;;  %v7821_v18 = vpop.permute.xlu0 %1177  ;;  %4447 = vmatmul.msk.f32.gmra.mxu0 %vm224_vm0, %v7572_v38  ;;  %v931_v38 = vsub.f32 %v6383_v52, %v7751_v8  ;;  %v7864_v52 = vld [vmem:[%s8944_s5 + $0x238] sm:$0xff] }
 0x37b   :  { %v7826_v22 = vpop.permute.xlu1 %1118  ;;  %9278 = vst [vmem:[#allocation27_spill] sm:$0xff] %v7837_v50 }
 0x37c   :  { %v1763_v56 = vpop.f32.mrf.mxu3 }
 0x37d   :  { %v1783_v15 = vadd.f32 %v1763_v56, %v7587_v43  ;;  %v7829_v14 = vpop.f32.mrf.mxu1  ;;  %v7846_v43 = vpop.permute.xlu2 %1182 }
 0x37e   :  { %v7856_v60 = vpop.f32.mrf.mxu2 }
 0x37f   :  { %v1969_v6 = vpop.f32.mrf.mxu0  ;;  %v7839_v28 = vadd.f32 %v1966_v2, %v1783_v15 }
 0x380   :  { %4465 = vmatmul.msk.f32.gmra.mxu1 %vm224_vm0, %v7834_v40 }
 0x381   :  { %9279 = vst [vmem:[#allocation29_spill] sm:$0xff] %v7839_v28  ;;  %3023 = vmatmul.f32.gmra.mxu2 %v7837_v50 }
 0x382   :  { %4423 = vmatmul.msk.f32.gmra.mxu3 %vm224_vm0, %v7595_v34  ;;  %v7850_v19 = vpop.permute.xlu0 %2969  ;;  %4448 = vmatmul.msk.f32.gmra.mxu0 %vm224_vm0, %v7609_v63 }
 0x383   :  { %v7854_v61 = vpop.permute.xlu1 %1049 }
 0x384   :  { %v1075_v42 = vmul.f32 %v7854_v61, %v931_v38  ;;  %v933_v38 = vsub.f32 %v6414_v25, %v7812_v36 }
 0x385   :  { %v1766_v21 = vpop.f32.mrf.mxu3  ;;  %v7859_v2 = vpop.f32.mrf.mxu1 }
 0x386   :  { %v1139_v34 = vmul.f32 %v7700_v57, %v1075_v42  ;;  %v1785_v48 = vadd.f32 %v1766_v21, %v7621_v4  ;;  %v7894_v17 = vpop.f32.mrf.mxu2 }
 0x387   :  { %v1972_v56 = vpop.f32.mrf.mxu0 }
 0x388   :  { %4466 = vmatmul.msk.f32.gmra.mxu1 %vm224_vm0, %v7864_v52  ;;  %v7871_v63 = vadd.f32 %v7821_v18, %v1139_v34  ;;  %v7873_v15 = vadd.f32 %v1969_v6, %v1785_v48  ;;  %v7887_v34 = vpop.permute.xlu2 %1059  ;;  %v1132_v6 = vmul.f32 %v7585_v49, %v7650_v44 }
 0x38a   :  { %9280 = vst [vmem:[#allocation31_spill] sm:$0xff] %v7871_v63  ;;  %4424 = vmatmul.msk.f32.gmra.mxu3 %vm224_vm0, %v7628_v54  ;;  %3026 = vmatmul.f32.gmra.mxu2 %v7871_v63  ;;  %v7880_v42 = vpop.permute.xlu0 %1054  ;;  %v7909_v49 = vadd.f32 %v7464_v46, %v1132_v6 }
 0x38b   :  { %9281 = vst [vmem:[#allocation30_spill] sm:$0xff] %v7873_v15  ;;  %v1077_v4 = vmul.f32 %v7880_v42, %v933_v38  ;;  %v7883_v21 = vpop.permute.xlu1 %915  ;;  %4449 = vmatmul.msk.f32.gmra.mxu0 %vm224_vm0, %v7640_v26  ;;  %v926_v26 = vsub.f32 %v6543_v16, %v7721_v33 }
 0x38c   :  { %v935_v38 = vsub.f32 %v6435_v47, %v7883_v21  ;;  %9284 = vst [vmem:[#allocation24_spill] sm:$0xff] %v7909_v49 }
 0x38d   :  { %v1141_v25 = vmul.f32 %v7826_v22, %v1077_v4  ;;  %v1769_v48 = vpop.f32.mrf.mxu3  ;;  %v7892_v54 = vpop.f32.mrf.mxu1  ;;  %v1070_v4 = vmul.f32 %v7755_v11, %v926_v26 }
 0x38e   :  { %v1787_v50 = vadd.f32 %v1769_v48, %v7652_v0  ;;  %v1079_v16 = vmul.f32 %v7887_v34, %v935_v38 }
 0x38f   :  { %v7901_v63 = vpop.f32.mrf.mxu0  ;;  %v7904_v15 = vadd.f32 %v7846_v43, %v1141_v25 }
 0x390   :  { %v7906_v44 = vadd.f32 %v1972_v56, %v1787_v50  ;;  %v1134_v50 = vmul.f32 %v7534_v31, %v1070_v4  ;;  %v7922_v6 = vpop.permute.xlu2 %2974 }
 0x391   :  { %9282 = vst [vmem:[#allocation20_spill] sm:$0xff] %v7904_v15 }
 0x392   :  { %9283 = vst [vmem:[#allocation32_spill] sm:$0xff] %v7906_v44  ;;  %4467 = vmatmul.msk.f32.vlgmr.msrb.gmra.mxu3 %vm224_vm0, %v7660_v12  ;;  %3029 = vmatmul.f32.gmra.mxu2 %v7904_v15  ;;  %v1124_v47 = vpop.permute.xlu0 %1123  ;;  %v7926_v12 = vpop.f32.mrf.mxu2  ;;  %v7931_v48 = vadd.f32 %v7631_v29, %v1134_v50 }
 0x393   :  { %v1188_v0 = vpop.permute.xlu1 %1187  ;;  %3055 = vmatmul.f32.vlgmr.msra.gmra.mxu0 %v7909_v49  ;;  %v1143_v33 = vmul.f32 %v1124_v47, %v1079_v16 }
 0x394   :  { %9286 = vst [vmem:[#allocation33_spill] sm:$0xff] %v7931_v48 }
 0x395   :  { %v7918_v56 = vpop.f32.mrf.mxu3  ;;  %v7920_v46 = vpop.f32.mrf.mxu1  ;;  %v7928_v25 = vadd.f32 %v1188_v0, %v1143_v33 }
 0x397   :  { %v7924_v11 = vpop.f32.mrf.mxu0  ;;  %9285 = vst [vmem:[#allocation35_spill] sm:$0xff] %v7928_v25 }
 0x398   :  { %v1129_v29 = vpop.permute.xlu2 %1128 }
 0x39a   :  { %4468 = vmatmul.msk.f32.gmra.mxu3 %vm224_vm0, %v7685_v53  ;;  %3032 = vmatmul.f32.gmra.mxu2 %v7928_v25  ;;  %v921_v31 = vpop.permute.xlu0 %920  ;;  %v7944_v15 = vpop.f32.mrf.mxu2  ;;  %v932_v25 = vsub.f32 %v6696_v30, %v7751_v8  ;;  %v934_v30 = vsub.f32 %v6736_v39, %v7812_v36  ;;  %v936_v39 = vsub.f32 %v6779_v20, %v7883_v21 }
 0x39b   :  { %3058 = vmatmul.f32.gmra.mxu0 %v7931_v48  ;;  %v937_v38 = vsub.f32 %v6458_v59, %v921_v31  ;;  %v1065_v26 = vpop.permute.xlu1 %1064 }
 0x39c   :  { %v1076_v44 = vmul.f32 %v7854_v61, %v932_v25  ;;  %v1078_v61 = vmul.f32 %v7880_v42, %v934_v30  ;;  %v938_v30 = vsub.f32 %v6805_v35, %v921_v31 }
 0x39d   :  { %v1081_v4 = vmul.f32 %v1065_v26, %v937_v38  ;;  %v7938_v16 = vpop.f32.mrf.mxu3  ;;  %v7940_v49 = vpop.f32.mrf.mxu1 }
 0x39f   :  { %v7942_v33 = vpop.f32.mrf.mxu0  ;;  %v1145_v50 = vmul.f32 %v1129_v29, %v1081_v4 }
 0x3a2   :  { %4469 = vmatmul.msk.f32.gmra.mxu3 %vm224_vm0, %v7711_v23  ;;  %v1193_v53 = vpop.permute.xlu0 %1192  ;;  %v7964_v23 = vpop.f32.mrf.mxu2 }
 0x3a3   :  { %3061 = vmatmul.f32.gmra.mxu0 %v7808_v7  ;;  %v7949_v48 = vadd.f32 %v1193_v53, %v1145_v50  ;;  %v1140_v50 = vmul.f32 %v7700_v57, %v1076_v44  ;;  %v1142_v57 = vmul.f32 %v7826_v22, %v1078_v61 }
 0x3a5   :  { %v7951_v59 = vpop.f32.mrf.mxu3  ;;  %v7953_v38 = vpop.f32.mrf.mxu1  ;;  %3035 = vmatmul.f32.gmra.mxu2 %v7949_v48  ;;  %v7977_v25 = vadd.f32 %v7821_v18, %v1140_v50  ;;  %v7992_v18 = vadd.f32 %v7846_v43, %v1142_v57 }
 0x3a7   :  { %v7958_v4 = vpop.f32.mrf.mxu0  ;;  %9287 = vst [vmem:[#allocation111_spill] sm:$0xff] %v7977_v25 }
 0x3aa   :  { %4470 = vmatmul.msk.f32.gmra.mxu3 %vm224_vm0, %v7734_v45 }
 0x3ab   :  { %3064 = vmatmul.f32.gmra.mxu0 %v7746_v58  ;;  %v2650_v58 = vpop.f32.mrf.mxu2 }
 0x3ad   :  { %v7967_v7 = vpop.f32.mrf.mxu3  ;;  %v7969_v28 = vpop.f32.mrf.mxu1 }
 0x3af   :  { %v7973_v8 = vpop.f32.mrf.mxu0 }
 0x3b2   :  { %4471 = vmatmul.msk.f32.gmra.mxu3 %vm224_vm0, %v7768_v1  ;;  %v1080_v1 = vmul.f32 %v7887_v34, %v936_v39 }
 0x3b3   :  { %3067 = vmatmul.f32.gmra.mxu0 %v7977_v25  ;;  %v2653_v21 = vpop.f32.mrf.mxu2 }
 0x3b4   :  { %v1144_v22 = vmul.f32 %v1124_v47, %v1080_v1  ;;  %v2106_v47 = vadd.f32 %v7655_v3, %v7408_v9 }
 0x3b5   :  { %v7983_v45 = vpop.f32.mrf.mxu3  ;;  %v7985_v44 = vpop.f32.mrf.mxu1 }
 0x3b6   :  { %v8005_v61 = vadd.f32 %v1188_v0, %v1144_v22  ;;  %v1774_v0 = vadd.f32 %v7398_v27, %v7154_v51  ;;  %v2309_v31 = vadd.f32 %v7737_v55, %v2106_v47  ;;  %v9289_v22 = vld [vmem:[#allocation23_spill] sm:$0xff] }
 0x3b7   :  { %v7989_v36 = vpop.f32.mrf.mxu0 }
 0x3b8   :  { %v1977_v9 = vadd.f32 %v7455_v37, %v1774_v0  ;;  %v9292_v37 = vld [vmem:[#allocation34_spill] sm:$0xff] }
 0x3ba   :  { %4472 = vmatmul.msk.f32.gmra.mxu3 %vm224_vm0, %v7802_v32  ;;  %v1082_v32 = vmul.f32 %v1065_v26, %v938_v30  ;;  %v2108_v51 = vadd.f32 %v7680_v13, %v1977_v9 }
 0x3bb   :  { %3070 = vmatmul.f32.gmra.mxu0 %v7992_v18  ;;  %v2656_v26 = vpop.f32.mrf.mxu2 }
 0x3bc   :  { %v1146_v57 = vmul.f32 %v1129_v29, %v1082_v32  ;;  %v2311_v30 = vadd.f32 %v9289_v22, %v2108_v51  ;;  %v9290_v32 = vld [vmem:[#allocation9_spill] sm:$0xff]  ;;  %v9295_v51 = vld [vmem:[#allocation10_spill] sm:$0xff] }
 0x3bd   :  { %v7998_v42 = vpop.f32.mrf.mxu3  ;;  %v8000_v50 = vpop.f32.mrf.mxu1 }
 0x3be   :  { %v8021_v39 = vadd.f32 %v1193_v53, %v1146_v57  ;;  %v9288_v53 = vld [vmem:[#allocation3_spill] sm:$0xff]  ;;  %v2514_v47 = vadd.f32 %v7920_v46, %v2311_v30  ;;  %v9296_v46 = vld [vmem:[#allocation12_spill] sm:$0xff] }
 0x3bf   :  { %v8003_v20 = vpop.f32.mrf.mxu0 }
 0x3c0   :  { %v2717_v57 = vadd.f32 %v2653_v21, %v2514_v47  ;;  %v9298_v21 = vld [vmem:[#allocation49_spill] sm:$0xff] }
 0x3c2   :  { %4473 = vmatmul.msk.f32.gmra.mxu3 %vm224_vm0, %v7834_v40  ;;  %v2512_v40 = vadd.f32 %v7892_v54, %v2309_v31  ;;  %v1776_v54 = vadd.f32 %v9288_v53, %v7193_v10 }
 0x3c3   :  { %3073 = vmatmul.f32.gmra.mxu0 %v8005_v61  ;;  %v2659_v0 = vpop.f32.mrf.mxu2 }
 0x3c4   :  { %v2715_v3 = vadd.f32 %v2650_v58, %v2512_v40  ;;  %v1979_v58 = vadd.f32 %v9292_v37, %v1776_v54  ;;  %v9293_v40 = vld [vmem:[#allocation11_spill] sm:$0xff] }
 0x3c5   :  { %v8010_v43 = vpop.f32.mrf.mxu3  ;;  %v8012_v34 = vpop.f32.mrf.mxu1 }
 0x3c6   :  { %v2110_v9 = vadd.f32 %v9293_v40, %v1979_v58 }
 0x3c7   :  { %v8016_v35 = vpop.f32.mrf.mxu0 }
 0x3c8   :  { %v2313_v53 = vadd.f32 %v7817_v62, %v2110_v9  ;;  %v9300_v62 = vld [vmem:[#allocation5_spill] sm:$0xff]  ;;  %v9301_v9 = vld [vmem:[#allocation4_spill] sm:$0xff] }
 0x3ca   :  { %4474 = vmatmul.msk.f32.gmra.mxu3 %vm224_vm0, %v7864_v52  ;;  %v2516_v54 = vadd.f32 %v7940_v49, %v2313_v53  ;;  %v9302_v49 = vld [vmem:[#allocation54_spill] sm:$0xff] }
 0x3cb   :  { %3076 = vmatmul.f32.gmra.mxu0 %v8021_v39  ;;  %v2662_v40 = vpop.f32.mrf.mxu2 }
 0x3cc   :  { %v2719_v47 = vadd.f32 %v2656_v26, %v2516_v54  ;;  %v9304_v26 = vld [vmem:[#allocation14_spill] sm:$0xff] }
 0x3cd   :  { %v8028_v29 = vpop.f32.mrf.mxu3  ;;  %v2853_v1 = vpop.f32.mrf.mxu1 }
 0x3ce   :  { %v2918_v27 = vadd.f32 %v2853_v1, %v2715_v3  ;;  %v9294_v1 = vld [vmem:[#allocation6_spill] sm:$0xff] }
 0x3cf   :  { %v8031_v55 = vpop.f32.mrf.mxu0 }
 0x3d0   :  { %v8037_v52 = vadd.f32 %v9290_v32, %v2918_v27  ;;  %v1778_v27 = vadd.f32 %v9295_v51, %v9294_v1 }
 0x3d2   :  { %9291 = vst [vmem:[#allocation109_spill] sm:$0xff] %v8037_v52  ;;  %3096 = vmatmul.f32.vlgmr.msra.gmra.mxu1 %v8037_v52  ;;  %v1981_v30 = vadd.f32 %v9298_v21, %v1778_v27 }
 0x3d5   :  { %v8042_v13 = vpop.f32.mrf.mxu3  ;;  %v2856_v31 = vpop.f32.mrf.mxu1 }
 0x3d6   :  { %v2920_v3 = vadd.f32 %v2856_v31, %v2717_v57  ;;  %v9299_v57 = vld [vmem:[#allocation17_spill] sm:$0xff] }
 0x3d7   :  { %v8045_v10 = vpop.f32.mrf.mxu0  ;;  %v2112_v31 = vadd.f32 %v9299_v57, %v1981_v30 }
 0x3d8   :  { %v8051_v22 = vadd.f32 %v9296_v46, %v2920_v3  ;;  %v1780_v3 = vadd.f32 %v9301_v9, %v9300_v62  ;;  %v9306_v62 = vld [vmem:[#allocation2_spill] sm:$0xff]  ;;  %v2665_v9 = vpop.f32.mrf.mxu2 }
 0x3d9   :  { %v2315_v51 = vadd.f32 %v7856_v60, %v2112_v31  ;;  %v9307_v60 = vld [vmem:[#allocation55_spill] sm:$0xff] }
 0x3da   :  { %9297 = vst [vmem:[#allocation36_spill] sm:$0xff] %v8051_v22  ;;  %3099 = vmatmul.f32.gmra.mxu1 %v8051_v22  ;;  %v1983_v54 = vadd.f32 %v9304_v26, %v1780_v3  ;;  %v1782_v31 = vadd.f32 %v9307_v60, %v9306_v62 }
 0x3db   :  { %v2518_v27 = vadd.f32 %v7953_v38, %v2315_v51  ;;  %v9308_v38 = vld [vmem:[#allocation67_spill] sm:$0xff] }
 0x3dd   :  { %v8056_v37 = vpop.f32.mrf.mxu3  ;;  %v2859_v58 = vpop.f32.mrf.mxu1  ;;  %v2721_v21 = vadd.f32 %v2659_v0, %v2518_v27  ;;  %v9309_v0 = vld [vmem:[#allocation60_spill] sm:$0xff] }
 0x3de   :  { %v2922_v52 = vadd.f32 %v2859_v58, %v2719_v47  ;;  %v9305_v58 = vld [vmem:[#allocation21_spill] sm:$0xff]  ;;  %v1985_v27 = vadd.f32 %v9309_v0, %v1782_v31 }
 0x3df   :  { %v8059_v1 = vpop.f32.mrf.mxu0  ;;  %v2114_v57 = vadd.f32 %v9305_v58, %v1983_v54 }
 0x3e0   :  { %v8065_v53 = vadd.f32 %v9302_v49, %v2922_v52  ;;  %v2668_v31 = vpop.f32.mrf.mxu2 }
 0x3e1   :  { %v2317_v52 = vadd.f32 %v7894_v17, %v2114_v57  ;;  %v9310_v17 = vld [vmem:[#allocation8_spill] sm:$0xff]  ;;  %v9311_v57 = vld [vmem:[#allocation43_spill] sm:$0xff] }
 0x3e2   :  { %9303 = vst [vmem:[#allocation75_spill] sm:$0xff] %v8065_v53  ;;  %3102 = vmatmul.f32.gmra.mxu1 %v8065_v53  ;;  %v1784_v60 = vadd.f32 %v9311_v57, %v9310_v17 }
 0x3e3   :  { %v2520_v3 = vadd.f32 %v7969_v28, %v2317_v52 }
 0x3e5   :  { %v8070_v30 = vpop.f32.mrf.mxu3  ;;  %v2862_v47 = vpop.f32.mrf.mxu1  ;;  %v2723_v26 = vadd.f32 %v2662_v40, %v2520_v3  ;;  %v9312_v40 = vld [vmem:[#allocation63_spill] sm:$0xff] }
 0x3e6   :  { %v2924_v22 = vadd.f32 %v2862_v47, %v2721_v21  ;;  %v2116_v47 = vadd.f32 %v7797_v5, %v1985_v27  ;;  %v1987_v3 = vadd.f32 %v9312_v40, %v1784_v60 }
 0x3e7   :  { %v8073_v25 = vpop.f32.mrf.mxu0 }
 0x3e8   :  { %v8079_v51 = vadd.f32 %v9308_v38, %v2924_v22  ;;  %v2319_v22 = vadd.f32 %v7926_v12, %v2116_v47  ;;  %v9313_v12 = vld [vmem:[#allocation7_spill] sm:$0xff]  ;;  %v2671_v40 = vpop.f32.mrf.mxu2 }
 0x3e9   :  { %v9314_v47 = vld [vmem:[#allocation15_spill] sm:$0xff] }
 0x3ea   :  { %3105 = vmatmul.f32.gmra.mxu1 %v8079_v51  ;;  %v2522_v52 = vadd.f32 %v7985_v44, %v2319_v22 }
 0x3ec   :  { %v2725_v0 = vadd.f32 %v2665_v9, %v2522_v52  ;;  %v9315_v9 = vld [vmem:[#allocation16_spill] sm:$0xff] }
 0x3ed   :  { %v8084_v54 = vpop.f32.mrf.mxu3  ;;  %v2865_v21 = vpop.f32.mrf.mxu1 }
 0x3ee   :  { %v2926_v58 = vadd.f32 %v2865_v21, %v2723_v26  ;;  %v2118_v26 = vadd.f32 %v7829_v14, %v1987_v3 }
 0x3ef   :  { %v8087_v62 = vpop.f32.mrf.mxu0 }
 0x3f0   :  { %v8093_v28 = vadd.f32 %v7792_v24, %v2926_v58  ;;  %v1786_v58 = vadd.f32 %v9314_v47, %v9313_v12  ;;  %v2321_v57 = vadd.f32 %v7944_v15, %v2118_v26 }
 0x3f2   :  { %3108 = vmatmul.f32.gmra.mxu1 %v8093_v28  ;;  %v2524_v22 = vadd.f32 %v8000_v50, %v2321_v57  ;;  %v1989_v60 = vadd.f32 %v9315_v9, %v1786_v58  ;;  %v3015_v58 = vpop.f32.mrf.mxu2 }
 0x3f4   :  { %v2727_v52 = vadd.f32 %v2668_v31, %v2524_v22  ;;  %v8125_v22 = vpop.permute.xlu1 %2979 }
 0x3f5   :  { %v8098_v5 = vpop.f32.mrf.mxu3  ;;  %v2868_v27 = vpop.f32.mrf.mxu1 }
 0x3f6   :  { %v2928_v21 = vadd.f32 %v2868_v27, %v2725_v0  ;;  %v2120_v0 = vadd.f32 %v7859_v2, %v1989_v60 }
 0x3f7   :  { %v8101_v17 = vpop.f32.mrf.mxu0 }
 0x3f8   :  { %v8107_v44 = vadd.f32 %v7850_v19, %v2928_v21  ;;  %v2323_v15 = vadd.f32 %v7964_v23, %v2120_v0  ;;  %v9316_v23 = vld [vmem:[#allocation66_spill] sm:$0xff] }
 0x3f9   :  { %v2107_v60 = vadd.f32 %v7918_v56, %v9316_v23 }
 0x3fa   :  { %3111 = vmatmul.f32.gmra.mxu1 %v8107_v44  ;;  %v2526_v50 = vadd.f32 %v8012_v34, %v2323_v15  ;;  %v9317_v15 = vld [vmem:[#allocation13_spill] sm:$0xff] }
 0x3fc   :  { %v2729_v21 = vadd.f32 %v2671_v40, %v2526_v50  ;;  %v8138_v40 = vpop.f32.mrf.mxu2  ;;  %v2109_v50 = vadd.f32 %v7938_v16, %v9317_v15 }
 0x3fd   :  { %v8112_v14 = vpop.f32.mrf.mxu3  ;;  %v2871_v3 = vpop.f32.mrf.mxu1 }
 0x3fe   :  { %v2930_v27 = vadd.f32 %v2871_v3, %v2727_v52  ;;  %v2310_v52 = vadd.f32 %v7901_v63, %v2107_v60  ;;  %v2312_v56 = vadd.f32 %v7924_v11, %v2109_v50 }
 0x3ff   :  { %v8115_v12 = vpop.f32.mrf.mxu0 }
 0x400   :  { %v8119_v26 = vadd.f32 %v7922_v6, %v2930_v27  ;;  %v2513_v3 = vadd.f32 %v8042_v13, %v2310_v52  ;;  %v2515_v23 = vadd.f32 %v8056_v37, %v2312_v56  ;;  %v2115_v56 = vadd.f32 %v7983_v45, %v7810_v41 }
 0x402   :  { %3114 = vmatmul.f32.gmra.mxu1 %v8119_v26  ;;  %v2718_v16 = vadd.f32 %v8045_v10, %v2515_v23 }
 0x404   :  { %v8148_v53 = vpop.f32.mrf.mxu2 }
 0x405   :  { %v8123_v31 = vpop.f32.mrf.mxu3  ;;  %v2874_v47 = vpop.f32.mrf.mxu1 }
 0x406   :  { %v2932_v57 = vadd.f32 %v2874_v47, %v2729_v21  ;;  %v2716_v21 = vadd.f32 %v8031_v55, %v2513_v3 }
 0x408   :  { %v8128_v2 = vadd.f32 %v8125_v22, %v2932_v57  ;;  %v8130_v9 = vpop.f32.mrf.mxu0 }
 0x40a   :  { %3117 = vmatmul.f32.gmra.mxu1 %v8128_v2 }
 0x40c   :  { %v3024_v50 = vpop.f32.mrf.mxu2 }
 0x40d   :  { %v8135_v34 = vpop.f32.mrf.mxu3 }
 0x410   :  { %v3056_v0 = vpop.f32.mrf.mxu0 }
 0x411   :  { %v8141_v27 = vadd.f32 %v3056_v0, %v3015_v58  ;;  %v9318_v58 = vld [vmem:[#allocation19_spill] sm:$0xff]  ;;  %v9319_v0 = vld [vmem:[#allocation22_spill] sm:$0xff] }
 0x412   :  { %v2111_v60 = vadd.f32 %v7951_v59, %v9318_v58  ;;  %v2113_v15 = vadd.f32 %v7967_v7, %v9319_v0 }
 0x414   :  { %v2314_v11 = vadd.f32 %v7942_v33, %v2111_v60  ;;  %v3027_v7 = vpop.f32.mrf.mxu2  ;;  %v9320_v60 = vld [vmem:[#allocation29_spill] sm:$0xff] }
 0x415   :  { %v2894_v47 = vpop.f32.mrf.mxu3 }
 0x416   :  { %v2919_v57 = vadd.f32 %v2894_v47, %v2716_v21  ;;  %v2517_v37 = vadd.f32 %v8070_v30, %v2314_v11  ;;  %v2316_v21 = vadd.f32 %v7958_v4, %v2113_v15 }
 0x418   :  { %v8151_v63 = vadd.f32 %v9290_v32, %v2919_v57  ;;  %v8153_v13 = vpop.f32.mrf.mxu0  ;;  %v2720_v59 = vadd.f32 %v8059_v1, %v2517_v37  ;;  %v2519_v47 = vadd.f32 %v8084_v54, %v2316_v21  ;;  %v2318_v1 = vadd.f32 %v7973_v8, %v2115_v56 }
 0x41a   :  { %3137 = vmatmul.f32.vlgmr.msra.gmra.mxu3 %v8151_v63  ;;  %v2722_v57 = vadd.f32 %v8073_v25, %v2519_v47  ;;  %v2521_v4 = vadd.f32 %v8098_v5, %v2318_v1 }
 0x41c   :  { %v2724_v41 = vadd.f32 %v8087_v62, %v2521_v4 }
 0x41d   :  { %v2897_v55 = vpop.f32.mrf.mxu3 }
 0x41e   :  { %v2921_v52 = vadd.f32 %v2897_v55, %v2718_v16  ;;  %v2117_v16 = vadd.f32 %v7998_v42, %v9320_v60  ;;  %v3030_v55 = vpop.f32.mrf.mxu2 }
 0x420   :  { %v8162_v3 = vadd.f32 %v9296_v46, %v2921_v52  ;;  %v8164_v32 = vpop.f32.mrf.mxu0  ;;  %v2320_v25 = vadd.f32 %v7989_v36, %v2117_v16  ;;  %v9321_v52 = vld [vmem:[#allocation30_spill] sm:$0xff] }
 0x421   :  { %v2119_v37 = vadd.f32 %v8010_v43, %v9321_v52 }
 0x422   :  { %3140 = vmatmul.f32.gmra.mxu3 %v8162_v3  ;;  %v2523_v8 = vadd.f32 %v8112_v14, %v2320_v25 }
 0x423   :  { %v2322_v62 = vadd.f32 %v8003_v20, %v2119_v37 }
 0x424   :  { %v2726_v42 = vadd.f32 %v8101_v17, %v2523_v8 }
 0x425   :  { %v2900_v10 = vpop.f32.mrf.mxu3  ;;  %v2525_v36 = vadd.f32 %v8123_v31, %v2322_v62 }
 0x426   :  { %v2923_v33 = vadd.f32 %v2900_v10, %v2720_v59  ;;  %v3033_v59 = vpop.f32.mrf.mxu2  ;;  %v9322_v10 = vld [vmem:[#allocation32_spill] sm:$0xff] }
 0x427   :  { %v2121_v21 = vadd.f32 %v8028_v29, %v9322_v10  ;;  %v2728_v43 = vadd.f32 %v8115_v12, %v2525_v36 }
 0x428   :  { %v8173_v30 = vadd.f32 %v9302_v49, %v2923_v33  ;;  %v3065_v46 = vpop.f32.mrf.mxu0 }
 0x429   :  { %v2324_v17 = vadd.f32 %v8016_v35, %v2121_v21 }
 0x42a   :  { %3143 = vmatmul.f32.gmra.mxu3 %v8173_v30 }
 0x42b   :  { %v2527_v20 = vadd.f32 %v8135_v34, %v2324_v17 }
 0x42d   :  { %v2903_v23 = vpop.f32.mrf.mxu3  ;;  %v2730_v12 = vadd.f32 %v8130_v9, %v2527_v20  ;;  %v8233_v9 = vadd.f32 %v8164_v32, %v8148_v53  ;;  %v8253_v53 = vld [vmem:[%s8945_s9 + $0x8] sm:$0xff]  ;;  %v8274_v32 = vld [vmem:[%s8945_s9 + $0x20] sm:$0xff] }
 0x42e   :  { %v2925_v58 = vadd.f32 %v2903_v23, %v2722_v57  ;;  %v3036_v56 = vpop.f32.mrf.mxu2 }
 0x430   :  { %v8182_v54 = vadd.f32 %v9308_v38, %v2925_v58  ;;  %v3068_v49 = vpop.f32.mrf.mxu0  ;;  %v8227_v58 = vadd.f32 %v3065_v46, %v3024_v50  ;;  %v8281_v50 = vld [vmem:[%s8945_s9 + $0x28] sm:$0xff]  ;;  %v8288_v46 = vld [vmem:[%s8945_s9 + $0x30] sm:$0xff] }
 0x431   :  { %v8221_v1 = vadd.f32 %v3068_v49, %v3027_v7  ;;  %v8238_v7 = vadd.f32 %v8153_v13, %v8138_v40  ;;  %v8260_v40 = vld [vmem:[%s8945_s9 + $0x10] sm:$0xff]  ;;  %v8267_v13 = vld [vmem:[%s8945_s9 + $0x18] sm:$0xff] }
 0x432   :  { %3146 = vmatmul.f32.gmra.mxu3 %v8182_v54  ;;  %v8295_v49 = vld [vmem:[%s8945_s9 + $0x38] sm:$0xff] }
 0x435   :  { %v2906_v45 = vpop.f32.mrf.mxu3 }
 0x436   :  { %v2927_v11 = vadd.f32 %v2906_v45, %v2724_v41 }
 0x438   :  { %v8191_v5 = vadd.f32 %v7792_v24, %v2927_v11  ;;  %v3071_v38 = vpop.f32.mrf.mxu0 }
 0x439   :  { %v8218_v23 = vadd.f32 %v3071_v38, %v3030_v55 }
 0x43a   :  { %3149 = vmatmul.f32.gmra.mxu3 %v8191_v5 }
 0x43d   :  { %v2909_v0 = vpop.f32.mrf.mxu3 }
 0x43e   :  { %v2929_v15 = vadd.f32 %v2909_v0, %v2726_v42 }
 0x440   :  { %v8200_v14 = vadd.f32 %v7850_v19, %v2929_v15  ;;  %v3074_v24 = vpop.f32.mrf.mxu0 }
 0x441   :  { %v8214_v29 = vadd.f32 %v3074_v24, %v3033_v59 }
 0x442   :  { %3152 = vmatmul.f32.gmra.mxu3 %v8200_v14 }
 0x445   :  { %v2912_v33 = vpop.f32.mrf.mxu3 }
 0x446   :  { %v2931_v47 = vadd.f32 %v2912_v33, %v2728_v43 }
 0x448   :  { %v8209_v31 = vadd.f32 %v7922_v6, %v2931_v47  ;;  %v3077_v19 = vpop.f32.mrf.mxu0 }
 0x449   :  { %v8211_v57 = vadd.f32 %v3077_v19, %v3036_v56 }
 0x44a   :  { %3155 = vmatmul.f32.gmra.mxu3 %v8209_v31 }
 0x44b   :  { %3202 = vmatpush.msra.mxu2 %v8211_v57 }
 0x44d   :  { %v2915_v35 = vpop.f32.mrf.mxu3  ;;  %3203 = vmatpush.msra.mxu2 %v8214_v29 }
 0x44e   :  { %v2933_v34 = vadd.f32 %v2915_v35, %v2730_v12 }
 0x44f   :  { %3204 = vmatpush.msra.mxu2 %v8218_v23  ;;  %v3097_v4 = vpop.f32.mrf.mxu1 }
 0x450   :  { %v8225_v6 = vadd.f32 %v8125_v22, %v2933_v34  ;;  %v8245_v22 = vld [vmem:[%s8945_s9] sm:$0xff] }
 0x451   :  { %3205 = vmatpush.msra.mxu2 %v8221_v1 }
 0x452   :  { %3158 = vmatmul.f32.gmra.mxu3 %v8225_v6 }
 0x453   :  { %3206 = vmatpush.msra.mxu2 %v8227_v58 }
 0x455   :  { %3207 = vmatpush.msra.mxu2 %v8233_v9 }
 0x457   :  { %3208 = vmatpush.msra.mxu2 %v8238_v7  ;;  %v3100_v60 = vpop.f32.mrf.mxu1 }
 0x459   :  { %3209 = vmatpush.msra.mxu2 %v8141_v27 }
 0x45a   :  { %4475 = vmatmul.msk.f32.vlgmr.msra.gmra.mxu2 %vm224_vm0, %v8245_v22 }
 0x45f   :  { %v3103_v45 = vpop.f32.mrf.mxu1 }
 0x462   :  { %4476 = vmatmul.msk.f32.gmra.mxu2 %vm224_vm0, %v8253_v53 }
 0x467   :  { %v3106_v55 = vpop.f32.mrf.mxu1 }
 0x46a   :  { %4477 = vmatmul.msk.f32.gmra.mxu2 %vm224_vm0, %v8260_v40 }
 0x46f   :  { %v3109_v38 = vpop.f32.mrf.mxu1 }
 0x472   :  { %4478 = vmatmul.msk.f32.gmra.mxu2 %vm224_vm0, %v8267_v13 }
 0x477   :  { %v3112_v37 = vpop.f32.mrf.mxu1 }
 0x47a   :  { %4479 = vmatmul.msk.f32.gmra.mxu2 %vm224_vm0, %v8274_v32 }
 0x47f   :  { %v3115_v0 = vpop.f32.mrf.mxu1 }
 0x482   :  { %4480 = vmatmul.msk.f32.gmra.mxu2 %vm224_vm0, %v8281_v50 }
 0x487   :  { %v3118_v15 = vpop.f32.mrf.mxu1 }
 0x48a   :  { %4481 = vmatmul.msk.f32.gmra.mxu2 %vm224_vm0, %v8288_v46 }
 0x492   :  { %4482 = vmatmul.msk.f32.gmra.mxu2 %vm224_vm0, %v8295_v49 }
 0x49d   :  { %v3138_v16 = vpop.f32.mrf.mxu3 }
 0x49e   :  { %v8299_v41 = vadd.f32 %v3138_v16, %v3097_v4 }
 0x4a5   :  { %v3141_v25 = vpop.f32.mrf.mxu3 }
 0x4a6   :  { %v8318_v47 = vadd.f32 %v3141_v25, %v3100_v60 }
 0x4ad   :  { %v3144_v11 = vpop.f32.mrf.mxu3 }
 0x4ae   :  { %v8315_v17 = vadd.f32 %v3144_v11, %v3103_v45 }
 0x4b5   :  { %v3147_v8 = vpop.f32.mrf.mxu3 }
 0x4b6   :  { %v8312_v33 = vadd.f32 %v3147_v8, %v3106_v55 }
 0x4bd   :  { %v3150_v52 = vpop.f32.mrf.mxu3 }
 0x4be   :  { %v8309_v21 = vadd.f32 %v3150_v52, %v3109_v38 }
 0x4c5   :  { %v3153_v42 = vpop.f32.mrf.mxu3 }
 0x4c6   :  { %v8306_v10 = vadd.f32 %v3153_v42, %v3112_v37 }
 0x4cd   :  { %v3156_v62 = vpop.f32.mrf.mxu3 }
 0x4ce   :  { %v8303_v24 = vadd.f32 %v3156_v62, %v3115_v0 }
 0x4d5   :  { %v3159_v36 = vpop.f32.mrf.mxu3 }
 0x4d6   :  { %v8301_v59 = vadd.f32 %v3159_v36, %v3118_v15 }
 0x4d8   :  { %3275 = vmatpush.msrb.mxu0 %v8301_v59 }
 0x4da   :  { %3276 = vmatpush.msrb.mxu0 %v8303_v24 }
 0x4dc   :  { %3277 = vmatpush.msrb.mxu0 %v8306_v10 }
 0x4dd   :  { %v3211_v43 = vpop.f32.mrf.mxu2 }
 0x4de   :  { %3278 = vmatpush.msrb.mxu0 %v8309_v21 }
 0x4e0   :  { %3279 = vmatpush.msrb.mxu0 %v8312_v33 }
 0x4e2   :  { %3280 = vmatpush.msrb.mxu0 %v8315_v17 }
 0x4e4   :  { %3281 = vmatpush.msrb.mxu0 %v8318_v47 }
 0x4e5   :  { %v3214_v20 = vpop.f32.mrf.mxu2 }
 0x4e6   :  { %3282 = vmatpush.msrb.mxu0 %v8299_v41  ;;  %v3236_v62 = vmul.f32 0.25, %v3214_v20 }
 0x4e7   :  { %4483 = vmatmul.msk.f32.vlgmr.msrb.gmra.mxu0 %vm224_vm0, %v8245_v22 }
 0x4ed   :  { %v3217_v56 = vpop.f32.mrf.mxu2 }
 0x4ee   :  { %v3237_v52 = vmul.f32 0.25, %v3217_v56 }
 0x4ef   :  { %4484 = vmatmul.msk.f32.gmra.mxu0 %vm224_vm0, %v8253_v53 }
 0x4f5   :  { %v3220_v19 = vpop.f32.mrf.mxu2 }
 0x4f6   :  { %v3238_v11 = vmul.f32 0.25, %v3220_v19 }
 0x4f7   :  { %4485 = vmatmul.msk.f32.gmra.mxu0 %vm224_vm0, %v8260_v40 }
 0x4f8   :  { %v3246_v15 = vsub.f32 %v8227_v58, %v3238_v11 }
 0x4fd   :  { %v3223_v12 = vpop.f32.mrf.mxu2 }
 0x4fe   :  { %v3239_v45 = vmul.f32 0.25, %v3223_v12  ;;  %v3245_v12 = vsub.f32 %v8233_v9, %v3237_v52 }
 0x4ff   :  { %4486 = vmatmul.msk.f32.gmra.mxu0 %vm224_vm0, %v8267_v13 }
 0x500   :  { %v3247_v37 = vsub.f32 %v8221_v1, %v3239_v45  ;;  %v3255_v56 = vmul.f32 1.442695, %v3245_v12 }
 0x505   :  { %v3226_v35 = vpop.f32.mrf.mxu2 }
 0x506   :  { %v3240_v60 = vmul.f32 0.25, %v3226_v35  ;;  %v3259_v35 = vmul.f32 1.442695, %v3247_v37 }
 0x507   :  { %4487 = vmatmul.msk.f32.gmra.mxu0 %vm224_vm0, %v8274_v32 }
 0x508   :  { %v3248_v8 = vsub.f32 %v8218_v23, %v3240_v60  ;;  %v3257_v23 = vmul.f32 1.442695, %v3246_v15 }
 0x50a   :  { %v3261_v36 = vmul.f32 1.442695, %v3248_v8 }
 0x50d   :  { %v3229_v34 = vpop.f32.mrf.mxu2 }
 0x50e   :  { %v3241_v4 = vmul.f32 0.25, %v3229_v34 }
 0x50f   :  { %4488 = vmatmul.msk.f32.gmra.mxu0 %vm224_vm0, %v8281_v50 }
 0x510   :  { %v3249_v25 = vsub.f32 %v8214_v29, %v3241_v4  ;;  %v3235_v29 = vmul.f32 0.25, %v3211_v43 }
 0x512   :  { %v3263_v42 = vmul.f32 1.442695, %v3249_v25  ;;  %v3243_v20 = vsub.f32 %v8141_v27, %v3235_v29 }
 0x514   :  { %v3251_v19 = vmul.f32 1.442695, %v3243_v20 }
 0x515   :  { %v3232_v16 = vpop.f32.mrf.mxu2 }
 0x516   :  { %v3242_v55 = vmul.f32 0.25, %v3232_v16 }
 0x517   :  { %4489 = vmatmul.msk.f32.gmra.mxu0 %vm224_vm0, %v8288_v46 }
 0x518   :  { %v3250_v38 = vsub.f32 %v8211_v57, %v3242_v55  ;;  %v3244_v57 = vsub.f32 %v8238_v7, %v3236_v62 }
 0x51a   :  { %v3265_v0 = vmul.f32 1.442695, %v3250_v38  ;;  %v3253_v9 = vmul.f32 1.442695, %v3244_v57 }
 0x51c   :  { %4612 = vpow2.f32 %v3265_v0 }
 0x51d   :  { %4614 = vpow2.f32 %v3263_v42 }
 0x51e   :  { %4616 = vpow2.f32 %v3261_v36 }
 0x51f   :  { %4490 = vmatmul.msk.f32.gmra.mxu0 %vm224_vm0, %v8295_v49  ;;  %4618 = vpow2.f32 %v3259_v35 }
 0x520   :  { %4620 = vpow2.f32 %v3257_v23 }
 0x521   :  { %4622 = vpow2.f32 %v3255_v56 }
 0x522   :  { %v8346_v1 = vpop.eup %4612  ;;  %4624 = vpow2.f32 %v3253_v9 }
 0x523   :  { %3348 = vmatpush.msrb.mxu1 %v8346_v1  ;;  %v8350_v58 = vpop.eup %4614  ;;  %4626 = vpow2.f32 %v3251_v19 }
 0x524   :  { %v8353_v43 = vpop.eup %4616 }
 0x525   :  { %3349 = vmatpush.msrb.mxu1 %v8350_v58  ;;  %v8356_v7 = vpop.eup %4618 }
 0x526   :  { %v8359_v27 = vpop.eup %4620 }
 0x527   :  { %3350 = vmatpush.msrb.mxu1 %v8353_v43  ;;  %v8362_v34 = vpop.eup %4622 }
 0x528   :  { %v8365_v4 = vpop.eup %4624 }
 0x529   :  { %3351 = vmatpush.msrb.mxu1 %v8356_v7  ;;  %v8368_v60 = vpop.eup %4626 }
 0x52b   :  { %3352 = vmatpush.msrb.mxu1 %v8359_v27 }
 0x52d   :  { %3353 = vmatpush.msrb.mxu1 %v8362_v34 }
 0x52f   :  { %3354 = vmatpush.msrb.mxu1 %v8365_v4 }
 0x531   :  { %3355 = vmatpush.msrb.mxu1 %v8368_v60 }
 0x532   :  { %4491 = vmatmul.msk.f32.vlgmr.msrb.gmra.mxu1 %vm224_vm0, %v8245_v22 }
 0x53a   :  { %4492 = vmatmul.msk.f32.gmra.mxu1 %vm224_vm0, %v8253_v53 }
 0x542   :  { %4493 = vmatmul.msk.f32.gmra.mxu1 %vm224_vm0, %v8260_v40 }
 0x54a   :  { %4494 = vmatmul.msk.f32.gmra.mxu1 %vm224_vm0, %v8267_v13 }
 0x552   :  { %4495 = vmatmul.msk.f32.gmra.mxu1 %vm224_vm0, %v8274_v32 }
 0x55a   :  { %4496 = vmatmul.msk.f32.gmra.mxu1 %vm224_vm0, %v8281_v50 }
 0x562   :  { %4497 = vmatmul.msk.f32.gmra.mxu1 %vm224_vm0, %v8288_v46 }
 0x564   :  { %v3284_v16 = vpop.f32.mrf.mxu0 }
 0x56a   :  { %4498 = vmatmul.msk.f32.gmra.mxu1 %vm224_vm0, %v8295_v49 }
 0x56c   :  { %v3287_v45 = vpop.f32.mrf.mxu0 }
 0x56d   :  { %v3309_v56 = vmul.f32 0.25, %v3287_v45 }
 0x574   :  { %v3290_v25 = vpop.f32.mrf.mxu0 }
 0x575   :  { %v3310_v35 = vmul.f32 0.25, %v3290_v25 }
 0x57c   :  { %v3293_v55 = vpop.f32.mrf.mxu0 }
 0x57d   :  { %v3311_v36 = vmul.f32 0.25, %v3293_v55  ;;  %v3317_v55 = vsub.f32 %v8318_v47, %v3309_v56 }
 0x57f   :  { %v3319_v9 = vsub.f32 %v8312_v33, %v3311_v36  ;;  %v3326_v45 = vmul.f32 1.442695, %v3317_v55 }
 0x584   :  { %v3296_v11 = vpop.f32.mrf.mxu0 }
 0x585   :  { %v3312_v0 = vmul.f32 0.25, %v3296_v11  ;;  %v3318_v11 = vsub.f32 %v8315_v17, %v3310_v35 }
 0x587   :  { %v3320_v57 = vsub.f32 %v8309_v21, %v3312_v0  ;;  %v3328_v25 = vmul.f32 1.442695, %v3318_v11 }
 0x58c   :  { %v3299_v8 = vpop.f32.mrf.mxu0 }
 0x58d   :  { %v3313_v37 = vmul.f32 0.25, %v3299_v8  ;;  %v3308_v8 = vmul.f32 0.25, %v3284_v16 }
 0x58f   :  { %v3321_v29 = vsub.f32 %v8306_v10, %v3313_v37  ;;  %v3330_v10 = vmul.f32 1.442695, %v3319_v9  ;;  %v3316_v21 = vsub.f32 %v8299_v41, %v3308_v8 }
 0x591   :  { %v3334_v19 = vmul.f32 1.442695, %v3321_v29  ;;  %v3324_v16 = vmul.f32 1.442695, %v3316_v21 }
 0x594   :  { %v3302_v38 = vpop.f32.mrf.mxu0 }
 0x595   :  { %v3314_v52 = vmul.f32 0.25, %v3302_v38 }
 0x597   :  { %v3322_v62 = vsub.f32 %v8303_v24, %v3314_v52  ;;  %v3332_v24 = vmul.f32 1.442695, %v3320_v57 }
 0x599   :  { %v3336_v23 = vmul.f32 1.442695, %v3322_v62 }
 0x59c   :  { %v3305_v42 = vpop.f32.mrf.mxu0 }
 0x59d   :  { %v3315_v15 = vmul.f32 0.25, %v3305_v42 }
 0x59f   :  { %v3323_v12 = vsub.f32 %v8301_v59, %v3315_v15 }
 0x5a1   :  { %v3338_v20 = vmul.f32 1.442695, %v3323_v12 }
 0x5a3   :  { %4628 = vpow2.f32 %v3338_v20 }
 0x5a4   :  { %4630 = vpow2.f32 %v3336_v23 }
 0x5a5   :  { %4632 = vpow2.f32 %v3334_v19 }
 0x5a6   :  { %4634 = vpow2.f32 %v3332_v24 }
 0x5a7   :  { %4636 = vpow2.f32 %v3330_v10 }
 0x5a8   :  { %4638 = vpow2.f32 %v3328_v25 }
 0x5a9   :  { %v8394_v59 = vpop.eup %4628  ;;  %4640 = vpow2.f32 %v3326_v45 }
 0x5aa   :  { %3509 = vmatpush.msrb.mxu3 %v8394_v59  ;;  %v8398_v33 = vpop.eup %4630  ;;  %4642 = vpow2.f32 %v3324_v16 }
 0x5ab   :  { %v8401_v17 = vpop.eup %4632 }
 0x5ac   :  { %3510 = vmatpush.msrb.mxu3 %v8398_v33  ;;  %v8404_v47 = vpop.eup %4634 }
 0x5ad   :  { %v8409_v38 = vpop.eup %4636 }
 0x5ae   :  { %3511 = vmatpush.msrb.mxu3 %v8401_v17  ;;  %v8412_v52 = vpop.eup %4638 }
 0x5af   :  { %v8406_v41 = vpop.f32.mrf.mxu1  ;;  %v8415_v37 = vpop.eup %4640 }
 0x5b0   :  { %3512 = vmatpush.msrb.mxu3 %v8404_v47  ;;  %v8418_v42 = vpop.eup %4642 }
 0x5b2   :  { %3513 = vmatpush.msrb.mxu3 %v8409_v38 }
 0x5b4   :  { %3514 = vmatpush.msrb.mxu3 %v8412_v52 }
 0x5b6   :  { %3515 = vmatpush.msrb.mxu3 %v8415_v37 }
 0x5b7   :  { %v8420_v0 = vpop.f32.mrf.mxu1 }
 0x5b8   :  { %3516 = vmatpush.msrb.mxu3 %v8418_v42 }
 0x5b9   :  { %4499 = vmatmul.msk.f32.vlgmr.msrb.gmra.mxu3 %vm224_vm0, %v8245_v22 }
 0x5bf   :  { %v8425_v62 = vpop.f32.mrf.mxu1 }
 0x5c1   :  { %4500 = vmatmul.msk.f32.gmra.mxu3 %vm224_vm0, %v8253_v53 }
 0x5c7   :  { %v3366_v15 = vpop.f32.mrf.mxu1 }
 0x5c8   :  { %4644 = vrcp.f32 %v3366_v15  ;;  %vm3431_vm4 = vweird.f32 %v3366_v15  ;;  %v3437_v57 = vand.u32 2147483648, %v3366_v15  ;;  %v3435_v22 = vand.u32 2147483647, %v3366_v15 }
 0x5c9   :  { %4501 = vmatmul.msk.f32.gmra.mxu3 %vm224_vm0, %v8260_v40 }
 0x5ca   :  { %v3438_v20 = vor.u32 1.1754944e-38, %v3437_v57  ;;  %vm3436_vm10 = vcmp.eq.f32.partialorder %v3435_v22, 8.507059e+37 }
 0x5ce   :  { %v4645_v36 = vpop.eup %4644 }
 0x5cf   :  { %v3427_v29 = vmul.f32 %v4645_v36, %v3366_v15  ;;  %v3369_v12 = vpop.f32.mrf.mxu1  ;;  %vm3432_vm6 = vweird.f32 %v4645_v36 }
 0x5d0   :  { %4646 = vrcp.f32 %v3369_v12  ;;  %vm3433_vm7 = vmor %vm3431_vm4, %vm3432_vm6  ;;  %vm3446_vm11 = vweird.f32 %v3369_v12  ;;  %v3452_v11 = vand.u32 2147483648, %v3369_v12 }
 0x5d1   :  { %v3428_v35 = vsub.f32 1.0, %v3427_v29  ;;  %4502 = vmatmul.msk.f32.gmra.mxu3 %vm224_vm0, %v8267_v13  ;;  %v3450_v13 = vand.u32 2147483647, %v3369_v12 }
 0x5d2   :  { %v3453_v45 = vor.u32 1.1754944e-38, %v3452_v11 }
 0x5d3   :  { %v3429_v23 = vmul.f32 %v4645_v36, %v3428_v35  ;;  %vm3451_vm2 = vcmp.eq.f32.partialorder %v3450_v13, 8.507059e+37 }
 0x5d5   :  { %v3430_v53 = vadd.f32 %v4645_v36, %v3429_v23 }
 0x5d6   :  { %v4647_v56 = vpop.eup %4646 }
 0x5d7   :  { %v3442_v9 = vmul.f32 %v4647_v56, %v3369_v12  ;;  %v3372_v40 = vpop.f32.mrf.mxu1  ;;  %v3434_v19 = vsel %vm3433_vm7, %v4645_v36, %v3430_v53  ;;  %vm3447_vm14 = vweird.f32 %v4647_v56 }
 0x5d8   :  { %4648 = vrcp.f32 %v3372_v40  ;;  %v3439_v24 = vsel %vm3436_vm10, %v3438_v20, %v3434_v19  ;;  %vm8436_vm1 = vmor %vm3446_vm11, %vm3447_vm14  ;;  %vm3461_vm5 = vweird.f32 %v3372_v40  ;;  %v3465_v35 = vand.u32 2147483647, %v3372_v40 }
 0x5d9   :  { %v3443_v8 = vsub.f32 1.0, %v3442_v9  ;;  %4503 = vmatmul.msk.f32.gmra.mxu3 %vm224_vm0, %v8274_v32  ;;  %v3440_v55 = vmul.f32 %v8359_v27, %v3439_v24  ;;  %v3467_v27 = vand.u32 2147483648, %v3372_v40 }
 0x5da   :  { %vm3466_vm12 = vcmp.eq.f32.partialorder %v3465_v35, 8.507059e+37 }
 0x5db   :  { %v3444_v10 = vmul.f32 %v4647_v56, %v3443_v8  ;;  %3679 = vperm.xlu1 %4562, %v3440_v55   ;;  %v3468_v20 = vor.u32 1.1754944e-38, %v3467_v27 }
 0x5dd   :  { %v3445_v25 = vadd.f32 %v4647_v56, %v3444_v10 }
 0x5de   :  { %v4649_v16 = vpop.eup %4648 }
 0x5df   :  { %v3457_v15 = vmul.f32 %v4649_v16, %v3372_v40  ;;  %v3375_v36 = vpop.f32.mrf.mxu1  ;;  %v3449_v29 = vsel %vm8436_vm1, %v4647_v56, %v3445_v25  ;;  %vm3462_vm9 = vweird.f32 %v4649_v16 }
 0x5e0   :  { %4650 = vrcp.f32 %v3375_v36  ;;  %v3454_v12 = vsel %vm3451_vm2, %v3453_v45, %v3449_v29  ;;  %vm8445_vm8 = vmor %vm3461_vm5, %vm3462_vm9  ;;  %vm3476_vm13 = vweird.f32 %v3375_v36 }
 0x5e1   :  { %v3458_v32 = vsub.f32 1.0, %v3457_v15  ;;  %4504 = vmatmul.msk.f32.gmra.mxu3 %vm224_vm0, %v8281_v50  ;;  %v3455_v57 = vmul.f32 %v8356_v7, %v3454_v12  ;;  %v3482_v50 = vand.u32 2147483648, %v3375_v36  ;;  %v3480_v7 = vand.u32 2147483647, %v3375_v36 }
 0x5e3   :  { %v3459_v22 = vmul.f32 %v4649_v16, %v3458_v32  ;;  %3684 = vperm.xlu2 %4563, %v3455_v57   ;;  %v3483_v55 = vor.u32 1.1754944e-38, %v3482_v50  ;;  %vm3481_vm4 = vcmp.eq.f32.partialorder %v3480_v7, 8.507059e+37 }
 0x5e5   :  { %v3460_v53 = vadd.f32 %v4649_v16, %v3459_v22 }
 0x5e6   :  { %v4651_v56 = vpop.eup %4650 }
 0x5e7   :  { %v3472_v9 = vmul.f32 %v4651_v56, %v3375_v36  ;;  %v3378_v19 = vpop.f32.mrf.mxu1  ;;  %v3464_v8 = vsel %vm8445_vm8, %v4649_v16, %v3460_v53  ;;  %vm3477_vm15 = vweird.f32 %v4651_v56 }
 0x5e8   :  { %4652 = vrcp.f32 %v3378_v19  ;;  %v3469_v11 = vsel %vm3466_vm12, %v3468_v20, %v3464_v8  ;;  %vm3478_vm3 = vmor %vm3476_vm13, %vm3477_vm15  ;;  %vm3491_vm6 = vweird.f32 %v3378_v19  ;;  %v3497_v16 = vand.u32 2147483648, %v3378_v19 }
 0x5e9   :  { %v3473_v40 = vsub.f32 1.0, %v3472_v9  ;;  %4505 = vmatmul.msk.f32.gmra.mxu3 %vm224_vm0, %v8288_v46  ;;  %v3470_v24 = vmul.f32 %v8353_v43, %v3469_v11  ;;  %v3495_v36 = vand.u32 2147483647, %v3378_v19  ;;  %vm3386_vm15 = vweird.f32 %v8406_v41 }
 0x5ea   :  { %v3498_v32 = vor.u32 1.1754944e-38, %v3497_v16 }
 0x5eb   :  { %v3474_v13 = vmul.f32 %v4651_v56, %v3473_v40  ;;  %3689 = vperm.xlu0 %4561, %v3470_v24   ;;  %vm3496_vm11 = vcmp.eq.f32.partialorder %v3495_v36, 8.507059e+37 }
 0x5ed   :  { %v3475_v10 = vadd.f32 %v4651_v56, %v3474_v13 }
 0x5ee   :  { %v4653_v21 = vpop.eup %4652 }
 0x5ef   :  { %v3487_v25 = vmul.f32 %v4653_v21, %v3378_v19  ;;  %v3479_v45 = vsel %vm3478_vm3, %v4651_v56, %v3475_v10  ;;  %vm3492_vm7 = vweird.f32 %v4653_v21 }
 0x5f0   :  { %v3484_v15 = vsel %vm3481_vm4, %v3483_v55, %v3479_v45  ;;  %vm3493_vm10 = vmor %vm3491_vm6, %vm3492_vm7  ;;  %vm3401_vm6 = vweird.f32 %v8420_v0 }
 0x5f1   :  { %v3488_v29 = vsub.f32 1.0, %v3487_v25  ;;  %4506 = vmatmul.msk.f32.gmra.mxu3 %vm224_vm0, %v8295_v49  ;;  %v3485_v46 = vmul.f32 %v8350_v58, %v3484_v15 }
 0x5f3   :  { %v3489_v43 = vmul.f32 %v4653_v21, %v3488_v29  ;;  %3694 = vperm.xlu1 %4562, %v3485_v46  }
 0x5f5   :  { %v3490_v27 = vadd.f32 %v4653_v21, %v3489_v43 }
 0x5f7   :  { %v3494_v12 = vsel %vm3493_vm10, %v4653_v21, %v3490_v27 }
 0x5f8   :  { %v3499_v35 = vsel %vm3496_vm11, %v3498_v32, %v3494_v12 }
 0x5f9   :  { %v3500_v57 = vmul.f32 %v8346_v1, %v3499_v35 }
 0x5fb   :  { %3699 = vperm.xlu2 %4563, %v3500_v57  }
 0x63c   :  { %v8458_v22 = vpop.f32.mrf.mxu3 }
 0x644   :  { %v8460_v23 = vpop.f32.mrf.mxu3 }
 0x64c   :  { %v8462_v53 = vpop.f32.mrf.mxu3 }
 0x654   :  { %v3527_v49 = vpop.f32.mrf.mxu3 }
 0x655   :  { %4654 = vrcp.f32 %v3527_v49  ;;  %v3598_v8 = vand.u32 2147483648, %v3527_v49  ;;  %v3596_v1 = vand.u32 2147483647, %v3527_v49  ;;  %vm3592_vm1 = vweird.f32 %v3527_v49 }
 0x657   :  { %v3599_v7 = vor.u32 1.1754944e-38, %v3598_v8  ;;  %vm3597_vm5 = vcmp.eq.f32.partialorder %v3596_v1, 8.507059e+37 }
 0x65b   :  { %v4655_v58 = vpop.eup %4654 }
 0x65c   :  { %v3588_v20 = vmul.f32 %v4655_v58, %v3527_v49  ;;  %v3530_v56 = vpop.f32.mrf.mxu3  ;;  %vm3593_vm14 = vweird.f32 %v4655_v58 }
 0x65d   :  { %4656 = vrcp.f32 %v3530_v56  ;;  %vm3594_vm2 = vmor %vm3592_vm1, %vm3593_vm14  ;;  %v3613_v29 = vand.u32 2147483648, %v3530_v56  ;;  %v3611_v46 = vand.u32 2147483647, %v3530_v56  ;;  %vm3607_vm8 = vweird.f32 %v3530_v56 }
 0x65e   :  { %v3589_v9 = vsub.f32 1.0, %v3588_v20  ;;  %4658 = vrcp.f32 %v8462_v53 }
 0x65f   :  { %4660 = vrcp.f32 %v8406_v41  ;;  %v3614_v12 = vor.u32 1.1754944e-38, %v3613_v29  ;;  %vm3612_vm13 = vcmp.eq.f32.partialorder %v3611_v46, 8.507059e+37 }
 0x660   :  { %v3590_v19 = vmul.f32 %v4655_v58, %v3589_v9  ;;  %4662 = vrcp.f32 %v8420_v0 }
 0x662   :  { %v3591_v50 = vadd.f32 %v4655_v58, %v3590_v19 }
 0x663   :  { %v4657_v40 = vpop.eup %4656 }
 0x664   :  { %v3603_v11 = vmul.f32 %v4657_v40, %v3530_v56  ;;  %v8467_v24 = vpop.f32.mrf.mxu3  ;;  %v3595_v13 = vsel %vm3594_vm2, %v4655_v58, %v3591_v50  ;;  %v8470_v55 = vpop.eup %4658  ;;  %vm3608_vm9 = vweird.f32 %v4657_v40  ;;  %vm3577_vm2 = vweird.f32 %v8462_v53 }
 0x665   :  { %4664 = vrcp.f32 %v8467_v24  ;;  %v3600_v21 = vsel %vm3597_vm5, %v3599_v7, %v3595_v13  ;;  %v8472_v25 = vpop.eup %4660  ;;  %v3573_v36 = vmul.f32 %v8470_v55, %v8462_v53  ;;  %vm3609_vm12 = vmor %vm3607_vm8, %vm3608_vm9  ;;  %v3628_v7 = vand.u32 2147483648, %v8467_v24 }
 0x666   :  { %v3604_v10 = vsub.f32 1.0, %v3603_v11  ;;  %v3601_v45 = vmul.f32 %v8409_v38, %v3600_v21  ;;  %v8475_v16 = vpop.eup %4662  ;;  %4666 = vrcp.f32 %v8425_v62  ;;  %v3382_v27 = vmul.f32 %v8472_v25, %v8406_v41 }
 0x667   :  { %v3397_v38 = vmul.f32 %v8475_v16, %v8420_v0  ;;  %4668 = vrcp.f32 %v8458_v22  ;;  %v3574_v58 = vsub.f32 1.0, %v3573_v36  ;;  %v3392_v13 = vand.u32 2147483648, %v8406_v41 }
 0x668   :  { %v3605_v15 = vmul.f32 %v4657_v40, %v3604_v10  ;;  %3735 = vperm.xlu2 %4563, %v3601_v45   ;;  %v3383_v9 = vsub.f32 1.0, %v3382_v27  ;;  %v3626_v21 = vand.u32 2147483647, %v8467_v24  ;;  %vm3387_vm4 = vweird.f32 %v8472_v25 }
 0x669   :  { %v3398_v19 = vsub.f32 1.0, %v3397_v38  ;;  %v3575_v10 = vmul.f32 %v8470_v55, %v3574_v58  ;;  %vm3622_vm7 = vweird.f32 %v8467_v24  ;;  %vm3402_vm10 = vweird.f32 %v8475_v16 }
 0x66a   :  { %v3606_v43 = vadd.f32 %v4657_v40, %v3605_v15  ;;  %v3384_v15 = vmul.f32 %v8472_v25, %v3383_v9  ;;  %vm3578_vm14 = vweird.f32 %v8470_v55  ;;  %vm3627_vm1 = vcmp.eq.f32.partialorder %v3626_v21, 8.507059e+37 }
 0x66b   :  { %v4665_v32 = vpop.eup %4664  ;;  %v3399_v29 = vmul.f32 %v8475_v16, %v3398_v19  ;;  %vm8527_vm9 = vmor %vm3577_vm2, %vm3578_vm14  ;;  %v3553_v9 = vand.u32 2147483648, %v8458_v22 }
 0x66c   :  { %v3618_v35 = vmul.f32 %v4665_v32, %v8467_v24  ;;  %v8486_v57 = vpop.f32.mrf.mxu3  ;;  %v3610_v49 = vsel %vm3609_vm12, %v4657_v40, %v3606_v43  ;;  %v8490_v1 = vpop.eup %4666  ;;  %vm3623_vm3 = vweird.f32 %v4665_v32  ;;  %v3390_v40 = vand.u32 2147483647, %v8406_v41  ;;  %vm8537_vm12 = vmor %vm3386_vm15, %vm3387_vm4 }
 0x66d   :  { %4670 = vrcp.f32 %v8486_v57  ;;  %v3615_v56 = vsel %vm3612_vm13, %v3614_v12, %v3610_v49  ;;  %v8494_v11 = vpop.eup %4668  ;;  %v3412_v36 = vmul.f32 %v8490_v1, %v8425_v62  ;;  %vm3624_vm11 = vmor %vm3622_vm7, %vm3623_vm3  ;;  %v3629_v43 = vor.u32 1.1754944e-38, %v3628_v7 }
 0x66e   :  { %v3619_v20 = vsub.f32 1.0, %v3618_v35  ;;  %v3616_v8 = vmul.f32 %v8404_v47, %v3615_v56  ;;  %v3543_v46 = vmul.f32 %v8494_v11, %v8458_v22  ;;  %v3576_v12 = vadd.f32 %v8470_v55, %v3575_v10  ;;  %vm8551_vm13 = vmor %vm3401_vm6, %vm3402_vm10 }
 0x66f   :  { %v3583_v35 = vand.u32 2147483648, %v8462_v53  ;;  %v3643_v56 = vand.u32 2147483648, %v8486_v57  ;;  %vm8523_vm5 = vcmp.eq.f32.partialorder %v3390_v40, 8.507059e+37  ;;  %v3385_v7 = vadd.f32 %v8472_v25, %v3384_v15 }
 0x670   :  { %v3620_v50 = vmul.f32 %v4665_v32, %v3619_v20  ;;  %3740 = vperm.xlu0 %4561, %v3616_v8   ;;  %v3581_v20 = vand.u32 2147483647, %v8462_v53  ;;  %v3405_v53 = vand.u32 2147483647, %v8420_v0  ;;  %v3407_v40 = vand.u32 2147483648, %v8420_v0 }
 0x671   :  { %v3580_v10 = vsel %vm8527_vm9, %v8470_v55, %v3576_v12  ;;  %v3400_v21 = vadd.f32 %v8475_v16, %v3399_v29  ;;  %vm3637_vm15 = vweird.f32 %v8486_v57  ;;  %v3644_v55 = vor.u32 1.1754944e-38, %v3643_v56 }
 0x672   :  { %v3621_v47 = vadd.f32 %v4665_v32, %v3620_v50  ;;  %v3641_v50 = vand.u32 2147483647, %v8486_v57  ;;  %vm3582_vm3 = vcmp.eq.f32.partialorder %v3581_v20, 8.507059e+37  ;;  %vm8560_vm6 = vcmp.eq.f32.partialorder %v3405_v53, 8.507059e+37 }
 0x673   :  { %v4671_v45 = vpop.eup %4670  ;;  %v3389_v20 = vsel %vm8537_vm12, %v8472_v25, %v3385_v7  ;;  %v3404_v56 = vsel %vm8551_vm13, %v8475_v16, %v3400_v21  ;;  %v3420_v25 = vand.u32 2147483647, %v8425_v62  ;;  %v3422_v16 = vand.u32 2147483648, %v8425_v62 }
 0x674   :  { %v3633_v27 = vmul.f32 %v4671_v45, %v8486_v57  ;;  %v8512_v38 = vpop.f32.mrf.mxu3  ;;  %v3625_v24 = vsel %vm3624_vm11, %v4665_v32, %v3621_v47  ;;  %vm3638_vm8 = vweird.f32 %v4671_v45  ;;  %v3584_v47 = vor.u32 1.1754944e-38, %v3583_v35 }
 0x675   :  { %4672 = vrcp.f32 %v8512_v38  ;;  %v3630_v58 = vsel %vm3627_vm1, %v3629_v43, %v3625_v24  ;;  %v3544_v24 = vsub.f32 1.0, %v3543_v46  ;;  %vm3639_vm4 = vmor %vm3637_vm15, %vm3638_vm8  ;;  %vm3642_vm7 = vcmp.eq.f32.partialorder %v3641_v50, 8.507059e+37 }
 0x676   :  { %4674 = vrcp.f32 %v8460_v23  ;;  %v3634_v49 = vsub.f32 1.0, %v3633_v27  ;;  %v3631_v32 = vmul.f32 %v8401_v17, %v3630_v58  ;;  %v3413_v27 = vsub.f32 1.0, %v3412_v36 }
 0x677   :  { %v3585_v12 = vsel %vm3582_vm3, %v3584_v47, %v3580_v10  ;;  %v3393_v58 = vor.u32 1.1754944e-38, %v3392_v13  ;;  %v3408_v57 = vor.u32 1.1754944e-38, %v3407_v40  ;;  %v3545_v13 = vmul.f32 %v8494_v11, %v3544_v24 }
 0x678   :  { %v3635_v8 = vmul.f32 %v4671_v45, %v3634_v49  ;;  %3745 = vperm.xlu1 %4562, %v3631_v32   ;;  %v3658_v19 = vand.u32 2147483648, %v8512_v38  ;;  %v3656_v17 = vand.u32 2147483647, %v8512_v38  ;;  %vm3416_vm11 = vweird.f32 %v8425_v62 }
 0x679   :  { %vm3417_vm14 = vweird.f32 %v8490_v1  ;;  %vm3652_vm1 = vweird.f32 %v8512_v38  ;;  %vm3548_vm2 = vweird.f32 %v8494_v11  ;;  %v3409_v10 = vsel %vm8560_vm6, %v3408_v57, %v3404_v56  ;;  %v3680_v56 = vpop.permute.xlu1 %3679 }
 0x67a   :  { %v3636_v15 = vadd.f32 %v4671_v45, %v3635_v8  ;;  %v3586_v8 = vmul.f32 %v8412_v52, %v3585_v12  ;;  %v3394_v52 = vsel %vm8523_vm5, %v3393_v58, %v3389_v20  ;;  %v3659_v40 = vor.u32 1.1754944e-38, %v3658_v19  ;;  %vm8592_vm12 = vmor %vm3416_vm11, %vm3417_vm14  ;;  %v3685_v20 = vpop.permute.xlu2 %3684 }
 0x67b   :  { %v4673_v43 = vpop.eup %4672  ;;  %v3546_v21 = vadd.f32 %v8494_v11, %v3545_v13  ;;  %vm3657_vm8 = vcmp.eq.f32.partialorder %v3656_v17, 8.507059e+37  ;;  %vm3547_vm5 = vweird.f32 %v8458_v22  ;;  %v3410_v24 = vmul.f32 %v8365_v4, %v3409_v10  ;;  %v3690_v13 = vpop.permute.xlu0 %3689  ;;  %v9339_v17 = vld [vmem:[#allocation35_spill] sm:$0xff] }
 0x67c   :  { %v8557_v29 = vpop.eup %4674  ;;  %v3648_v0 = vmul.f32 %v4673_v43, %v8512_v38  ;;  %v3640_v49 = vsel %vm3639_vm4, %v4671_v45, %v3636_v15  ;;  %v3414_v45 = vmul.f32 %v8490_v1, %v3413_v27  ;;  %vm3653_vm10 = vweird.f32 %v4673_v43  ;;  %vm3549_vm13 = vmor %vm3547_vm5, %vm3548_vm2  ;;  %v9341_v38 = vld [vmem:[#allocation31_spill] sm:$0xff] }
 0x67d   :  { %v3645_v32 = vsel %vm3642_vm7, %v3644_v55, %v3640_v49  ;;  %v3558_v50 = vmul.f32 %v8557_v29, %v8460_v23  ;;  %vm3654_vm9 = vmor %vm3652_vm1, %vm3653_vm10  ;;  %v3551_v27 = vand.u32 2147483647, %v8458_v22  ;;  %v3395_v62 = vmul.f32 %v8368_v60, %v3394_v52 }
 0x67e   :  { %v3649_v36 = vsub.f32 1.0, %v3648_v0  ;;  %v3646_v46 = vmul.f32 %v8398_v33, %v3645_v32  ;;  %v3415_v53 = vadd.f32 %v8490_v1, %v3414_v45  ;;  %v3423_v0 = vor.u32 1.1754944e-38, %v3422_v16 }
 0x67f   :  { %v3559_v41 = vsub.f32 1.0, %v3558_v50  ;;  %vm3421_vm15 = vcmp.eq.f32.partialorder %v3420_v25, 8.507059e+37  ;;  %v3550_v12 = vsel %vm3549_vm13, %v8494_v11, %v3546_v21  ;;  %v3554_v4 = vor.u32 1.1754944e-38, %v3553_v9 }
 0x680   :  { %v3650_v33 = vmul.f32 %v4673_v43, %v3649_v36  ;;  %3750 = vperm.xlu2 %4563, %v3646_v46   ;;  %3730 = vperm.xlu1 %4562, %v3586_v8   ;;  %v3419_v22 = vsel %vm8592_vm12, %v8490_v1, %v3415_v53  ;;  %vm3552_vm3 = vcmp.eq.f32.partialorder %v3551_v27, 8.507059e+37  ;;  %vm3563_vm4 = vweird.f32 %v8557_v29 }
 0x681   :  { %v3424_v49 = vsel %vm3421_vm15, %v3423_v0, %v3419_v22  ;;  %v3568_v60 = vand.u32 2147483648, %v8460_v23  ;;  %vm3562_vm7 = vweird.f32 %v8460_v23  ;;  %v3566_v35 = vand.u32 2147483647, %v8460_v23  ;;  %v3695_v23 = vpop.permute.xlu1 %3694  ;;  %v9344_v0 = vld [vmem:[#allocation18_spill] sm:$0xff] }
 0x682   :  { %v3651_v7 = vadd.f32 %v4673_v43, %v3650_v33  ;;  %v3425_v57 = vmul.f32 %v8362_v34, %v3424_v49  ;;  %vm3564_vm6 = vmor %vm3562_vm7, %vm3563_vm4  ;;  %v3700_v45 = vpop.permute.xlu2 %3699  ;;  %v3714_v52 = vmul.f32 %v3695_v23, %v8119_v26  ;;  %v3715_v53 = vmul.f32 %v3695_v23, %v8209_v31  ;;  %v9345_v49 = vld [vmem:[#allocation75_spill] sm:$0xff] }
 0x683   :  { %v3569_v32 = vor.u32 1.1754944e-38, %v3568_v60  ;;  %vm3567_vm10 = vcmp.eq.f32.partialorder %v3566_v35, 8.507059e+37  ;;  %v3716_v50 = vmul.f32 %v3700_v45, %v8128_v2  ;;  %v3717_v33 = vmul.f32 %v3700_v45, %v8225_v6  ;;  %v9346_v35 = vld [vmem:[#allocation26_spill] sm:$0xff]  ;;  %v9349_v45 = vld [vmem:[#allocation109_spill] sm:$0xff] }
 0x684   :  { %v3655_v47 = vsel %vm3654_vm9, %v4673_v43, %v3651_v7  ;;  %v3560_v43 = vmul.f32 %v8557_v29, %v3559_v41  ;;  %v3712_v6 = vmul.f32 %v3690_v13, %v8107_v44  ;;  %v3710_v26 = vmul.f32 %v3685_v20, %v8093_v28 }
 0x685   :  { %v3660_v15 = vsel %vm3657_vm8, %v3659_v40, %v3655_v47  ;;  %v9340_v40 = vld [vmem:[#allocation20_spill] sm:$0xff]  ;;  %v3713_v47 = vmul.f32 %v3690_v13, %v8200_v14  ;;  %v3711_v31 = vmul.f32 %v3685_v20, %v8191_v5 }
 0x686   :  { %v3661_v55 = vmul.f32 %v8394_v59, %v3660_v15  ;;  %v3555_v59 = vsel %vm3552_vm3, %v3554_v4, %v3550_v12  ;;  %v3561_v58 = vadd.f32 %v8557_v29, %v3560_v43  ;;  %v3708_v43 = vmul.f32 %v3680_v56, %v8079_v51 }
 0x687   :  { %v3556_v11 = vmul.f32 %v8418_v42, %v3555_v59  ;;  %v3709_v12 = vmul.f32 %v3680_v56, %v8182_v54 }
 0x688   :  { %3669 = vperm.xlu2 %4563, %v3410_v24   ;;  %3755 = vperm.xlu0 %4561, %v3661_v55   ;;  %v3565_v1 = vsel %vm3564_vm6, %v8557_v29, %v3561_v58 }
 0x689   :  { %3664 = vperm.xlu1 %4562, %v3395_v62   ;;  %v3570_v36 = vsel %vm3567_vm10, %v3569_v32, %v3565_v1 }
 0x68a   :  { %v3571_v46 = vmul.f32 %v8415_v37, %v3570_v36  ;;  %v9348_v36 = vld [vmem:[#allocation36_spill] sm:$0xff] }
 0x690   :  { %3720 = vperm.xlu2 %4563, %v3556_v11   ;;  %3674 = vperm.xlu0 %4561, %v3425_v57   ;;  %v9347_v57 = vld [vmem:[#allocation28_spill] sm:$0xff] }
 0x698   :  { %3725 = vperm.xlu0 %4561, %v3571_v46  }
 0x6c2   :  { %v3736_v19 = vpop.permute.xlu2 %3735 }
 0x6c3   :  { %v3765_v44 = vmul.f32 %v3736_v19, %v9344_v0 }
 0x6c5   :  { %v3781_v60 = vadd.f32 %v3765_v44, %v3709_v12 }
 0x6da   :  { %v3751_v34 = vpop.permute.xlu2 %3750 }
 0x6db   :  { %v3770_v25 = vmul.f32 %v3751_v34, %v9339_v17  ;;  %v3771_v16 = vmul.f32 %v3751_v34, %v8005_v61 }
 0x6dd   :  { %v3787_v15 = vadd.f32 %v3771_v16, %v3715_v53  ;;  %v4763_v53 = vld [vmem:[%s8945_s9 + $0x18] sm:$0xff] }
 0x6e2   :  { %v3741_v42 = vpop.permute.xlu0 %3740  ;;  %v3670_v55 = vpop.permute.xlu2 %3669 }
 0x6e3   :  { %v3766_v61 = vmul.f32 %v3741_v42, %v9341_v38  ;;  %v3704_v46 = vmul.f32 %v3670_v55, %v9348_v36 }
 0x6e5   :  { %v3782_v22 = vadd.f32 %v3766_v61, %v3710_v26 }
 0x6ea   :  { %v3746_v8 = vpop.permute.xlu1 %3745  ;;  %v3721_v20 = vpop.permute.xlu2 %3720 }
 0x6eb   :  { %v3768_v10 = vmul.f32 %v3746_v8, %v9340_v40  ;;  %v3769_v21 = vmul.f32 %v3746_v8, %v7992_v18  ;;  %v9343_v18 = vld [vmem:[#allocation27_spill] sm:$0xff]  ;;  %v9351_v8 = vld [vmem:[#allocation33_spill] sm:$0xff]  ;;  %v4764_v40 = vld [vmem:[%s8945_s9 + $0x20] sm:$0xff] }
 0x6ec   :  { %v3764_v24 = vmul.f32 %v3736_v19, %v9343_v18  ;;  %v9350_v19 = vld [vmem:[#allocation25_spill] sm:$0xff] }
 0x6ed   :  { %v3784_v62 = vadd.f32 %v3768_v10, %v3712_v6  ;;  %v3785_v14 = vadd.f32 %v3769_v21, %v3713_v47  ;;  %v4765_v10 = vld [vmem:[%s8945_s9 + $0x28] sm:$0xff]  ;;  %v4766_v21 = vld [vmem:[%s8945_s9 + $0x30] sm:$0xff] }
 0x6ee   :  { %v3780_v58 = vadd.f32 %v3764_v24, %v3708_v43 }
 0x6f2   :  { %v3731_v9 = vpop.permute.xlu1 %3730 }
 0x6f3   :  { %v3762_v11 = vmul.f32 %v3731_v9, %v9346_v35  ;;  %v3763_v1 = vmul.f32 %v3731_v9, %v9347_v57 }
 0x6fa   :  { %v3756_v29 = vpop.permute.xlu0 %3755 }
 0x6fb   :  { %v3772_v37 = vmul.f32 %v3756_v29, %v7949_v48  ;;  %v3773_v7 = vmul.f32 %v3756_v29, %v8021_v39  ;;  %v3786_v48 = vadd.f32 %v3770_v25, %v3714_v52  ;;  %v9342_v39 = vld [vmem:[#allocation111_spill] sm:$0xff]  ;;  %v3665_v54 = vpop.permute.xlu1 %3664  ;;  %v9353_v29 = vld [vmem:[#allocation24_spill] sm:$0xff] }
 0x6fc   :  { %v3767_v27 = vmul.f32 %v3741_v42, %v9342_v39  ;;  %v3702_v13 = vmul.f32 %v3665_v54, %v9349_v45  ;;  %v3703_v23 = vmul.f32 %v3665_v54, %v8151_v63  ;;  %v3759_v17 = vmul.f32 %v3721_v20, %v9353_v29  ;;  %v4760_v63 = vld [vmem:[%s8945_s9] sm:$0xff]  ;;  %v4762_v52 = vld [vmem:[%s8945_s9 + $0x10] sm:$0xff] }
 0x6fd   :  { %v3788_v2 = vadd.f32 %v3772_v37, %v3716_v50  ;;  %v3789_v41 = vadd.f32 %v3773_v7, %v3717_v33  ;;  %v9352_v50 = vld [vmem:[#allocation59_spill] sm:$0xff] }
 0x6fe   :  { %v3783_v59 = vadd.f32 %v3767_v27, %v3711_v31  ;;  %v3758_v33 = vmul.f32 %v3721_v20, %v9352_v50  ;;  %v3775_v7 = vadd.f32 %v3759_v17, %v3703_v23  ;;  %v4768_v23 = vld [vmem:[%s8937_s0 + $0x8] sm:$0xff] }
 0x6ff   :  { %3798 = vmatpush.msrb.mxu2 %v3788_v2  ;;  %3839 = vmatpush.msra.mxu0 %v3789_v41  ;;  %v4767_v2 = vld [vmem:[%s8945_s9 + $0x38] sm:$0xff] }
 0x700   :  { %v3774_v37 = vadd.f32 %v3758_v33, %v3702_v13 }
 0x701   :  { %3799 = vmatpush.msrb.mxu2 %v3786_v48  ;;  %3840 = vmatpush.msra.mxu0 %v3787_v15 }
 0x702   :  { %v3675_v4 = vpop.permute.xlu0 %3674 }
 0x703   :  { %v3706_v28 = vmul.f32 %v3675_v4, %v9345_v49  ;;  %v3707_v5 = vmul.f32 %v3675_v4, %v8173_v30  ;;  %3800 = vmatpush.msrb.mxu2 %v3784_v62  ;;  %3841 = vmatpush.msra.mxu0 %v3785_v14  ;;  %v3705_v30 = vmul.f32 %v3670_v55, %v8162_v3  ;;  %v4761_v3 = vld [vmem:[%s8945_s9 + $0x8] sm:$0xff] }
 0x705   :  { %3801 = vmatpush.msrb.mxu2 %v3782_v22  ;;  %3842 = vmatpush.msra.mxu0 %v3783_v59  ;;  %v3778_v51 = vadd.f32 %v3762_v11, %v3706_v28  ;;  %v3779_v32 = vadd.f32 %v3763_v1, %v3707_v5 }
 0x707   :  { %3802 = vmatpush.msrb.mxu2 %v3780_v58  ;;  %3843 = vmatpush.msra.mxu0 %v3781_v60 }
 0x709   :  { %3803 = vmatpush.msrb.mxu2 %v3778_v51  ;;  %3844 = vmatpush.msra.mxu0 %v3779_v32 }
 0x70a   :  { %v3726_v56 = vpop.permute.xlu0 %3725 }
 0x70b   :  { %v3760_v42 = vmul.f32 %v3726_v56, %v9350_v19  ;;  %v3761_v34 = vmul.f32 %v3726_v56, %v9351_v8 }
 0x70d   :  { %v3776_v25 = vadd.f32 %v3760_v42, %v3704_v46  ;;  %v3777_v16 = vadd.f32 %v3761_v34, %v3705_v30 }
 0x70f   :  { %3804 = vmatpush.msrb.mxu2 %v3776_v25  ;;  %3845 = vmatpush.msra.mxu0 %v3777_v16 }
 0x711   :  { %3805 = vmatpush.msrb.mxu2 %v3774_v37  ;;  %3846 = vmatpush.msra.mxu0 %v3775_v7 }
 0x712   :  { %4507 = vmatmul.msk.f32.vlgmr.msrb.gmra.mxu2 %vm224_vm0, %v4760_v63  ;;  %4515 = vmatmul.msk.f32.vlgmr.msra.gmra.mxu0 %vm224_vm0, %v4760_v63 }
 0x71a   :  { %4508 = vmatmul.msk.f32.gmra.mxu2 %vm224_vm0, %v4761_v3  ;;  %4516 = vmatmul.msk.f32.gmra.mxu0 %vm224_vm0, %v4761_v3 }
 0x722   :  { %4509 = vmatmul.msk.f32.gmra.mxu2 %vm224_vm0, %v4762_v52  ;;  %4517 = vmatmul.msk.f32.gmra.mxu0 %vm224_vm0, %v4762_v52 }
 0x72a   :  { %4510 = vmatmul.msk.f32.gmra.mxu2 %vm224_vm0, %v4763_v53  ;;  %4518 = vmatmul.msk.f32.gmra.mxu0 %vm224_vm0, %v4763_v53 }
 0x732   :  { %4511 = vmatmul.msk.f32.gmra.mxu2 %vm224_vm0, %v4764_v40  ;;  %4519 = vmatmul.msk.f32.gmra.mxu0 %vm224_vm0, %v4764_v40 }
 0x73a   :  { %4512 = vmatmul.msk.f32.gmra.mxu2 %vm224_vm0, %v4765_v10  ;;  %4520 = vmatmul.msk.f32.gmra.mxu0 %vm224_vm0, %v4765_v10 }
 0x742   :  { %4513 = vmatmul.msk.f32.gmra.mxu2 %vm224_vm0, %v4766_v21  ;;  %4521 = vmatmul.msk.f32.gmra.mxu0 %vm224_vm0, %v4766_v21 }
 0x74a   :  { %4514 = vmatmul.msk.f32.gmra.mxu2 %vm224_vm0, %v4767_v2  ;;  %4522 = vmatmul.msk.f32.gmra.mxu0 %vm224_vm0, %v4767_v2 }
 0x78f   :  { %v3848_v41 = vpop.f32.mrf.mxu0 }
 0x790   :  { %v4524_v6 = vmul.f32 -1.442695, %v3848_v41 }
 0x792   :  { %4676 = vpow2.f32 %v4524_v6  ;;  %v4769_v6 = vld [vmem:[%s8937_s0] sm:$0xff] }
 0x795   :  { %v3807_v47 = vpop.f32.mrf.mxu2 }
 0x796   :  { %v4523_v38 = vmul.f32 -1.442695, %v3807_v47 }
 0x797   :  { %v3851_v61 = vpop.f32.mrf.mxu0 }
 0x798   :  { %v4677_v9 = vpop.eup %4676  ;;  %4678 = vpow2.f32 %v4523_v38  ;;  %v4526_v48 = vmul.f32 -1.442695, %v3851_v61 }
 0x799   :  { %v3921_v15 = vadd.f32 1.0, %v4677_v9 }
 0x79a   :  { %4680 = vpow2.f32 %v4526_v48 }
 0x79b   :  { %4682 = vrcp.f32 %v3921_v15  ;;  %v3960_v43 = vand.u32 2147483647, %v3921_v15  ;;  %v3962_v12 = vand.u32 2147483648, %v3921_v15  ;;  %vm3956_vm0 = vweird.f32 %v3921_v15 }
 0x79d   :  { %v3810_v39 = vpop.f32.mrf.mxu2  ;;  %vm3961_vm14 = vcmp.eq.f32.partialorder %v3960_v43, 8.507059e+37  ;;  %v3963_v51 = vor.u32 1.1754944e-38, %v3962_v12 }
 0x79e   :  { %v4679_v27 = vpop.eup %4678  ;;  %v4525_v26 = vmul.f32 -1.442695, %v3810_v39 }
 0x79f   :  { %v3920_v31 = vadd.f32 1.0, %v4679_v27  ;;  %v3854_v18 = vpop.f32.mrf.mxu0 }
 0x7a0   :  { %v4681_v24 = vpop.eup %4680  ;;  %4684 = vpow2.f32 %v4525_v26  ;;  %v4528_v55 = vmul.f32 -1.442695, %v3854_v18  ;;  %v4770_v18 = vld [vmem:[%s8937_s0 + $0x18] sm:$0xff] }
 0x7a1   :  { %v4683_v0 = vpop.eup %4682  ;;  %4686 = vrcp.f32 %v3920_v31  ;;  %v8690_v62 = vadd.f32 1.0, %v4681_v24  ;;  %v3945_v57 = vand.u32 2147483647, %v3920_v31  ;;  %v3947_v1 = vand.u32 2147483648, %v3920_v31 }
 0x7a2   :  { %v3952_v44 = vmul.f32 %v4683_v0, %v3921_v15  ;;  %4688 = vpow2.f32 %v4528_v55  ;;  %vm3957_vm11 = vweird.f32 %v4683_v0  ;;  %vm3941_vm2 = vweird.f32 %v3920_v31 }
 0x7a3   :  { %4690 = vrcp.f32 %v8690_v62  ;;  %vm3958_vm1 = vmor %vm3956_vm0, %vm3957_vm11  ;;  %v3990_v45 = vand.u32 2147483647, %v8690_v62  ;;  %vm8704_vm8 = vcmp.eq.f32.partialorder %v3945_v57, 8.507059e+37  ;;  %v3948_v8 = vor.u32 1.1754944e-38, %v3947_v1  ;;  %v4771_v1 = vld [vmem:[%s8937_s0 + $0x10] sm:$0xff] }
 0x7a4   :  { %v3953_v14 = vsub.f32 1.0, %v3952_v44  ;;  %v3992_v50 = vand.u32 2147483648, %v8690_v62  ;;  %vm3986_vm12 = vweird.f32 %v8690_v62 }
 0x7a5   :  { %v3813_v22 = vpop.f32.mrf.mxu2  ;;  %vm8719_vm15 = vcmp.eq.f32.partialorder %v3990_v45, 8.507059e+37 }
 0x7a6   :  { %v4685_v4 = vpop.eup %4684  ;;  %v3954_v59 = vmul.f32 %v4683_v0, %v3953_v14  ;;  %v4527_v49 = vmul.f32 -1.442695, %v3813_v22  ;;  %v3993_v2 = vor.u32 1.1754944e-38, %v3992_v50 }
 0x7a7   :  { %v4687_v28 = vpop.eup %4686  ;;  %v8693_v5 = vadd.f32 1.0, %v4685_v4  ;;  %v3857_v58 = vpop.f32.mrf.mxu0 }
 0x7a8   :  { %v4689_v60 = vpop.eup %4688  ;;  %v3937_v35 = vmul.f32 %v4687_v28, %v3920_v31  ;;  %v3955_v11 = vadd.f32 %v4683_v0, %v3954_v59  ;;  %4692 = vpow2.f32 %v4527_v49  ;;  %v4530_v30 = vmul.f32 -1.442695, %v3857_v58 }
 0x7a9   :  { %4694 = vrcp.f32 %v8693_v5  ;;  %v4691_v32 = vpop.eup %4690  ;;  %v8696_v46 = vadd.f32 1.0, %v4689_v60  ;;  %vm3942_vm9 = vweird.f32 %v4687_v28  ;;  %v3977_v37 = vand.u32 2147483648, %v8693_v5 }
 0x7aa   :  { %v3938_v54 = vsub.f32 1.0, %v3937_v35  ;;  %v3959_v36 = vsel %vm3958_vm1, %v4683_v0, %v3955_v11  ;;  %v3982_v56 = vmul.f32 %v4691_v32, %v8690_v62  ;;  %vm3943_vm5 = vmor %vm3941_vm2, %vm3942_vm9  ;;  %vm3987_vm13 = vweird.f32 %v4691_v32 }
 0x7ab   :  { %v3964_v20 = vsel %vm3961_vm14, %v3963_v51, %v3959_v36  ;;  %4696 = vrcp.f32 %v8696_v46  ;;  %vm3971_vm3 = vweird.f32 %v8693_v5  ;;  %v3975_v61 = vand.u32 2147483647, %v8693_v5  ;;  %vm3988_vm4 = vmor %vm3986_vm12, %vm3987_vm13 }
 0x7ac   :  { %v3939_v13 = vmul.f32 %v4687_v28, %v3938_v54  ;;  %v4177_v19 = vmul.f32 %v4768_v23, %v3964_v20  ;;  %v3983_v34 = vsub.f32 1.0, %v3982_v56  ;;  %4698 = vpow2.f32 %v4530_v30  ;;  %v4772_v23 = vld [vmem:[%s8937_s0 + $0x28] sm:$0xff] }
 0x7ad   :  { %v3816_v33 = vpop.f32.mrf.mxu2  ;;  %v3978_v9 = vor.u32 1.1754944e-38, %v3977_v37  ;;  %vm4016_vm6 = vweird.f32 %v8696_v46  ;;  %v4020_v43 = vand.u32 2147483647, %v8696_v46  ;;  %v4022_v12 = vand.u32 2147483648, %v8696_v46 }
 0x7ae   :  { %v4693_v29 = vpop.eup %4692  ;;  %v3940_v17 = vadd.f32 %v4687_v28, %v3939_v13  ;;  %4193 = vst [vmem:[%s8946_s11 + $0x8] sm:$0xff] %v4177_v19  ;;  %v4529_v25 = vmul.f32 -1.442695, %v3816_v33  ;;  %v3984_v7 = vmul.f32 %v4691_v32, %v3983_v34  ;;  %vm3976_vm11 = vcmp.eq.f32.partialorder %v3975_v61, 8.507059e+37 }
 0x7af   :  { %v4695_v16 = vpop.eup %4694  ;;  %v8716_v63 = vadd.f32 1.0, %v4693_v29  ;;  %v3860_v3 = vpop.f32.mrf.mxu0  ;;  %v4023_v54 = vor.u32 1.1754944e-38, %v4022_v12  ;;  %vm4021_vm1 = vcmp.eq.f32.partialorder %v4020_v43, 8.507059e+37  ;;  %v4774_v12 = vld [vmem:[%s8937_s0 + $0x38] sm:$0xff] }
 0x7b0   :  { %v3944_v52 = vsel %vm3943_vm5, %v4687_v28, %v3940_v17  ;;  %v3967_v53 = vmul.f32 %v4695_v16, %v8693_v5  ;;  %4700 = vpow2.f32 %v4529_v25  ;;  %v3985_v21 = vadd.f32 %v4691_v32, %v3984_v7 }
 0x7b1   :  { %v3949_v10 = vsel %vm8704_vm8, %v3948_v8, %v3944_v52  ;;  %4702 = vrcp.f32 %v8716_v63  ;;  %v4697_v41 = vpop.eup %4696  ;;  %v4532_v39 = vmul.f32 -1.442695, %v3860_v3  ;;  %vm3972_vm7 = vweird.f32 %v4695_v16 }
 0x7b2   :  { %v4176_v47 = vmul.f32 %v4769_v6, %v3949_v10  ;;  %v3968_v38 = vsub.f32 1.0, %v3967_v53  ;;  %v3989_v48 = vsel %vm3988_vm4, %v4691_v32, %v3985_v21  ;;  %v4012_v15 = vmul.f32 %v4697_v41, %v8696_v46  ;;  %v4699_v27 = vpop.eup %4698  ;;  %vm3973_vm0 = vmor %vm3971_vm3, %vm3972_vm7  ;;  %v4773_v21 = vld [vmem:[%s8937_s0 + $0x20] sm:$0xff] }
 0x7b3   :  { %v3994_v31 = vsel %vm8719_vm15, %v3993_v2, %v3989_v48  ;;  %v8744_v0 = vadd.f32 1.0, %v4699_v27  ;;  %4704 = vpow2.f32 %v4532_v39  ;;  %vm4017_vm10 = vweird.f32 %v4697_v41 }
 0x7b4   :  { %4192 = vst [vmem:[%s8946_s11] sm:$0xff] %v4176_v47  ;;  %v3969_v26 = vmul.f32 %v4695_v16, %v3968_v38  ;;  %v4179_v24 = vmul.f32 %v4770_v18, %v3994_v31  ;;  %v4013_v55 = vsub.f32 1.0, %v4012_v15  ;;  %v4005_v35 = vand.u32 2147483647, %v8716_v63  ;;  %vm4018_vm14 = vmor %vm4016_vm6, %vm4017_vm10 }
 0x7b5   :  { %v3819_v44 = vpop.f32.mrf.mxu2  ;;  %4706 = vrcp.f32 %v8744_v0  ;;  %v4007_v5 = vand.u32 2147483648, %v8716_v63  ;;  %vm4001_vm2 = vweird.f32 %v8716_v63  ;;  %v4050_v33 = vand.u32 2147483647, %v8744_v0 }
 0x7b6   :  { %v4701_v62 = vpop.eup %4700  ;;  %v3970_v14 = vadd.f32 %v4695_v16, %v3969_v26  ;;  %4195 = vst [vmem:[%s8946_s11 + $0x18] sm:$0xff] %v4179_v24  ;;  %v4014_v4 = vmul.f32 %v4697_v41, %v4013_v55  ;;  %v4531_v49 = vmul.f32 -1.442695, %v3819_v44  ;;  %vm8771_vm8 = vcmp.eq.f32.partialorder %v4005_v35, 8.507059e+37 }
 0x7b7   :  { %v4703_v22 = vpop.eup %4702  ;;  %v8754_v59 = vadd.f32 1.0, %v4701_v62  ;;  %v3863_v28 = vpop.f32.mrf.mxu0  ;;  %v4008_v46 = vor.u32 1.1754944e-38, %v4007_v5  ;;  %vm4046_vm5 = vweird.f32 %v8744_v0  ;;  %v4052_v10 = vand.u32 2147483648, %v8744_v0 }
 0x7b8   :  { %v3974_v58 = vsel %vm3973_vm0, %v4695_v16, %v3970_v14  ;;  %v3997_v60 = vmul.f32 %v4703_v22, %v8716_v63  ;;  %v4015_v57 = vadd.f32 %v4697_v41, %v4014_v4  ;;  %vm4002_vm9 = vweird.f32 %v4703_v22 }
 0x7b9   :  { %v3979_v11 = vsel %vm3976_vm11, %v3978_v9, %v3974_v58  ;;  %4708 = vrcp.f32 %v8754_v59  ;;  %v4705_v36 = vpop.eup %4704  ;;  %vm4003_vm12 = vmor %vm4001_vm2, %vm4002_vm9  ;;  %v4035_v25 = vand.u32 2147483647, %v8754_v59  ;;  %v4534_v16 = vmul.f32 -1.442695, %v3863_v28 }
 0x7ba   :  { %v4178_v51 = vmul.f32 %v4771_v1, %v3979_v11  ;;  %v3998_v32 = vsub.f32 1.0, %v3997_v60  ;;  %v4019_v30 = vsel %vm4018_vm14, %v4697_v41, %v4015_v57  ;;  %4710 = vpow2.f32 %v4531_v49  ;;  %v4775_v11 = vld [vmem:[%s8937_s0 + $0x30] sm:$0xff] }
 0x7bb   :  { %v4024_v56 = vsel %vm4021_vm1, %v4023_v54, %v4019_v30  ;;  %v4707_v45 = vpop.eup %4706  ;;  %v8778_v42 = vadd.f32 1.0, %v4705_v36  ;;  %v4037_v52 = vand.u32 2147483648, %v8754_v59  ;;  %vm4031_vm15 = vweird.f32 %v8754_v59 }
 0x7bc   :  { %4194 = vst [vmem:[%s8946_s11 + $0x10] sm:$0xff] %v4178_v51  ;;  %v3999_v20 = vmul.f32 %v4703_v22, %v3998_v32  ;;  %v4181_v19 = vmul.f32 %v4772_v23, %v4024_v56  ;;  %v4042_v50 = vmul.f32 %v4707_v45, %v8744_v0  ;;  %vm4047_vm13 = vweird.f32 %v4707_v45 }
 0x7bd   :  { %v3822_v8 = vpop.f32.mrf.mxu2  ;;  %4712 = vrcp.f32 %v8778_v42  ;;  %vm8805_vm4 = vcmp.eq.f32.partialorder %v4035_v25, 8.507059e+37  ;;  %vm4048_vm7 = vmor %vm4046_vm5, %vm4047_vm13  ;;  %vm4051_vm6 = vcmp.eq.f32.partialorder %v4050_v33, 8.507059e+37  ;;  %v4053_v39 = vor.u32 1.1754944e-38, %v4052_v10 }
 0x7be   :  { %v4000_v34 = vadd.f32 %v4703_v22, %v3999_v20  ;;  %v4533_v29 = vmul.f32 -1.442695, %v3822_v8  ;;  %4197 = vst [vmem:[%s8946_s11 + $0x28] sm:$0xff] %v4181_v19  ;;  %v4043_v53 = vsub.f32 1.0, %v4042_v50  ;;  %v4038_v31 = vor.u32 1.1754944e-38, %v4037_v52 }
 0x7bf   :  { %v4709_v17 = vpop.eup %4708  ;;  %v3866_v37 = vpop.f32.mrf.mxu0  ;;  %vm4076_vm0 = vweird.f32 %v8778_v42  ;;  %v4080_v0 = vand.u32 2147483647, %v8778_v42  ;;  %v4082_v58 = vand.u32 2147483648, %v8778_v42 }
 0x7c0   :  { %v4004_v7 = vsel %vm4003_vm12, %v4703_v22, %v4000_v34  ;;  %v4027_v3 = vmul.f32 %v4709_v17, %v8754_v59  ;;  %v4711_v63 = vpop.eup %4710  ;;  %4714 = vpow2.f32 %v4533_v29  ;;  %v4044_v6 = vmul.f32 %v4707_v45, %v4043_v53 }
 0x7c1   :  { %v4009_v40 = vsel %vm8771_vm8, %v4008_v46, %v4004_v7  ;;  %v8798_v47 = vadd.f32 1.0, %v4711_v63  ;;  %4716 = vpow2.f32 %v4534_v16  ;;  %v4536_v38 = vmul.f32 -1.442695, %v3866_v37 }
 0x7c2   :  { %v4180_v2 = vmul.f32 %v4773_v21, %v4009_v40  ;;  %v4028_v41 = vsub.f32 1.0, %v4027_v3  ;;  %vm4032_vm3 = vweird.f32 %v4709_v17  ;;  %v4045_v9 = vadd.f32 %v4707_v45, %v4044_v6 }
 0x7c3   :  { %4718 = vrcp.f32 %v8798_v47  ;;  %v4713_v48 = vpop.eup %4712  ;;  %vm4033_vm10 = vmor %vm4031_vm15, %vm4032_vm3  ;;  %vm4081_vm1 = vcmp.eq.f32.partialorder %v4080_v0, 8.507059e+37  ;;  %v4083_v20 = vor.u32 1.1754944e-38, %v4082_v58  ;;  %v4065_v56 = vand.u32 2147483647, %v8798_v47 }
 0x7c4   :  { %4196 = vst [vmem:[%s8946_s11 + $0x20] sm:$0xff] %v4180_v2  ;;  %v4029_v61 = vmul.f32 %v4709_v17, %v4028_v41  ;;  %4720 = vpow2.f32 %v4536_v38  ;;  %v4049_v18 = vsel %vm4048_vm7, %v4707_v45, %v4045_v9  ;;  %v4072_v24 = vmul.f32 %v4713_v48, %v8778_v42  ;;  %v4776_v42 = vld [vmem:[%s8937_s0 + $0x48] sm:$0xff]  ;;  %v4777_v41 = vld [vmem:[%s8937_s0 + $0x40] sm:$0xff] }
 0x7c5   :  { %v3825_v27 = vpop.f32.mrf.mxu2  ;;  %v4054_v44 = vsel %vm4051_vm6, %v4053_v39, %v4049_v18  ;;  %vm4077_vm11 = vweird.f32 %v4713_v48  ;;  %v4067_v45 = vand.u32 2147483648, %v8798_v47  ;;  %vm4061_vm9 = vweird.f32 %v8798_v47 }
 0x7c6   :  { %v4030_v26 = vadd.f32 %v4709_v17, %v4029_v61  ;;  %v4715_v55 = vpop.eup %4714  ;;  %v4535_v62 = vmul.f32 -1.442695, %v3825_v27  ;;  %v4183_v22 = vmul.f32 %v4774_v12, %v4054_v44  ;;  %v4073_v4 = vsub.f32 1.0, %v4072_v24  ;;  %vm4078_vm14 = vmor %vm4076_vm0, %vm4077_vm11 }
 0x7c7   :  { %v3869_v14 = vpop.f32.mrf.mxu0  ;;  %v8821_v49 = vadd.f32 1.0, %v4715_v55  ;;  %v4717_v28 = vpop.eup %4716  ;;  %v4068_v37 = vor.u32 1.1754944e-38, %v4067_v45  ;;  %vm4066_vm12 = vcmp.eq.f32.partialorder %v4065_v56, 8.507059e+37 }
 0x7c8   :  { %v4034_v43 = vsel %vm4033_vm10, %v4709_v17, %v4030_v26  ;;  %4722 = vpow2.f32 %v4535_v62  ;;  %v4538_v60 = vmul.f32 -1.442695, %v3869_v14  ;;  %4199 = vst [vmem:[%s8946_s11 + $0x38] sm:$0xff] %v4183_v22  ;;  %v4074_v57 = vmul.f32 %v4713_v48, %v4073_v4 }
 0x7c9   :  { %v4039_v59 = vsel %vm8805_vm4, %v4038_v31, %v4034_v43  ;;  %v4719_v35 = vpop.eup %4718  ;;  %4724 = vrcp.f32 %v8821_v49  ;;  %v8837_v54 = vadd.f32 1.0, %v4717_v28  ;;  %v4095_v50 = vand.u32 2147483647, %v8821_v49  ;;  %v4778_v43 = vld [vmem:[%s8937_s0 + $0x50] sm:$0xff] }
 0x7ca   :  { %v4182_v5 = vmul.f32 %v4775_v11, %v4039_v59  ;;  %v4721_v1 = vpop.eup %4720  ;;  %v4057_v51 = vmul.f32 %v4719_v35, %v8798_v47  ;;  %v4075_v32 = vadd.f32 %v4713_v48, %v4074_v57  ;;  %4726 = vpow2.f32 %v4538_v60 }
 0x7cb   :  { %v8839_v36 = vadd.f32 1.0, %v4721_v1  ;;  %4728 = vrcp.f32 %v8837_v54  ;;  %vm4062_vm2 = vweird.f32 %v4719_v35  ;;  %v4097_v33 = vand.u32 2147483648, %v8821_v49 }
 0x7cc   :  { %4198 = vst [vmem:[%s8946_s11 + $0x30] sm:$0xff] %v4182_v5  ;;  %v4058_v30 = vsub.f32 1.0, %v4057_v51  ;;  %v4079_v13 = vsel %vm4078_vm14, %v4713_v48, %v4075_v32  ;;  %vm4063_vm8 = vmor %vm4061_vm9, %vm4062_vm2  ;;  %vm4091_vm5 = vweird.f32 %v8821_v49  ;;  %vm8861_vm13 = vcmp.eq.f32.partialorder %v4095_v50, 8.507059e+37  ;;  %v4779_v32 = vld [vmem:[%s8937_s0 + $0x58] sm:$0xff] }
 0x7cd   :  { %v4084_v19 = vsel %vm4081_vm1, %v4083_v20, %v4079_v13  ;;  %4730 = vrcp.f32 %v8839_v36  ;;  %v3828_v16 = vpop.f32.mrf.mxu2  ;;  %v4098_v10 = vor.u32 1.1754944e-38, %v4097_v33  ;;  %vm4106_vm3 = vweird.f32 %v8837_v54 }
 0x7ce   :  { %v4723_v46 = vpop.eup %4722  ;;  %v4059_v23 = vmul.f32 %v4719_v35, %v4058_v30  ;;  %v4185_v34 = vmul.f32 %v4776_v42, %v4084_v19  ;;  %v4537_v21 = vmul.f32 -1.442695, %v3828_v16  ;;  %v4110_v61 = vand.u32 2147483647, %v8837_v54 }
 0x7cf   :  { %v4725_v8 = vpop.eup %4724  ;;  %v8852_v29 = vadd.f32 1.0, %v4723_v46  ;;  %v4112_v9 = vand.u32 2147483648, %v8837_v54  ;;  %vm4136_vm7 = vweird.f32 %v8839_v36  ;;  %v4140_v18 = vand.u32 2147483647, %v8839_v36 }
 0x7d0   :  { %v4060_v17 = vadd.f32 %v4719_v35, %v4059_v23  ;;  %v4087_v25 = vmul.f32 %v4725_v8, %v8821_v49  ;;  %4201 = vst [vmem:[%s8946_s11 + $0x48] sm:$0xff] %v4185_v34  ;;  %v4727_v7 = vpop.eup %4726  ;;  %vm4092_vm15 = vweird.f32 %v4725_v8  ;;  %v4142_v24 = vand.u32 2147483648, %v8839_v36 }
 0x7d1   :  { %4732 = vrcp.f32 %v8852_v29  ;;  %v4729_v53 = vpop.eup %4728  ;;  %v8876_v27 = vadd.f32 1.0, %v4727_v7  ;;  %vm4093_vm4 = vmor %vm4091_vm5, %vm4092_vm15  ;;  %vm4111_vm0 = vcmp.eq.f32.partialorder %v4110_v61, 8.507059e+37  ;;  %v4113_v49 = vor.u32 1.1754944e-38, %v4112_v9 }
 0x7d2   :  { %v4064_v3 = vsel %vm4063_vm8, %v4719_v35, %v4060_v17  ;;  %v4088_v52 = vsub.f32 1.0, %v4087_v25  ;;  %v4102_v38 = vmul.f32 %v4729_v53, %v8837_v54  ;;  %4734 = vpow2.f32 %v4537_v21 }
 0x7d3   :  { %v4069_v63 = vsel %vm4066_vm12, %v4068_v37, %v4064_v3  ;;  %v4731_v2 = vpop.eup %4730  ;;  %vm4107_vm6 = vweird.f32 %v4729_v53  ;;  %4736 = vrcp.f32 %v8876_v27  ;;  %v4125_v28 = vand.u32 2147483647, %v8852_v29 }
 0x7d4   :  { %v4184_v6 = vmul.f32 %v4777_v41, %v4069_v63  ;;  %v4089_v47 = vmul.f32 %v4725_v8, %v4088_v52  ;;  %v4132_v48 = vmul.f32 %v4731_v2, %v8839_v36  ;;  %v4103_v39 = vsub.f32 1.0, %v4102_v38  ;;  %vm4108_vm11 = vmor %vm4106_vm3, %vm4107_vm6  ;;  %v4780_v36 = vld [vmem:[%s8937_s0 + $0x68] sm:$0xff]  ;;  %v4783_v38 = vld [vmem:[%s8937_s0 + $0x70] sm:$0xff] }
 0x7d5   :  { %vm4137_vm10 = vweird.f32 %v4731_v2  ;;  %v4127_v59 = vand.u32 2147483648, %v8852_v29  ;;  %v4143_v5 = vor.u32 1.1754944e-38, %v4142_v24  ;;  %vm4141_vm2 = vcmp.eq.f32.partialorder %v4140_v18, 8.507059e+37 }
 0x7d6   :  { %4200 = vst [vmem:[%s8946_s11 + $0x40] sm:$0xff] %v4184_v6  ;;  %v4090_v15 = vadd.f32 %v4725_v8, %v4089_v47  ;;  %v4133_v31 = vsub.f32 1.0, %v4132_v48  ;;  %v4104_v44 = vmul.f32 %v4729_v53, %v4103_v39  ;;  %vm4138_vm1 = vmor %vm4136_vm7, %vm4137_vm10  ;;  %vm4121_vm9 = vweird.f32 %v8852_v29 }
 0x7d7   :  { %v4733_v26 = vpop.eup %4732  ;;  %v4128_v45 = vor.u32 1.1754944e-38, %v4127_v59  ;;  %vm4126_vm12 = vcmp.eq.f32.partialorder %v4125_v28, 8.507059e+37  ;;  %v4172_v50 = vand.u32 2147483648, %v8876_v27  ;;  %vm4166_vm5 = vweird.f32 %v8876_v27 }
 0x7d8   :  { %v4094_v55 = vsel %vm4093_vm4, %v4725_v8, %v4090_v15  ;;  %v4117_v0 = vmul.f32 %v4733_v26, %v8852_v29  ;;  %v4134_v14 = vmul.f32 %v4731_v2, %v4133_v31  ;;  %v4105_v22 = vadd.f32 %v4729_v53, %v4104_v44  ;;  %v4735_v60 = vpop.eup %4734  ;;  %v4781_v8 = vld [vmem:[%s8937_s0 + $0x60] sm:$0xff] }
 0x7d9   :  { %v4099_v62 = vsel %vm8861_vm13, %v4098_v10, %v4094_v55  ;;  %vm4122_vm14 = vweird.f32 %v4733_v26  ;;  %v3934_v51 = vadd.f32 1.0, %v4735_v60  ;;  %v4737_v56 = vpop.eup %4736  ;;  %v4170_v29 = vand.u32 2147483647, %v8876_v27  ;;  %v4782_v10 = vld [vmem:[%s8937_s0 + $0x78] sm:$0xff] }
 0x7da   :  { %v4186_v12 = vmul.f32 %v4778_v43, %v4099_v62  ;;  %v4118_v4 = vsub.f32 1.0, %v4117_v0  ;;  %v4135_v58 = vadd.f32 %v4731_v2, %v4134_v14  ;;  %v4109_v35 = vsel %vm4108_vm11, %v4729_v53, %v4105_v22  ;;  %vm4123_vm8 = vmor %vm4121_vm9, %vm4122_vm14 }
 0x7db   :  { %v4114_v57 = vsel %vm4111_vm0, %v4113_v49, %v4109_v35  ;;  %4738 = vrcp.f32 %v3934_v51  ;;  %v4162_v23 = vmul.f32 %v4737_v56, %v8876_v27  ;;  %vm4167_vm13 = vweird.f32 %v4737_v56 }
 0x7dc   :  { %4202 = vst [vmem:[%s8946_s11 + $0x50] sm:$0xff] %v4186_v12  ;;  %v4119_v11 = vmul.f32 %v4733_v26, %v4118_v4  ;;  %v4139_v1 = vsel %vm4138_vm1, %v4731_v2, %v4135_v58  ;;  %v4187_v54 = vmul.f32 %v4779_v32, %v4114_v57  ;;  %vm4168_vm15 = vmor %vm4166_vm5, %vm4167_vm13  ;;  %v4173_v37 = vor.u32 1.1754944e-38, %v4172_v50 }
 0x7dd   :  { %v4144_v20 = vsel %vm4141_vm2, %v4143_v5, %v4139_v1  ;;  %v4163_v34 = vsub.f32 1.0, %v4162_v23  ;;  %vm4171_vm3 = vcmp.eq.f32.partialorder %v4170_v29, 8.507059e+37  ;;  %v4157_v52 = vand.u32 2147483648, %v3934_v51 }
 0x7de   :  { %v4120_v30 = vadd.f32 %v4733_v26, %v4119_v11  ;;  %v4189_v13 = vmul.f32 %v4780_v36, %v4144_v20  ;;  %4203 = vst [vmem:[%s8946_s11 + $0x58] sm:$0xff] %v4187_v54  ;;  %v4155_v40 = vand.u32 2147483647, %v3934_v51  ;;  %vm4151_vm7 = vweird.f32 %v3934_v51 }
 0x7df   :  { %v4164_v33 = vmul.f32 %v4737_v56, %v4163_v34  ;;  %v4158_v41 = vor.u32 1.1754944e-38, %v4157_v52 }
 0x7e0   :  { %v4124_v46 = vsel %vm4123_vm8, %v4733_v26, %v4120_v30  ;;  %4205 = vst [vmem:[%s8946_s11 + $0x68] sm:$0xff] %v4189_v13  ;;  %vm4156_vm10 = vcmp.eq.f32.partialorder %v4155_v40, 8.507059e+37 }
 0x7e1   :  { %v4129_v19 = vsel %vm4126_vm12, %v4128_v45, %v4124_v46  ;;  %v4739_v17 = vpop.eup %4738  ;;  %v4165_v16 = vadd.f32 %v4737_v56, %v4164_v33 }
 0x7e2   :  { %v4188_v42 = vmul.f32 %v4781_v8, %v4129_v19  ;;  %v4147_v25 = vmul.f32 %v4739_v17, %v3934_v51  ;;  %vm4152_vm4 = vweird.f32 %v4739_v17 }
 0x7e3   :  { %v4169_v3 = vsel %vm4168_vm15, %v4737_v56, %v4165_v16  ;;  %vm4153_vm6 = vmor %vm4151_vm7, %vm4152_vm4 }
 0x7e4   :  { %4204 = vst [vmem:[%s8946_s11 + $0x60] sm:$0xff] %v4188_v42  ;;  %v4148_v7 = vsub.f32 1.0, %v4147_v25  ;;  %v4174_v53 = vsel %vm4171_vm3, %v4173_v37, %v4169_v3 }
 0x7e5   :  { %v4191_v21 = vmul.f32 %v4782_v10, %v4174_v53 }
 0x7e6   :  { %v4149_v63 = vmul.f32 %v4739_v17, %v4148_v7 }
 0x7e7   :  { %4207 = vst [vmem:[%s8946_s11 + $0x78] sm:$0xff] %v4191_v21 }
 0x7e8   :  { %v4150_v2 = vadd.f32 %v4739_v17, %v4149_v63 }
 0x7ea   :  { %v4154_v6 = vsel %vm4153_vm6, %v4739_v17, %v4150_v2 }
 0x7eb   :  { %v4159_v47 = vsel %vm4156_vm10, %v4158_v41, %v4154_v6 }
 0x7ec   :  { %v4190_v61 = vmul.f32 %v4783_v38, %v4159_v47 }
 0x7ee   :  { %4206 = vst [vmem:[%s8946_s11 + $0x70] sm:$0xff] %v4190_v61 }

</bundles_post_ra>
